<compile_context>
chip_gen: v6e
topology: v6e:2x2x1
jax: 0.10.0
libtpu: 0.0.40
codegen_flags: <defaults>
</compile_context>

<pallas_src>
import jax
import jax.numpy as jnp
from jax import lax
from jax.experimental import pallas as pl
from jax.experimental.pallas import tpu as pltpu


# ----------------------------------------------------------------------------
# Fused kernel: conv1 -> bn1 -> relu -> conv2 -> bn2 -> (+x) -> relu
# ----------------------------------------------------------------------------
def _resblock_kernel(x_ref, w1_ref, s1_ref, b1_ref, w2_ref, s2_ref, b2_ref,
                     o_ref, xp_ref, y1p_ref):
    """One batch element per grid step.

    x_ref : (1, H, W, C)      f32  input tile (unpadded)
    w1_ref: (3, 3, C, C)      bf16 conv1 weights (HWIO)
    s1/b1 : (1, C)            f32  folded BN1 scale / bias
    w2_ref: (3, 3, C, C)      bf16 conv2 weights (HWIO)
    s2/b2 : (1, C)            f32  folded BN2 scale / bias
    o_ref : (1, H, W, C)      f32  output tile
    xp_ref : (H+2, W+2, C)    f32  VMEM scratch: halo-padded x
    y1p_ref: (H+2, W+2, C)    f32  VMEM scratch: halo-padded intermediate y1
    """
    H, W, Cout = o_ref.shape[1], o_ref.shape[2], o_ref.shape[3]
    Cin = x_ref.shape[3]

    # ---- in-kernel halo padding of x (no host-side jnp.pad) ----
    xp_ref[...] = jnp.zeros_like(xp_ref)
    xp_ref[1:H + 1, 1:W + 1, :] = x_ref[0]

    # ---- conv1 (bf16 MXU, f32 accum) + folded BN1 + ReLU ----
    acc1 = jnp.zeros((H * W, Cout), jnp.float32)
    for dy in range(3):
        for dx in range(3):
            patch = xp_ref[dy:dy + H, dx:dx + W, :].reshape(H * W, Cin)
            acc1 = acc1 + jnp.dot(patch.astype(jnp.bfloat16), w1_ref[dy, dx],
                                  preferred_element_type=jnp.float32)
    y1 = jnp.maximum(acc1 * s1_ref[...] + b1_ref[...], 0.0)   # (H*W, Cout) f32

    # ---- intermediate stays in VMEM (never written to HBM), re-padded ----
    y1p_ref[...] = jnp.zeros_like(y1p_ref)
    y1p_ref[1:H + 1, 1:W + 1, :] = y1.reshape(H, W, Cout)

    # ---- conv2 + folded BN2 + residual add (x tile already resident) + ReLU ----
    acc2 = jnp.zeros((H * W, Cout), jnp.float32)
    for dy in range(3):
        for dx in range(3):
            patch = y1p_ref[dy:dy + H, dx:dx + W, :].reshape(H * W, Cout)
            acc2 = acc2 + jnp.dot(patch.astype(jnp.bfloat16), w2_ref[dy, dx],
                                  preferred_element_type=jnp.float32)
    y2 = acc2 * s2_ref[...] + b2_ref[...] + x_ref[0].reshape(H * W, Cin)
    o_ref[...] = jnp.maximum(y2, 0.0).reshape(1, H, W, Cout).astype(o_ref.dtype)


# ----------------------------------------------------------------------------
# Wrapper
# ----------------------------------------------------------------------------
def _fold_bn(gamma, beta, mean, var, eps=1e-5):
    scale = gamma / jnp.sqrt(var + eps)
    bias = beta - mean * scale
    return scale.reshape(1, -1).astype(jnp.float32), bias.reshape(1, -1).astype(jnp.float32)


def res_block_forward(x_nchw, params):
    """ResBlock forward. x_nchw: (N, C, H, W) float32. Returns (N, C, H, W)."""
    (w1, g1, be1, m1, v1, w2, g2, be2, m2, v2) = params
    N, C, H, W = x_nchw.shape
    if not (w1.shape[0] == C and w1.shape[1] == C and
            w2.shape[0] == C and w2.shape[1] == C):
        # identity shortcut (right=None) silently requires Cin == Cout, stride == 1
        raise ValueError("identity-shortcut ResBlock requires inchannel == outchannel")

    # NCHW -> NHWC (kept so the module's NCHW contract is preserved; drop if the
    # call site can supply/consume NHWC directly).
    x = jnp.transpose(x_nchw, (0, 2, 3, 1)).astype(jnp.float32)

    # torch Conv2d weight (Cout, Cin, kh, kw) -> HWIO, cast once to bf16 (halves DMA bytes).
    w1_hwio = jnp.transpose(w1, (2, 3, 1, 0)).astype(jnp.bfloat16)
    w2_hwio = jnp.transpose(w2, (2, 3, 1, 0)).astype(jnp.bfloat16)

    s1, b1 = _fold_bn(g1, be1, m1, v1)
    s2, b2 = _fold_bn(g2, be2, m2, v2)

    out = pl.pallas_call(
        _resblock_kernel,
        out_shape=jax.ShapeDtypeStruct((N, H, W, C), jnp.float32),
        grid=(N,),
        in_specs=[
            pl.BlockSpec((1, H, W, C), lambda n: (n, 0, 0, 0)),
            pl.BlockSpec((3, 3, C, C), lambda n: (0, 0, 0, 0)),
            pl.BlockSpec((1, C), lambda n: (0, 0)),
            pl.BlockSpec((1, C), lambda n: (0, 0)),
            pl.BlockSpec((3, 3, C, C), lambda n: (0, 0, 0, 0)),
            pl.BlockSpec((1, C), lambda n: (0, 0)),
            pl.BlockSpec((1, C), lambda n: (0, 0)),
        ],
        out_specs=pl.BlockSpec((1, H, W, C), lambda n: (n, 0, 0, 0)),
        scratch_shapes=[
            pltpu.VMEM((H + 2, W + 2, C), jnp.float32),   # padded x
            pltpu.VMEM((H + 2, W + 2, C), jnp.float32),   # padded y1 (fused intermediate)
        ],
        compiler_params=pltpu.CompilerParams(
            dimension_semantics=("parallel",),
            vmem_limit_bytes=32 * 1024 * 1024),
    )(x, w1_hwio, s1, b1, w2_hwio, s2, b2)

    # NHWC -> NCHW
    return jnp.transpose(out, (0, 3, 1, 2))


# ----------------------------------------------------------------------------
# Pure-JAX reference (matches the kernel's bf16-operand / f32-accumulate MXU math)
# ----------------------------------------------------------------------------
def _ref_forward(x_nchw, params):
    (w1, g1, be1, m1, v1, w2, g2, be2, m2, v2) = params
    x = jnp.transpose(x_nchw, (0, 2, 3, 1)).astype(jnp.float32)
    w1_hwio = jnp.transpose(w1, (2, 3, 1, 0)).astype(jnp.bfloat16)
    w2_hwio = jnp.transpose(w2, (2, 3, 1, 0)).astype(jnp.bfloat16)
    s1, b1 = _fold_bn(g1, be1, m1, v1)
    s2, b2 = _fold_bn(g2, be2, m2, v2)
    dn = ("NHWC", "HWIO", "NHWC")
    y = lax.conv_general_dilated(x.astype(jnp.bfloat16), w1_hwio, (1, 1), "SAME",
                                 dimension_numbers=dn,
                                 preferred_element_type=jnp.float32)
    y = jnp.maximum(y * s1 + b1, 0.0)
    y2 = lax.conv_general_dilated(y.astype(jnp.bfloat16), w2_hwio, (1, 1), "SAME",
                                  dimension_numbers=dn,
                                  preferred_element_type=jnp.float32)
    y2 = y2 * s2 + b2 + x
    out = jnp.maximum(y2, 0.0)
    return jnp.transpose(out, (0, 3, 1, 2))


# ----------------------------------------------------------------------------
# Main
# ----------------------------------------------------------------------------
if __name__ == "__main__":
    N, C, H, W = 2, 8, 16, 16   # identity shortcut => inchannel == outchannel, stride == 1
    key = jax.random.PRNGKey(0)
    (k_x, k_w1, k_w2, k_g1, k_b1, k_m1, k_v1,
     k_g2, k_b2, k_m2, k_v2) = jax.random.split(key, 11)

    x = jax.random.normal(k_x, (N, C, H, W), jnp.float32)

    # Deterministic parameter init (shapes match nn.Conv2d / nn.BatchNorm2d).
    w1 = jax.random.normal(k_w1, (C, C, 3, 3), jnp.float32) * 0.1   # Conv2d(C, C, 3)
    w2 = jax.random.normal(k_w2, (C, C, 3, 3), jnp.float32) * 0.1
    g1 = 1.0 + 0.1 * jax.random.normal(k_g1, (C,), jnp.float32)     # BN gamma
    be1 = 0.1 * jax.random.normal(k_b1, (C,), jnp.float32)          # BN beta
    m1 = 0.1 * jax.random.normal(k_m1, (C,), jnp.float32)           # running_mean
    v1 = jnp.abs(1.0 + 0.1 * jax.random.normal(k_v1, (C,), jnp.float32))  # running_var
    g2 = 1.0 + 0.1 * jax.random.normal(k_g2, (C,), jnp.float32)
    be2 = 0.1 * jax.random.normal(k_b2, (C,), jnp.float32)
    m2 = 0.1 * jax.random.normal(k_m2, (C,), jnp.float32)
    v2 = jnp.abs(1.0 + 0.1 * jax.random.normal(k_v2, (C,), jnp.float32))

    params = (w1, g1, be1, m1, v1, w2, g2, be2, m2, v2)

    out = jax.jit(res_block_forward)(x, params)
    out = jax.block_until_ready(out)

    ref = jax.block_until_ready(_ref_forward(x, params))

    assert out.shape == (N, C, H, W)
    assert jnp.allclose(out, ref, atol=1e-2, rtol=1e-2), (
        f"max abs diff {float(jnp.max(jnp.abs(out - ref)))}")

    print("KERNEL_OK")
</pallas_src>

<mosaic_0001>
module attributes {stable_mosaic.version = 11 : i64} {
  func.func @_resblock_kernel(%arg0: i32, %arg1: memref<1x16x16x8xf32, #tpu.memory_space<vmem>>, %arg2: memref<3x3x8x8xbf16, #tpu.memory_space<vmem>>, %arg3: memref<1x8xf32, #tpu.memory_space<vmem>>, %arg4: memref<1x8xf32, #tpu.memory_space<vmem>>, %arg5: memref<3x3x8x8xbf16, #tpu.memory_space<vmem>>, %arg6: memref<1x8xf32, #tpu.memory_space<vmem>>, %arg7: memref<1x8xf32, #tpu.memory_space<vmem>>, %arg8: memref<1x16x16x8xf32, #tpu.memory_space<vmem>>, %arg9: memref<18x18x8xf32, #tpu.memory_space<vmem>>, %arg10: memref<18x18x8xf32, #tpu.memory_space<vmem>>) attributes {dimension_semantics = [#tpu.dimension_semantics<parallel>], iteration_bounds = array<i64: 2>, scalar_prefetch = 0 : i64, scratch_operands = 2 : i64, tpu.core_type = #tpu.core_type<tc>, window_params = [{transform_indices = @transform_0, window_bounds = array<i64: 1, 16, 16, 8>}, {pipeline_mode = #tpu.pipeline_mode<synchronous>, transform_indices = @transform_1, window_bounds = array<i64: 3, 3, 8, 8>}, {pipeline_mode = #tpu.pipeline_mode<synchronous>, transform_indices = @transform_2, window_bounds = array<i64: 1, 8>}, {pipeline_mode = #tpu.pipeline_mode<synchronous>, transform_indices = @transform_3, window_bounds = array<i64: 1, 8>}, {pipeline_mode = #tpu.pipeline_mode<synchronous>, transform_indices = @transform_4, window_bounds = array<i64: 3, 3, 8, 8>}, {pipeline_mode = #tpu.pipeline_mode<synchronous>, transform_indices = @transform_5, window_bounds = array<i64: 1, 8>}, {pipeline_mode = #tpu.pipeline_mode<synchronous>, transform_indices = @transform_6, window_bounds = array<i64: 1, 8>}, {transform_indices = @transform_7, window_bounds = array<i64: 1, 16, 16, 8>}]} {
    %cst = arith.constant 0.000000e+00 : f32
    %0 = vector.broadcast %cst : f32 to vector<18x18x8xf32>
    %c0 = arith.constant 0 : index
    %c0_0 = arith.constant 0 : index
    %c0_1 = arith.constant 0 : index
    %1 = vector.load %arg9[%c0, %c0_0, %c0_1] : memref<18x18x8xf32, #tpu.memory_space<vmem>>, vector<18x18x8xf32>
    tpu.vector_store %arg9[%c0, %c0_0, %c0_1], %0 {strides = array<i32>} : memref<18x18x8xf32, #tpu.memory_space<vmem>>, vector<18x18x8xf32>,
    %c0_2 = arith.constant 0 : index
    %c0_3 = arith.constant 0 : index
    %c0_4 = arith.constant 0 : index
    %c0_5 = arith.constant 0 : index
    %2 = vector.load %arg1[%c0_2, %c0_3, %c0_4, %c0_5] : memref<1x16x16x8xf32, #tpu.memory_space<vmem>>, vector<1x16x16x8xf32>
    %3 = vector.shape_cast %2 : vector<1x16x16x8xf32> to vector<16x16x8xf32>
    %c1 = arith.constant 1 : index
    %c1_6 = arith.constant 1 : index
    %c0_7 = arith.constant 0 : index
    %4 = vector.load %arg9[%c1, %c1_6, %c0_7] : memref<18x18x8xf32, #tpu.memory_space<vmem>>, vector<16x16x8xf32>
    tpu.vector_store %arg9[%c1, %c1_6, %c0_7], %3 {strides = array<i32>} : memref<18x18x8xf32, #tpu.memory_space<vmem>>, vector<16x16x8xf32>,
    %cst_8 = arith.constant 0.000000e+00 : f32
    %5 = vector.broadcast %cst_8 : f32 to vector<256x8xf32>
    %c0_9 = arith.constant 0 : index
    %c0_10 = arith.constant 0 : index
    %c0_11 = arith.constant 0 : index
    %6 = vector.load %arg9[%c0_9, %c0_10, %c0_11] : memref<18x18x8xf32, #tpu.memory_space<vmem>>, vector<16x16x8xf32>
    %7 = vector.shape_cast %6 : vector<16x16x8xf32> to vector<256x8xf32>
    %8 = arith.truncf %7 : vector<256x8xf32> to vector<256x8xbf16>
    %c0_12 = arith.constant 0 : index
    %c0_13 = arith.constant 0 : index
    %c0_14 = arith.constant 0 : index
    %c0_15 = arith.constant 0 : index
    %9 = vector.load %arg2[%c0_12, %c0_13, %c0_14, %c0_15] : memref<3x3x8x8xbf16, #tpu.memory_space<vmem>>, vector<1x1x8x8xbf16>
    %10 = vector.shape_cast %9 : vector<1x1x8x8xbf16> to vector<8x8xbf16>
    %cst_16 = arith.constant dense<0.000000e+00> : vector<256x8xf32>
    %11 = tpu.matmul %8, %10, %cst_16 {dimension_numbers = #tpu.dot_dimension_numbers<[1], [0], [0], [1], [0, 0, 1, 1], [], []>} : vector<256x8xbf16>, vector<8x8xbf16>, vector<256x8xf32> -> vector<256x8xf32>
    %12 = arith.addf %5, %11 : vector<256x8xf32>
    %c0_17 = arith.constant 0 : index
    %c1_18 = arith.constant 1 : index
    %c0_19 = arith.constant 0 : index
    %13 = vector.load %arg9[%c0_17, %c1_18, %c0_19] : memref<18x18x8xf32, #tpu.memory_space<vmem>>, vector<16x16x8xf32>
    %14 = vector.shape_cast %13 : vector<16x16x8xf32> to vector<256x8xf32>
    %15 = arith.truncf %14 : vector<256x8xf32> to vector<256x8xbf16>
    %c0_20 = arith.constant 0 : index
    %c1_21 = arith.constant 1 : index
    %c0_22 = arith.constant 0 : index
    %c0_23 = arith.constant 0 : index
    %16 = vector.load %arg2[%c0_20, %c1_21, %c0_22, %c0_23] : memref<3x3x8x8xbf16, #tpu.memory_space<vmem>>, vector<1x1x8x8xbf16>
    %17 = vector.shape_cast %16 : vector<1x1x8x8xbf16> to vector<8x8xbf16>
    %cst_24 = arith.constant dense<0.000000e+00> : vector<256x8xf32>
    %18 = tpu.matmul %15, %17, %cst_24 {dimension_numbers = #tpu.dot_dimension_numbers<[1], [0], [0], [1], [0, 0, 1, 1], [], []>} : vector<256x8xbf16>, vector<8x8xbf16>, vector<256x8xf32> -> vector<256x8xf32>
    %19 = arith.addf %12, %18 : vector<256x8xf32>
    %c0_25 = arith.constant 0 : index
    %c2 = arith.constant 2 : index
    %c0_26 = arith.constant 0 : index
    %20 = vector.load %arg9[%c0_25, %c2, %c0_26] : memref<18x18x8xf32, #tpu.memory_space<vmem>>, vector<16x16x8xf32>
    %21 = vector.shape_cast %20 : vector<16x16x8xf32> to vector<256x8xf32>
    %22 = arith.truncf %21 : vector<256x8xf32> to vector<256x8xbf16>
    %c0_27 = arith.constant 0 : index
    %c2_28 = arith.constant 2 : index
    %c0_29 = arith.constant 0 : index
    %c0_30 = arith.constant 0 : index
    %23 = vector.load %arg2[%c0_27, %c2_28, %c0_29, %c0_30] : memref<3x3x8x8xbf16, #tpu.memory_space<vmem>>, vector<1x1x8x8xbf16>
    %24 = vector.shape_cast %23 : vector<1x1x8x8xbf16> to vector<8x8xbf16>
    %cst_31 = arith.constant dense<0.000000e+00> : vector<256x8xf32>
    %25 = tpu.matmul %22, %24, %cst_31 {dimension_numbers = #tpu.dot_dimension_numbers<[1], [0], [0], [1], [0, 0, 1, 1], [], []>} : vector<256x8xbf16>, vector<8x8xbf16>, vector<256x8xf32> -> vector<256x8xf32>
    %26 = arith.addf %19, %25 : vector<256x8xf32>
    %c1_32 = arith.constant 1 : index
    %c0_33 = arith.constant 0 : index
    %c0_34 = arith.constant 0 : index
    %27 = vector.load %arg9[%c1_32, %c0_33, %c0_34] : memref<18x18x8xf32, #tpu.memory_space<vmem>>, vector<16x16x8xf32>
    %28 = vector.shape_cast %27 : vector<16x16x8xf32> to vector<256x8xf32>
    %29 = arith.truncf %28 : vector<256x8xf32> to vector<256x8xbf16>
    %c1_35 = arith.constant 1 : index
    %c0_36 = arith.constant 0 : index
    %c0_37 = arith.constant 0 : index
    %c0_38 = arith.constant 0 : index
    %30 = vector.load %arg2[%c1_35, %c0_36, %c0_37, %c0_38] : memref<3x3x8x8xbf16, #tpu.memory_space<vmem>>, vector<1x1x8x8xbf16>
    %31 = vector.shape_cast %30 : vector<1x1x8x8xbf16> to vector<8x8xbf16>
    %cst_39 = arith.constant dense<0.000000e+00> : vector<256x8xf32>
    %32 = tpu.matmul %29, %31, %cst_39 {dimension_numbers = #tpu.dot_dimension_numbers<[1], [0], [0], [1], [0, 0, 1, 1], [], []>} : vector<256x8xbf16>, vector<8x8xbf16>, vector<256x8xf32> -> vector<256x8xf32>
    %33 = arith.addf %26, %32 : vector<256x8xf32>
    %c1_40 = arith.constant 1 : index
    %c1_41 = arith.constant 1 : index
    %c0_42 = arith.constant 0 : index
    %34 = vector.load %arg9[%c1_40, %c1_41, %c0_42] : memref<18x18x8xf32, #tpu.memory_space<vmem>>, vector<16x16x8xf32>
    %35 = vector.shape_cast %34 : vector<16x16x8xf32> to vector<256x8xf32>
    %36 = arith.truncf %35 : vector<256x8xf32> to vector<256x8xbf16>
    %c1_43 = arith.constant 1 : index
    %c1_44 = arith.constant 1 : index
    %c0_45 = arith.constant 0 : index
    %c0_46 = arith.constant 0 : index
    %37 = vector.load %arg2[%c1_43, %c1_44, %c0_45, %c0_46] : memref<3x3x8x8xbf16, #tpu.memory_space<vmem>>, vector<1x1x8x8xbf16>
    %38 = vector.shape_cast %37 : vector<1x1x8x8xbf16> to vector<8x8xbf16>
    %cst_47 = arith.constant dense<0.000000e+00> : vector<256x8xf32>
    %39 = tpu.matmul %36, %38, %cst_47 {dimension_numbers = #tpu.dot_dimension_numbers<[1], [0], [0], [1], [0, 0, 1, 1], [], []>} : vector<256x8xbf16>, vector<8x8xbf16>, vector<256x8xf32> -> vector<256x8xf32>
    %40 = arith.addf %33, %39 : vector<256x8xf32>
    %c1_48 = arith.constant 1 : index
    %c2_49 = arith.constant 2 : index
    %c0_50 = arith.constant 0 : index
    %41 = vector.load %arg9[%c1_48, %c2_49, %c0_50] : memref<18x18x8xf32, #tpu.memory_space<vmem>>, vector<16x16x8xf32>
    %42 = vector.shape_cast %41 : vector<16x16x8xf32> to vector<256x8xf32>
    %43 = arith.truncf %42 : vector<256x8xf32> to vector<256x8xbf16>
    %c1_51 = arith.constant 1 : index
    %c2_52 = arith.constant 2 : index
    %c0_53 = arith.constant 0 : index
    %c0_54 = arith.constant 0 : index
    %44 = vector.load %arg2[%c1_51, %c2_52, %c0_53, %c0_54] : memref<3x3x8x8xbf16, #tpu.memory_space<vmem>>, vector<1x1x8x8xbf16>
    %45 = vector.shape_cast %44 : vector<1x1x8x8xbf16> to vector<8x8xbf16>
    %cst_55 = arith.constant dense<0.000000e+00> : vector<256x8xf32>
    %46 = tpu.matmul %43, %45, %cst_55 {dimension_numbers = #tpu.dot_dimension_numbers<[1], [0], [0], [1], [0, 0, 1, 1], [], []>} : vector<256x8xbf16>, vector<8x8xbf16>, vector<256x8xf32> -> vector<256x8xf32>
    %47 = arith.addf %40, %46 : vector<256x8xf32>
    %c2_56 = arith.constant 2 : index
    %c0_57 = arith.constant 0 : index
    %c0_58 = arith.constant 0 : index
    %48 = vector.load %arg9[%c2_56, %c0_57, %c0_58] : memref<18x18x8xf32, #tpu.memory_space<vmem>>, vector<16x16x8xf32>
    %49 = vector.shape_cast %48 : vector<16x16x8xf32> to vector<256x8xf32>
    %50 = arith.truncf %49 : vector<256x8xf32> to vector<256x8xbf16>
    %c2_59 = arith.constant 2 : index
    %c0_60 = arith.constant 0 : index
    %c0_61 = arith.constant 0 : index
    %c0_62 = arith.constant 0 : index
    %51 = vector.load %arg2[%c2_59, %c0_60, %c0_61, %c0_62] : memref<3x3x8x8xbf16, #tpu.memory_space<vmem>>, vector<1x1x8x8xbf16>
    %52 = vector.shape_cast %51 : vector<1x1x8x8xbf16> to vector<8x8xbf16>
    %cst_63 = arith.constant dense<0.000000e+00> : vector<256x8xf32>
    %53 = tpu.matmul %50, %52, %cst_63 {dimension_numbers = #tpu.dot_dimension_numbers<[1], [0], [0], [1], [0, 0, 1, 1], [], []>} : vector<256x8xbf16>, vector<8x8xbf16>, vector<256x8xf32> -> vector<256x8xf32>
    %54 = arith.addf %47, %53 : vector<256x8xf32>
    %c2_64 = arith.constant 2 : index
    %c1_65 = arith.constant 1 : index
    %c0_66 = arith.constant 0 : index
    %55 = vector.load %arg9[%c2_64, %c1_65, %c0_66] : memref<18x18x8xf32, #tpu.memory_space<vmem>>, vector<16x16x8xf32>
    %56 = vector.shape_cast %55 : vector<16x16x8xf32> to vector<256x8xf32>
    %57 = arith.truncf %56 : vector<256x8xf32> to vector<256x8xbf16>
    %c2_67 = arith.constant 2 : index
    %c1_68 = arith.constant 1 : index
    %c0_69 = arith.constant 0 : index
    %c0_70 = arith.constant 0 : index
    %58 = vector.load %arg2[%c2_67, %c1_68, %c0_69, %c0_70] : memref<3x3x8x8xbf16, #tpu.memory_space<vmem>>, vector<1x1x8x8xbf16>
    %59 = vector.shape_cast %58 : vector<1x1x8x8xbf16> to vector<8x8xbf16>
    %cst_71 = arith.constant dense<0.000000e+00> : vector<256x8xf32>
    %60 = tpu.matmul %57, %59, %cst_71 {dimension_numbers = #tpu.dot_dimension_numbers<[1], [0], [0], [1], [0, 0, 1, 1], [], []>} : vector<256x8xbf16>, vector<8x8xbf16>, vector<256x8xf32> -> vector<256x8xf32>
    %61 = arith.addf %54, %60 : vector<256x8xf32>
    %c2_72 = arith.constant 2 : index
    %c2_73 = arith.constant 2 : index
    %c0_74 = arith.constant 0 : index
    %62 = vector.load %arg9[%c2_72, %c2_73, %c0_74] : memref<18x18x8xf32, #tpu.memory_space<vmem>>, vector<16x16x8xf32>
    %63 = vector.shape_cast %62 : vector<16x16x8xf32> to vector<256x8xf32>
    %64 = arith.truncf %63 : vector<256x8xf32> to vector<256x8xbf16>
    %c2_75 = arith.constant 2 : index
    %c2_76 = arith.constant 2 : index
    %c0_77 = arith.constant 0 : index
    %c0_78 = arith.constant 0 : index
    %65 = vector.load %arg2[%c2_75, %c2_76, %c0_77, %c0_78] : memref<3x3x8x8xbf16, #tpu.memory_space<vmem>>, vector<1x1x8x8xbf16>
    %66 = vector.shape_cast %65 : vector<1x1x8x8xbf16> to vector<8x8xbf16>
    %cst_79 = arith.constant dense<0.000000e+00> : vector<256x8xf32>
    %67 = tpu.matmul %64, %66, %cst_79 {dimension_numbers = #tpu.dot_dimension_numbers<[1], [0], [0], [1], [0, 0, 1, 1], [], []>} : vector<256x8xbf16>, vector<8x8xbf16>, vector<256x8xf32> -> vector<256x8xf32>
    %68 = arith.addf %61, %67 : vector<256x8xf32>
    %c0_80 = arith.constant 0 : index
    %c0_81 = arith.constant 0 : index
    %69 = vector.load %arg3[%c0_80, %c0_81] : memref<1x8xf32, #tpu.memory_space<vmem>>, vector<1x8xf32>
    %70 = vector.broadcast %69 : vector<1x8xf32> to vector<256x8xf32>
    %71 = arith.mulf %68, %70 : vector<256x8xf32>
    %c0_82 = arith.constant 0 : index
    %c0_83 = arith.constant 0 : index
    %72 = vector.load %arg4[%c0_82, %c0_83] : memref<1x8xf32, #tpu.memory_space<vmem>>, vector<1x8xf32>
    %73 = vector.broadcast %72 : vector<1x8xf32> to vector<256x8xf32>
    %74 = arith.addf %71, %73 : vector<256x8xf32>
    %cst_84 = arith.constant 0.000000e+00 : f32
    %75 = vector.broadcast %cst_84 : f32 to vector<256x8xf32>
    %76 = arith.maximumf %74, %75 : vector<256x8xf32>
    %cst_85 = arith.constant 0.000000e+00 : f32
    %77 = vector.broadcast %cst_85 : f32 to vector<18x18x8xf32>
    %c0_86 = arith.constant 0 : index
    %c0_87 = arith.constant 0 : index
    %c0_88 = arith.constant 0 : index
    %78 = vector.load %arg10[%c0_86, %c0_87, %c0_88] : memref<18x18x8xf32, #tpu.memory_space<vmem>>, vector<18x18x8xf32>
    tpu.vector_store %arg10[%c0_86, %c0_87, %c0_88], %77 {strides = array<i32>} : memref<18x18x8xf32, #tpu.memory_space<vmem>>, vector<18x18x8xf32>,
    %79 = vector.shape_cast %76 : vector<256x8xf32> to vector<16x16x8xf32>
    %c1_89 = arith.constant 1 : index
    %c1_90 = arith.constant 1 : index
    %c0_91 = arith.constant 0 : index
    %80 = vector.load %arg10[%c1_89, %c1_90, %c0_91] : memref<18x18x8xf32, #tpu.memory_space<vmem>>, vector<16x16x8xf32>
    tpu.vector_store %arg10[%c1_89, %c1_90, %c0_91], %79 {strides = array<i32>} : memref<18x18x8xf32, #tpu.memory_space<vmem>>, vector<16x16x8xf32>,
    %cst_92 = arith.constant 0.000000e+00 : f32
    %81 = vector.broadcast %cst_92 : f32 to vector<256x8xf32>
    %c0_93 = arith.constant 0 : index
    %c0_94 = arith.constant 0 : index
    %c0_95 = arith.constant 0 : index
    %82 = vector.load %arg10[%c0_93, %c0_94, %c0_95] : memref<18x18x8xf32, #tpu.memory_space<vmem>>, vector<16x16x8xf32>
    %83 = vector.shape_cast %82 : vector<16x16x8xf32> to vector<256x8xf32>
    %84 = arith.truncf %83 : vector<256x8xf32> to vector<256x8xbf16>
    %c0_96 = arith.constant 0 : index
    %c0_97 = arith.constant 0 : index
    %c0_98 = arith.constant 0 : index
    %c0_99 = arith.constant 0 : index
    %85 = vector.load %arg5[%c0_96, %c0_97, %c0_98, %c0_99] : memref<3x3x8x8xbf16, #tpu.memory_space<vmem>>, vector<1x1x8x8xbf16>
    %86 = vector.shape_cast %85 : vector<1x1x8x8xbf16> to vector<8x8xbf16>
    %cst_100 = arith.constant dense<0.000000e+00> : vector<256x8xf32>
    %87 = tpu.matmul %84, %86, %cst_100 {dimension_numbers = #tpu.dot_dimension_numbers<[1], [0], [0], [1], [0, 0, 1, 1], [], []>} : vector<256x8xbf16>, vector<8x8xbf16>, vector<256x8xf32> -> vector<256x8xf32>
    %88 = arith.addf %81, %87 : vector<256x8xf32>
    %c0_101 = arith.constant 0 : index
    %c1_102 = arith.constant 1 : index
    %c0_103 = arith.constant 0 : index
    %89 = vector.load %arg10[%c0_101, %c1_102, %c0_103] : memref<18x18x8xf32, #tpu.memory_space<vmem>>, vector<16x16x8xf32>
    %90 = vector.shape_cast %89 : vector<16x16x8xf32> to vector<256x8xf32>
    %91 = arith.truncf %90 : vector<256x8xf32> to vector<256x8xbf16>
    %c0_104 = arith.constant 0 : index
    %c1_105 = arith.constant 1 : index
    %c0_106 = arith.constant 0 : index
    %c0_107 = arith.constant 0 : index
    %92 = vector.load %arg5[%c0_104, %c1_105, %c0_106, %c0_107] : memref<3x3x8x8xbf16, #tpu.memory_space<vmem>>, vector<1x1x8x8xbf16>
    %93 = vector.shape_cast %92 : vector<1x1x8x8xbf16> to vector<8x8xbf16>
    %cst_108 = arith.constant dense<0.000000e+00> : vector<256x8xf32>
    %94 = tpu.matmul %91, %93, %cst_108 {dimension_numbers = #tpu.dot_dimension_numbers<[1], [0], [0], [1], [0, 0, 1, 1], [], []>} : vector<256x8xbf16>, vector<8x8xbf16>, vector<256x8xf32> -> vector<256x8xf32>
    %95 = arith.addf %88, %94 : vector<256x8xf32>
    %c0_109 = arith.constant 0 : index
    %c2_110 = arith.constant 2 : index
    %c0_111 = arith.constant 0 : index
    %96 = vector.load %arg10[%c0_109, %c2_110, %c0_111] : memref<18x18x8xf32, #tpu.memory_space<vmem>>, vector<16x16x8xf32>
    %97 = vector.shape_cast %96 : vector<16x16x8xf32> to vector<256x8xf32>
    %98 = arith.truncf %97 : vector<256x8xf32> to vector<256x8xbf16>
    %c0_112 = arith.constant 0 : index
    %c2_113 = arith.constant 2 : index
    %c0_114 = arith.constant 0 : index
    %c0_115 = arith.constant 0 : index
    %99 = vector.load %arg5[%c0_112, %c2_113, %c0_114, %c0_115] : memref<3x3x8x8xbf16, #tpu.memory_space<vmem>>, vector<1x1x8x8xbf16>
    %100 = vector.shape_cast %99 : vector<1x1x8x8xbf16> to vector<8x8xbf16>
    %cst_116 = arith.constant dense<0.000000e+00> : vector<256x8xf32>
    %101 = tpu.matmul %98, %100, %cst_116 {dimension_numbers = #tpu.dot_dimension_numbers<[1], [0], [0], [1], [0, 0, 1, 1], [], []>} : vector<256x8xbf16>, vector<8x8xbf16>, vector<256x8xf32> -> vector<256x8xf32>
    %102 = arith.addf %95, %101 : vector<256x8xf32>
    %c1_117 = arith.constant 1 : index
    %c0_118 = arith.constant 0 : index
    %c0_119 = arith.constant 0 : index
    %103 = vector.load %arg10[%c1_117, %c0_118, %c0_119] : memref<18x18x8xf32, #tpu.memory_space<vmem>>, vector<16x16x8xf32>
    %104 = vector.shape_cast %103 : vector<16x16x8xf32> to vector<256x8xf32>
    %105 = arith.truncf %104 : vector<256x8xf32> to vector<256x8xbf16>
    %c1_120 = arith.constant 1 : index
    %c0_121 = arith.constant 0 : index
    %c0_122 = arith.constant 0 : index
    %c0_123 = arith.constant 0 : index
    %106 = vector.load %arg5[%c1_120, %c0_121, %c0_122, %c0_123] : memref<3x3x8x8xbf16, #tpu.memory_space<vmem>>, vector<1x1x8x8xbf16>
    %107 = vector.shape_cast %106 : vector<1x1x8x8xbf16> to vector<8x8xbf16>
    %cst_124 = arith.constant dense<0.000000e+00> : vector<256x8xf32>
    %108 = tpu.matmul %105, %107, %cst_124 {dimension_numbers = #tpu.dot_dimension_numbers<[1], [0], [0], [1], [0, 0, 1, 1], [], []>} : vector<256x8xbf16>, vector<8x8xbf16>, vector<256x8xf32> -> vector<256x8xf32>
    %109 = arith.addf %102, %108 : vector<256x8xf32>
    %c1_125 = arith.constant 1 : index
    %c1_126 = arith.constant 1 : index
    %c0_127 = arith.constant 0 : index
    %110 = vector.load %arg10[%c1_125, %c1_126, %c0_127] : memref<18x18x8xf32, #tpu.memory_space<vmem>>, vector<16x16x8xf32>
    %111 = vector.shape_cast %110 : vector<16x16x8xf32> to vector<256x8xf32>
    %112 = arith.truncf %111 : vector<256x8xf32> to vector<256x8xbf16>
    %c1_128 = arith.constant 1 : index
    %c1_129 = arith.constant 1 : index
    %c0_130 = arith.constant 0 : index
    %c0_131 = arith.constant 0 : index
    %113 = vector.load %arg5[%c1_128, %c1_129, %c0_130, %c0_131] : memref<3x3x8x8xbf16, #tpu.memory_space<vmem>>, vector<1x1x8x8xbf16>
    %114 = vector.shape_cast %113 : vector<1x1x8x8xbf16> to vector<8x8xbf16>
    %cst_132 = arith.constant dense<0.000000e+00> : vector<256x8xf32>
    %115 = tpu.matmul %112, %114, %cst_132 {dimension_numbers = #tpu.dot_dimension_numbers<[1], [0], [0], [1], [0, 0, 1, 1], [], []>} : vector<256x8xbf16>, vector<8x8xbf16>, vector<256x8xf32> -> vector<256x8xf32>
    %116 = arith.addf %109, %115 : vector<256x8xf32>
    %c1_133 = arith.constant 1 : index
    %c2_134 = arith.constant 2 : index
    %c0_135 = arith.constant 0 : index
    %117 = vector.load %arg10[%c1_133, %c2_134, %c0_135] : memref<18x18x8xf32, #tpu.memory_space<vmem>>, vector<16x16x8xf32>
    %118 = vector.shape_cast %117 : vector<16x16x8xf32> to vector<256x8xf32>
    %119 = arith.truncf %118 : vector<256x8xf32> to vector<256x8xbf16>
    %c1_136 = arith.constant 1 : index
    %c2_137 = arith.constant 2 : index
    %c0_138 = arith.constant 0 : index
    %c0_139 = arith.constant 0 : index
    %120 = vector.load %arg5[%c1_136, %c2_137, %c0_138, %c0_139] : memref<3x3x8x8xbf16, #tpu.memory_space<vmem>>, vector<1x1x8x8xbf16>
    %121 = vector.shape_cast %120 : vector<1x1x8x8xbf16> to vector<8x8xbf16>
    %cst_140 = arith.constant dense<0.000000e+00> : vector<256x8xf32>
    %122 = tpu.matmul %119, %121, %cst_140 {dimension_numbers = #tpu.dot_dimension_numbers<[1], [0], [0], [1], [0, 0, 1, 1], [], []>} : vector<256x8xbf16>, vector<8x8xbf16>, vector<256x8xf32> -> vector<256x8xf32>
    %123 = arith.addf %116, %122 : vector<256x8xf32>
    %c2_141 = arith.constant 2 : index
    %c0_142 = arith.constant 0 : index
    %c0_143 = arith.constant 0 : index
    %124 = vector.load %arg10[%c2_141, %c0_142, %c0_143] : memref<18x18x8xf32, #tpu.memory_space<vmem>>, vector<16x16x8xf32>
    %125 = vector.shape_cast %124 : vector<16x16x8xf32> to vector<256x8xf32>
    %126 = arith.truncf %125 : vector<256x8xf32> to vector<256x8xbf16>
    %c2_144 = arith.constant 2 : index
    %c0_145 = arith.constant 0 : index
    %c0_146 = arith.constant 0 : index
    %c0_147 = arith.constant 0 : index
    %127 = vector.load %arg5[%c2_144, %c0_145, %c0_146, %c0_147] : memref<3x3x8x8xbf16, #tpu.memory_space<vmem>>, vector<1x1x8x8xbf16>
    %128 = vector.shape_cast %127 : vector<1x1x8x8xbf16> to vector<8x8xbf16>
    %cst_148 = arith.constant dense<0.000000e+00> : vector<256x8xf32>
    %129 = tpu.matmul %126, %128, %cst_148 {dimension_numbers = #tpu.dot_dimension_numbers<[1], [0], [0], [1], [0, 0, 1, 1], [], []>} : vector<256x8xbf16>, vector<8x8xbf16>, vector<256x8xf32> -> vector<256x8xf32>
    %130 = arith.addf %123, %129 : vector<256x8xf32>
    %c2_149 = arith.constant 2 : index
    %c1_150 = arith.constant 1 : index
    %c0_151 = arith.constant 0 : index
    %131 = vector.load %arg10[%c2_149, %c1_150, %c0_151] : memref<18x18x8xf32, #tpu.memory_space<vmem>>, vector<16x16x8xf32>
    %132 = vector.shape_cast %131 : vector<16x16x8xf32> to vector<256x8xf32>
    %133 = arith.truncf %132 : vector<256x8xf32> to vector<256x8xbf16>
    %c2_152 = arith.constant 2 : index
    %c1_153 = arith.constant 1 : index
    %c0_154 = arith.constant 0 : index
    %c0_155 = arith.constant 0 : index
    %134 = vector.load %arg5[%c2_152, %c1_153, %c0_154, %c0_155] : memref<3x3x8x8xbf16, #tpu.memory_space<vmem>>, vector<1x1x8x8xbf16>
    %135 = vector.shape_cast %134 : vector<1x1x8x8xbf16> to vector<8x8xbf16>
    %cst_156 = arith.constant dense<0.000000e+00> : vector<256x8xf32>
    %136 = tpu.matmul %133, %135, %cst_156 {dimension_numbers = #tpu.dot_dimension_numbers<[1], [0], [0], [1], [0, 0, 1, 1], [], []>} : vector<256x8xbf16>, vector<8x8xbf16>, vector<256x8xf32> -> vector<256x8xf32>
    %137 = arith.addf %130, %136 : vector<256x8xf32>
    %c2_157 = arith.constant 2 : index
    %c2_158 = arith.constant 2 : index
    %c0_159 = arith.constant 0 : index
    %138 = vector.load %arg10[%c2_157, %c2_158, %c0_159] : memref<18x18x8xf32, #tpu.memory_space<vmem>>, vector<16x16x8xf32>
    %139 = vector.shape_cast %138 : vector<16x16x8xf32> to vector<256x8xf32>
    %140 = arith.truncf %139 : vector<256x8xf32> to vector<256x8xbf16>
    %c2_160 = arith.constant 2 : index
    %c2_161 = arith.constant 2 : index
    %c0_162 = arith.constant 0 : index
    %c0_163 = arith.constant 0 : index
    %141 = vector.load %arg5[%c2_160, %c2_161, %c0_162, %c0_163] : memref<3x3x8x8xbf16, #tpu.memory_space<vmem>>, vector<1x1x8x8xbf16>
    %142 = vector.shape_cast %141 : vector<1x1x8x8xbf16> to vector<8x8xbf16>
    %cst_164 = arith.constant dense<0.000000e+00> : vector<256x8xf32>
    %143 = tpu.matmul %140, %142, %cst_164 {dimension_numbers = #tpu.dot_dimension_numbers<[1], [0], [0], [1], [0, 0, 1, 1], [], []>} : vector<256x8xbf16>, vector<8x8xbf16>, vector<256x8xf32> -> vector<256x8xf32>
    %144 = arith.addf %137, %143 : vector<256x8xf32>
    %c0_165 = arith.constant 0 : index
    %c0_166 = arith.constant 0 : index
    %145 = vector.load %arg6[%c0_165, %c0_166] : memref<1x8xf32, #tpu.memory_space<vmem>>, vector<1x8xf32>
    %146 = vector.broadcast %145 : vector<1x8xf32> to vector<256x8xf32>
    %147 = arith.mulf %144, %146 : vector<256x8xf32>
    %c0_167 = arith.constant 0 : index
    %c0_168 = arith.constant 0 : index
    %148 = vector.load %arg7[%c0_167, %c0_168] : memref<1x8xf32, #tpu.memory_space<vmem>>, vector<1x8xf32>
    %149 = vector.broadcast %148 : vector<1x8xf32> to vector<256x8xf32>
    %150 = arith.addf %147, %149 : vector<256x8xf32>
    %c0_169 = arith.constant 0 : index
    %c0_170 = arith.constant 0 : index
    %c0_171 = arith.constant 0 : index
    %c0_172 = arith.constant 0 : index
    %151 = vector.load %arg1[%c0_169, %c0_170, %c0_171, %c0_172] : memref<1x16x16x8xf32, #tpu.memory_space<vmem>>, vector<1x16x16x8xf32>
    %152 = vector.shape_cast %151 : vector<1x16x16x8xf32> to vector<16x16x8xf32>
    %153 = vector.shape_cast %152 : vector<16x16x8xf32> to vector<256x8xf32>
    %154 = arith.addf %150, %153 : vector<256x8xf32>
    %cst_173 = arith.constant 0.000000e+00 : f32
    %155 = vector.broadcast %cst_173 : f32 to vector<256x8xf32>
    %156 = arith.maximumf %154, %155 : vector<256x8xf32>
    %157 = vector.shape_cast %156 : vector<256x8xf32> to vector<1x16x16x8xf32>
    %c0_174 = arith.constant 0 : index
    %c0_175 = arith.constant 0 : index
    %c0_176 = arith.constant 0 : index
    %c0_177 = arith.constant 0 : index
    %158 = vector.load %arg8[%c0_174, %c0_175, %c0_176, %c0_177] : memref<1x16x16x8xf32, #tpu.memory_space<vmem>>, vector<1x16x16x8xf32>
    tpu.vector_store %arg8[%c0_174, %c0_175, %c0_176, %c0_177], %157 {strides = array<i32>} : memref<1x16x16x8xf32, #tpu.memory_space<vmem>>, vector<1x16x16x8xf32>,
    return
  }
  func.func @transform_0(%arg0: i32) -> (i32, i32, i32, i32) {
    %c0_i32 = arith.constant 0 : i32
    %c0_i32_0 = arith.constant 0 : i32
    %c0_i32_1 = arith.constant 0 : i32
    %c0_i32_2 = arith.constant 0 : i32
    return %arg0, %c0_i32, %c0_i32_0, %c0_i32_1 : i32, i32, i32, i32
  }
  func.func @transform_1(%arg0: i32) -> (i32, i32, i32, i32) {
    %c0_i32 = arith.constant 0 : i32
    %c0_i32_0 = arith.constant 0 : i32
    %c0_i32_1 = arith.constant 0 : i32
    %c0_i32_2 = arith.constant 0 : i32
    %c0_i32_3 = arith.constant 0 : i32
    return %c0_i32, %c0_i32_0, %c0_i32_1, %c0_i32_2 : i32, i32, i32, i32
  }
  func.func @transform_2(%arg0: i32) -> (i32, i32) {
    %c0_i32 = arith.constant 0 : i32
    %c0_i32_0 = arith.constant 0 : i32
    %c0_i32_1 = arith.constant 0 : i32
    return %c0_i32, %c0_i32_0 : i32, i32
  }
  func.func @transform_3(%arg0: i32) -> (i32, i32) {
    %c0_i32 = arith.constant 0 : i32
    %c0_i32_0 = arith.constant 0 : i32
    %c0_i32_1 = arith.constant 0 : i32
    return %c0_i32, %c0_i32_0 : i32, i32
  }
  func.func @transform_4(%arg0: i32) -> (i32, i32, i32, i32) {
    %c0_i32 = arith.constant 0 : i32
    %c0_i32_0 = arith.constant 0 : i32
    %c0_i32_1 = arith.constant 0 : i32
    %c0_i32_2 = arith.constant 0 : i32
    %c0_i32_3 = arith.constant 0 : i32
    return %c0_i32, %c0_i32_0, %c0_i32_1, %c0_i32_2 : i32, i32, i32, i32
  }
  func.func @transform_5(%arg0: i32) -> (i32, i32) {
    %c0_i32 = arith.constant 0 : i32
    %c0_i32_0 = arith.constant 0 : i32
    %c0_i32_1 = arith.constant 0 : i32
    return %c0_i32, %c0_i32_0 : i32, i32
  }
  func.func @transform_6(%arg0: i32) -> (i32, i32) {
    %c0_i32 = arith.constant 0 : i32
    %c0_i32_0 = arith.constant 0 : i32
    %c0_i32_1 = arith.constant 0 : i32
    return %c0_i32, %c0_i32_0 : i32, i32
  }
  func.func @transform_7(%arg0: i32) -> (i32, i32, i32, i32) {
    %c0_i32 = arith.constant 0 : i32
    %c0_i32_0 = arith.constant 0 : i32
    %c0_i32_1 = arith.constant 0 : i32
    %c0_i32_2 = arith.constant 0 : i32
    return %arg0, %c0_i32, %c0_i32_0, %c0_i32_1 : i32, i32, i32, i32
  }
}

</mosaic_0001>

<bundles_post_ra>
// kernel: res_block_forward.1
= control target key start
LH: loop header
LB: loop body
LE: loop exit
PB: predicated region body
PF: predicated region fallthrough
CT: control target
= control target key end

     0   :  { %s7339_s24 = smov 0   ;;  %s9966_s0 = inlined_call_operand.vmem [shape: f32[2,16,16,8], index: 0, kind: input, shape index: {}]   ;;  %s9967_s1 = inlined_call_operand.vmem [shape: bf16[3,3,8,8], index: 1, kind: input, shape index: {}]   ;;  %s9968_s2 = inlined_call_operand.vmem [shape: f32[1,8], index: 2, kind: input, shape index: {}]   ;;  %s9969_s3 = inlined_call_operand.vmem [shape: f32[1,8], index: 3, kind: input, shape index: {}]   ;;  %s9970_s4 = inlined_call_operand.vmem [shape: bf16[3,3,8,8], index: 4, kind: input, shape index: {}]   ;;  %s9971_s5 = inlined_call_operand.vmem [shape: f32[1,8], index: 5, kind: input, shape index: {}]   ;;  %s9972_s6 = inlined_call_operand.vmem [shape: f32[1,8], index: 6, kind: input, shape index: {}]   ;;  %s9973_s7 = inlined_call_operand.vmem [shape: f32[2,16,16,8], index: 7, kind: output, shape index: {}]  }
   0x1 LB: > { %s6024_s25 = sadd.s32 4294967295, %s7296_s24   ;;  %p6028_p0 = scmp.ge.s32.totalorder %s7296_s24, 1  ;;  %s7296_s24 = sphi %s7339_s24, %s17_s24  }
   0x2   : > { %p237_p1 = scmp.lt.s32.totalorder %s7296_s24, 3 }
   0x4   : > { %p238_p2 = pnand %p6028_p0, %p237_p1 }
   0x6   : > { %241 = sbr.rel (%p238_p2) target bundleno = 1073 (0x431), region = 48 }
   0xb   : > { %v6033_v0 = vld [vmem:[%s9967_s1 + $0x4] sm:$0xf]  ;;  %vm548_vm0 = vcmask 1043456   ;;  %v449_v1 = vld [vmem:[%s9967_s1] sm:$0xf]  ;;  %vm280_vm1 = vcmask 64512  }
   0xc   : > { %7263 = vmatprep.subr.msk.bf16.mxu0 %vm548_vm0, %v6033_v0  ;;  %v550_v2 = vsel %vm548_vm0, %v6033_v0, 0  ;;  %7264 = vmatprep.subr.msk.bf16.mxu1 %vm548_vm0, %v449_v1  ;;  %v762_v3 = vsel %vm548_vm0, %v449_v1, 0  ;;  %vm283_vm2 = vcmask 58368   ;;  %v7360_v4 = vld [vmem:[%s9967_s1 + $0x8] sm:$0xf]  ;;  %v7298_v5 = vmov 0.0  }
   0xd   : > { %6652 = vmatpush3.bf16.msra.mxu0 %v550_v2  ;;  %6686 = vmatpush3.bf16.msra.mxu1 %v762_v3  ;;  %281 = vst.msk [vmem:[#allocation2] sm:$0xff] %vm280_vm1, %v7298_v5  ;;  %282 = vst.msk [vmem:[#allocation2 + $0x8] sm:$0xff] %vm280_vm1, %v7298_v5  ;;  %p269_p3 = scmp.lt.s32.totalorder %s6024_s25, 1  ;;  %v7583_v6 = vld [vmem:[%s9967_s1 + $0xc] sm:$0xf]  ;;  %v1024_v38 = vsel %vm548_vm0, %v7360_v4, 0 }
   0xe   : > { %284 = vst.msk [vmem:[#allocation2 + $0x10] sm:$0x3] %vm283_vm2, %v7298_v5  ;;  %287 = vst.msk [vmem:[#allocation2 + $0x28] sm:$0x3] %vm283_vm2, %v7298_v5  ;;  %7265 = vmatprep.subr.msk.bf16.mxu0 %vm548_vm0, %v7360_v4  ;;  %7266 = vmatprep.subr.msk.bf16.mxu1 %vm548_vm0, %v7583_v6  ;;  %v1318_v46 = vsel %vm548_vm0, %v7583_v6, 0 }
   0xf   : > { %285 = vst.msk [vmem:[#allocation2 + $0x18] sm:$0xff] %vm280_vm1, %v7298_v5  ;;  %286 = vst.msk [vmem:[#allocation2 + $0x20] sm:$0xff] %vm280_vm1, %v7298_v5  ;;  %s10243_s25 = smov (!%p269_p3, %s6024_s25), 1  ;;  %v7660_v47 = vld [vmem:[%s9967_s1 + $0x10] sm:$0xf] }
  0x10   : > { %288 = vst.msk [vmem:[#allocation2 + $0x30] sm:$0xff] %vm280_vm1, %v7298_v5  ;;  %289 = vst.msk [vmem:[#allocation2 + $0x38] sm:$0xff] %vm280_vm1, %v7298_v5  ;;  %s6343_s11 = sshll.u32 %s10243_s25, 8 }
  0x11   : > { %290 = vst.msk [vmem:[#allocation2 + $0x40] sm:$0x3] %vm283_vm2, %v7298_v5  ;;  %293 = vst.msk [vmem:[#allocation2 + $0x58] sm:$0x3] %vm283_vm2, %v7298_v5  ;;  %s7599_s14 = scalar_lea.vmem %s9966_s0, %s6343_s11  ;;  %s9701_s15 = scalar_lea.vmem %s9973_s7, %s6343_s11 }
  0x12   : > { %291 = vst.msk [vmem:[#allocation2 + $0x48] sm:$0xff] %vm280_vm1, %v7298_v5  ;;  %292 = vst.msk [vmem:[#allocation2 + $0x50] sm:$0xff] %vm280_vm1, %v7298_v5  ;;  %v336_v7 = vld [vmem:[%s7599_s14] sm:$0xff]  ;;  %v337_v8 = vld [vmem:[%s7599_s14 + $0x8] sm:$0xff] }
  0x13   : > { %294 = vst.msk [vmem:[#allocation2 + $0x60] sm:$0xff] %vm280_vm1, %v7298_v5  ;;  %295 = vst.msk [vmem:[#allocation2 + $0x68] sm:$0xff] %vm280_vm1, %v7298_v5  ;;  %v338_v9 = vld [vmem:[%s7599_s14 + $0x10] sm:$0xff]  ;;  %v339_v15 = vld [vmem:[%s7599_s14 + $0x18] sm:$0xff] }
  0x14   : > { %296 = vst.msk [vmem:[#allocation2 + $0x70] sm:$0x3] %vm283_vm2, %v7298_v5  ;;  %299 = vst.msk [vmem:[#allocation2 + $0x88] sm:$0x3] %vm283_vm2, %v7298_v5  ;;  %v450_v10 = vld [vmem:[#allocation2 + $0x1] sm:$0xff]  ;;  %v342_v19 = vld [vmem:[%s7599_s14 + $0x30] sm:$0xff] }
  0x15   : > { %297 = vst.msk [vmem:[#allocation2 + $0x78] sm:$0xff] %vm280_vm1, %v7298_v5  ;;  %298 = vst.msk [vmem:[#allocation2 + $0x80] sm:$0xff] %vm280_vm1, %v7298_v5  ;;  %v451_v11 = vld [vmem:[#allocation2 + $0x9] sm:$0xff]  ;;  %v401_v12 = vld [vmem:[#allocation2] sm:$0xff] }
  0x16   : > { %300 = vst.msk [vmem:[#allocation2 + $0x90] sm:$0xff] %vm280_vm1, %v7298_v5  ;;  %301 = vst.msk [vmem:[#allocation2 + $0x98] sm:$0xff] %vm280_vm1, %v7298_v5  ;;  %v482_v13 = vpack.c.bf16 %v451_v11, %v450_v10  ;;  %v402_v14 = vld [vmem:[#allocation2 + $0x8] sm:$0xff]  ;;  %v340_v16 = vld [vmem:[%s7599_s14 + $0x20] sm:$0xff] }
  0x17   : > { %302 = vst.msk [vmem:[#allocation2 + $0xa0] sm:$0x3] %vm283_vm2, %v7298_v5  ;;  %305 = vst.msk [vmem:[#allocation2 + $0xb8] sm:$0x3] %vm283_vm2, %v7298_v5  ;;  %v433_v17 = vpack.c.bf16 %v402_v14, %v401_v12  ;;  %v341_v18 = vld [vmem:[%s7599_s14 + $0x28] sm:$0xff]  ;;  %v343_v20 = vld [vmem:[%s7599_s14 + $0x38] sm:$0xff] }
  0x18   : > { %303 = vst.msk [vmem:[#allocation2 + $0xa8] sm:$0xff] %vm280_vm1, %v7298_v5  ;;  %304 = vst.msk [vmem:[#allocation2 + $0xb0] sm:$0xff] %vm280_vm1, %v7298_v5  ;;  %6653 = vmatprep.mubr.msk.bf16.mxu0 %vm280_vm1, %v482_v13  ;;  %v344_v21 = vld [vmem:[%s7599_s14 + $0x40] sm:$0xff]  ;;  %v345_v22 = vld [vmem:[%s7599_s14 + $0x48] sm:$0xff] }
  0x19   : > { %306 = vst.msk [vmem:[#allocation2 + $0xc0] sm:$0xff] %vm280_vm1, %v7298_v5  ;;  %307 = vst.msk [vmem:[#allocation2 + $0xc8] sm:$0xff] %vm280_vm1, %v7298_v5  ;;  %v346_v23 = vld [vmem:[%s7599_s14 + $0x50] sm:$0xff]  ;;  %6687 = vmatprep.mubr.msk.bf16.mxu1 %vm280_vm1, %v433_v17  ;;  %v347_v24 = vld [vmem:[%s7599_s14 + $0x58] sm:$0xff] }
  0x1a   : > { %308 = vst.msk [vmem:[#allocation2 + $0xd0] sm:$0x3] %vm283_vm2, %v7298_v5  ;;  %311 = vst.msk [vmem:[#allocation2 + $0xe8] sm:$0x3] %vm283_vm2, %v7298_v5  ;;  %v348_v25 = vld [vmem:[%s7599_s14 + $0x60] sm:$0xff]  ;;  %v349_v26 = vld [vmem:[%s7599_s14 + $0x68] sm:$0xff] }
  0x1b   : > { %309 = vst.msk [vmem:[#allocation2 + $0xd8] sm:$0xff] %vm280_vm1, %v7298_v5  ;;  %310 = vst.msk [vmem:[#allocation2 + $0xe0] sm:$0xff] %vm280_vm1, %v7298_v5  ;;  %v350_v27 = vld [vmem:[%s7599_s14 + $0x70] sm:$0xff]  ;;  %v351_v28 = vld [vmem:[%s7599_s14 + $0x78] sm:$0xff] }
  0x1c   : > { %312 = vst.msk [vmem:[#allocation2 + $0xf0] sm:$0xff] %vm280_vm1, %v7298_v5  ;;  %313 = vst.msk [vmem:[#allocation2 + $0xf8] sm:$0xff] %vm280_vm1, %v7298_v5  ;;  %v352_v29 = vld [vmem:[%s7599_s14 + $0x80] sm:$0xff]  ;;  %v353_v30 = vld [vmem:[%s7599_s14 + $0x88] sm:$0xff] }
  0x1d   : > { %314 = vst.msk [vmem:[#allocation2 + $0x100] sm:$0x3] %vm283_vm2, %v7298_v5  ;;  %317 = vst.msk [vmem:[#allocation2 + $0x118] sm:$0x3] %vm283_vm2, %v7298_v5  ;;  %v354_v31 = vld [vmem:[%s7599_s14 + $0x90] sm:$0xff]  ;;  %v355_v32 = vld [vmem:[%s7599_s14 + $0x98] sm:$0xff] }
  0x1e   : > { %315 = vst.msk [vmem:[#allocation2 + $0x108] sm:$0xff] %vm280_vm1, %v7298_v5  ;;  %316 = vst.msk [vmem:[#allocation2 + $0x110] sm:$0xff] %vm280_vm1, %v7298_v5  ;;  %v356_v4 = vld [vmem:[%s7599_s14 + $0xa0] sm:$0xff]  ;;  %v358_v6 = vld [vmem:[%s7599_s14 + $0xb0] sm:$0xff] }
  0x1f   : > { %318 = vst.msk [vmem:[#allocation2 + $0x120] sm:$0xff] %vm280_vm1, %v7298_v5  ;;  %319 = vst.msk [vmem:[#allocation2 + $0x128] sm:$0xff] %vm280_vm1, %v7298_v5  ;;  %v361_v10 = vld [vmem:[%s7599_s14 + $0xc8] sm:$0xff]  ;;  %v362_v11 = vld [vmem:[%s7599_s14 + $0xd0] sm:$0xff] }
  0x20   : > { %320 = vst.msk [vmem:[#allocation2 + $0x130] sm:$0x3] %vm283_vm2, %v7298_v5  ;;  %323 = vst.msk [vmem:[#allocation2 + $0x148] sm:$0x3] %vm283_vm2, %v7298_v5  ;;  %v363_v12 = vld [vmem:[%s7599_s14 + $0xd8] sm:$0xff] }
  0x21   : > { %321 = vst.msk [vmem:[#allocation2 + $0x138] sm:$0xff] %vm280_vm1, %v7298_v5  ;;  %322 = vst.msk [vmem:[#allocation2 + $0x140] sm:$0xff] %vm280_vm1, %v7298_v5 }
  0x22   : > { %324 = vst.msk [vmem:[#allocation2 + $0x150] sm:$0xff] %vm280_vm1, %v7298_v5  ;;  %325 = vst.msk [vmem:[#allocation2 + $0x158] sm:$0xff] %vm280_vm1, %v7298_v5 }
  0x23   : > { %326 = vst.msk [vmem:[#allocation2 + $0x160] sm:$0x3] %vm283_vm2, %v7298_v5  ;;  %329 = vst.msk [vmem:[#allocation2 + $0x178] sm:$0x3] %vm283_vm2, %v7298_v5 }
  0x24   : > { %327 = vst.msk [vmem:[#allocation2 + $0x168] sm:$0xff] %vm280_vm1, %v7298_v5  ;;  %328 = vst.msk [vmem:[#allocation2 + $0x170] sm:$0xff] %vm280_vm1, %v7298_v5 }
  0x25   : > { %330 = vst.msk [vmem:[#allocation2 + $0x180] sm:$0xff] %vm280_vm1, %v7298_v5  ;;  %331 = vst.msk [vmem:[#allocation2 + $0x188] sm:$0xff] %vm280_vm1, %v7298_v5 }
  0x26   : > { %332 = vst.msk [vmem:[#allocation2 + $0x190] sm:$0x3] %vm283_vm2, %v7298_v5  ;;  %335 = vst.msk [vmem:[#allocation2 + $0x1a8] sm:$0x3] %vm283_vm2, %v7298_v5 }
  0x27   : > { %333 = vst.msk [vmem:[#allocation2 + $0x198] sm:$0xff] %vm280_vm1, %v7298_v5  ;;  %334 = vst.msk [vmem:[#allocation2 + $0x1a0] sm:$0xff] %vm280_vm1, %v7298_v5 }
  0x28   : > { %3094 = vst.msk [vmem:[#allocation3] sm:$0xff] %vm280_vm1, %v7298_v5  ;;  %3095 = vst.msk [vmem:[#allocation3 + $0x8] sm:$0xff] %vm280_vm1, %v7298_v5 }
  0x29   : > { %3096 = vst.msk [vmem:[#allocation3 + $0x10] sm:$0x3] %vm283_vm2, %v7298_v5  ;;  %3099 = vst.msk [vmem:[#allocation3 + $0x28] sm:$0x3] %vm283_vm2, %v7298_v5 }
  0x2a   : > { %3097 = vst.msk [vmem:[#allocation3 + $0x18] sm:$0xff] %vm280_vm1, %v7298_v5  ;;  %3098 = vst.msk [vmem:[#allocation3 + $0x20] sm:$0xff] %vm280_vm1, %v7298_v5 }
  0x2b   : > { %3100 = vst.msk [vmem:[#allocation3 + $0x30] sm:$0xff] %vm280_vm1, %v7298_v5  ;;  %3101 = vst.msk [vmem:[#allocation3 + $0x38] sm:$0xff] %vm280_vm1, %v7298_v5 }
  0x2c   : > { %3102 = vst.msk [vmem:[#allocation3 + $0x40] sm:$0x3] %vm283_vm2, %v7298_v5  ;;  %3105 = vst.msk [vmem:[#allocation3 + $0x58] sm:$0x3] %vm283_vm2, %v7298_v5 }
  0x2d   : > { %3103 = vst.msk [vmem:[#allocation3 + $0x48] sm:$0xff] %vm280_vm1, %v7298_v5  ;;  %3104 = vst.msk [vmem:[#allocation3 + $0x50] sm:$0xff] %vm280_vm1, %v7298_v5 }
  0x2e   : > { %3106 = vst.msk [vmem:[#allocation3 + $0x60] sm:$0xff] %vm280_vm1, %v7298_v5  ;;  %3107 = vst.msk [vmem:[#allocation3 + $0x68] sm:$0xff] %vm280_vm1, %v7298_v5 }
  0x2f   : > { %3108 = vst.msk [vmem:[#allocation3 + $0x70] sm:$0x3] %vm283_vm2, %v7298_v5  ;;  %3111 = vst.msk [vmem:[#allocation3 + $0x88] sm:$0x3] %vm283_vm2, %v7298_v5 }
  0x30   : > { %3109 = vst.msk [vmem:[#allocation3 + $0x78] sm:$0xff] %vm280_vm1, %v7298_v5  ;;  %3110 = vst.msk [vmem:[#allocation3 + $0x80] sm:$0xff] %vm280_vm1, %v7298_v5 }
  0x31   : > { %3112 = vst.msk [vmem:[#allocation3 + $0x90] sm:$0xff] %vm280_vm1, %v7298_v5  ;;  %3113 = vst.msk [vmem:[#allocation3 + $0x98] sm:$0xff] %vm280_vm1, %v7298_v5 }
  0x32   : > { %3114 = vst.msk [vmem:[#allocation3 + $0xa0] sm:$0x3] %vm283_vm2, %v7298_v5  ;;  %3117 = vst.msk [vmem:[#allocation3 + $0xb8] sm:$0x3] %vm283_vm2, %v7298_v5 }
  0x33   : > { %3115 = vst.msk [vmem:[#allocation3 + $0xa8] sm:$0xff] %vm280_vm1, %v7298_v5  ;;  %3116 = vst.msk [vmem:[#allocation3 + $0xb0] sm:$0xff] %vm280_vm1, %v7298_v5 }
  0x34   : > { %3118 = vst.msk [vmem:[#allocation3 + $0xc0] sm:$0xff] %vm280_vm1, %v7298_v5  ;;  %3119 = vst.msk [vmem:[#allocation3 + $0xc8] sm:$0xff] %vm280_vm1, %v7298_v5 }
  0x35   : > { %3120 = vst.msk [vmem:[#allocation3 + $0xd0] sm:$0x3] %vm283_vm2, %v7298_v5  ;;  %3123 = vst.msk [vmem:[#allocation3 + $0xe8] sm:$0x3] %vm283_vm2, %v7298_v5 }
  0x36   : > { %3121 = vst.msk [vmem:[#allocation3 + $0xd8] sm:$0xff] %vm280_vm1, %v7298_v5  ;;  %3122 = vst.msk [vmem:[#allocation3 + $0xe0] sm:$0xff] %vm280_vm1, %v7298_v5 }
  0x37   : > { %3124 = vst.msk [vmem:[#allocation3 + $0xf0] sm:$0xff] %vm280_vm1, %v7298_v5  ;;  %3125 = vst.msk [vmem:[#allocation3 + $0xf8] sm:$0xff] %vm280_vm1, %v7298_v5 }
  0x38   : > { %3126 = vst.msk [vmem:[#allocation3 + $0x100] sm:$0x3] %vm283_vm2, %v7298_v5  ;;  %3129 = vst.msk [vmem:[#allocation3 + $0x118] sm:$0x3] %vm283_vm2, %v7298_v5 }
  0x39   : > { %3127 = vst.msk [vmem:[#allocation3 + $0x108] sm:$0xff] %vm280_vm1, %v7298_v5  ;;  %3128 = vst.msk [vmem:[#allocation3 + $0x110] sm:$0xff] %vm280_vm1, %v7298_v5 }
  0x3a   : > { %3130 = vst.msk [vmem:[#allocation3 + $0x120] sm:$0xff] %vm280_vm1, %v7298_v5  ;;  %3131 = vst.msk [vmem:[#allocation3 + $0x128] sm:$0xff] %vm280_vm1, %v7298_v5 }
  0x3b   : > { %3132 = vst.msk [vmem:[#allocation3 + $0x130] sm:$0x3] %vm283_vm2, %v7298_v5  ;;  %3135 = vst.msk [vmem:[#allocation3 + $0x148] sm:$0x3] %vm283_vm2, %v7298_v5 }
  0x3c   : > { %3133 = vst.msk [vmem:[#allocation3 + $0x138] sm:$0xff] %vm280_vm1, %v7298_v5  ;;  %3134 = vst.msk [vmem:[#allocation3 + $0x140] sm:$0xff] %vm280_vm1, %v7298_v5 }
  0x3d   : > { %3136 = vst.msk [vmem:[#allocation3 + $0x150] sm:$0xff] %vm280_vm1, %v7298_v5  ;;  %3137 = vst.msk [vmem:[#allocation3 + $0x158] sm:$0xff] %vm280_vm1, %v7298_v5 }
  0x3e   : > { %3138 = vst.msk [vmem:[#allocation3 + $0x160] sm:$0x3] %vm283_vm2, %v7298_v5  ;;  %3141 = vst.msk [vmem:[#allocation3 + $0x178] sm:$0x3] %vm283_vm2, %v7298_v5 }
  0x3f   : > { %3139 = vst.msk [vmem:[#allocation3 + $0x168] sm:$0xff] %vm280_vm1, %v7298_v5  ;;  %3140 = vst.msk [vmem:[#allocation3 + $0x170] sm:$0xff] %vm280_vm1, %v7298_v5 }
  0x40   : > { %3142 = vst.msk [vmem:[#allocation3 + $0x180] sm:$0xff] %vm280_vm1, %v7298_v5  ;;  %3143 = vst.msk [vmem:[#allocation3 + $0x188] sm:$0xff] %vm280_vm1, %v7298_v5 }
  0x41   : > { %3144 = vst.msk [vmem:[#allocation3 + $0x190] sm:$0x3] %vm283_vm2, %v7298_v5  ;;  %3147 = vst.msk [vmem:[#allocation3 + $0x1a8] sm:$0x3] %vm283_vm2, %v7298_v5 }
  0x42   : > { %3145 = vst.msk [vmem:[#allocation3 + $0x198] sm:$0xff] %vm280_vm1, %v7298_v5  ;;  %3146 = vst.msk [vmem:[#allocation3 + $0x1a0] sm:$0xff] %vm280_vm1, %v7298_v5  ;;  %v357_v5 = vld [vmem:[%s7599_s14 + $0xa8] sm:$0xff] }
  0x43   : > { %369 = vst.msk [vmem:[#allocation2 + $0x19] sm:$0xff] %vm280_vm1, %v336_v7  ;;  %370 = vst.msk [vmem:[#allocation2 + $0x21] sm:$0xff] %vm280_vm1, %v337_v8  ;;  %v359_v7 = vld [vmem:[%s7599_s14 + $0xb8] sm:$0xff]  ;;  %v360_v8 = vld [vmem:[%s7599_s14 + $0xc0] sm:$0xff] }
  0x44   : > { %371 = vst.msk [vmem:[#allocation2 + $0x31] sm:$0xff] %vm280_vm1, %v338_v9  ;;  %372 = vst.msk [vmem:[#allocation2 + $0x39] sm:$0xff] %vm280_vm1, %v339_v15  ;;  %v364_v15 = vld [vmem:[%s7599_s14 + $0xe0] sm:$0xff] }
  0x45   : > { %373 = vst.msk [vmem:[#allocation2 + $0x49] sm:$0xff] %vm280_vm1, %v340_v16  ;;  %374 = vst.msk [vmem:[#allocation2 + $0x51] sm:$0xff] %vm280_vm1, %v341_v18  ;;  %v365_v16 = vld [vmem:[%s7599_s14 + $0xe8] sm:$0xff] }
  0x46   : > { %375 = vst.msk [vmem:[#allocation2 + $0x61] sm:$0xff] %vm280_vm1, %v342_v19  ;;  %376 = vst.msk [vmem:[#allocation2 + $0x69] sm:$0xff] %vm280_vm1, %v343_v20 }
  0x47   : > { %377 = vst.msk [vmem:[#allocation2 + $0x79] sm:$0xff] %vm280_vm1, %v344_v21  ;;  %378 = vst.msk [vmem:[#allocation2 + $0x81] sm:$0xff] %vm280_vm1, %v345_v22 }
  0x48   : > { %379 = vst.msk [vmem:[#allocation2 + $0x91] sm:$0xff] %vm280_vm1, %v346_v23  ;;  %380 = vst.msk [vmem:[#allocation2 + $0x99] sm:$0xff] %vm280_vm1, %v347_v24 }
  0x49   : > { %381 = vst.msk [vmem:[#allocation2 + $0xa9] sm:$0xff] %vm280_vm1, %v348_v25  ;;  %382 = vst.msk [vmem:[#allocation2 + $0xb1] sm:$0xff] %vm280_vm1, %v349_v26 }
  0x4a   : > { %383 = vst.msk [vmem:[#allocation2 + $0xc1] sm:$0xff] %vm280_vm1, %v350_v27  ;;  %384 = vst.msk [vmem:[#allocation2 + $0xc9] sm:$0xff] %vm280_vm1, %v351_v28  ;;  %v452_v33 = vld [vmem:[#allocation2 + $0x19] sm:$0xff]  ;;  %v453_v34 = vld [vmem:[#allocation2 + $0x21] sm:$0xff] }
  0x4b   : > { %385 = vst.msk [vmem:[#allocation2 + $0xd9] sm:$0xff] %vm280_vm1, %v352_v29  ;;  %v403_v35 = vld [vmem:[#allocation2 + $0x18] sm:$0xff]  ;;  %386 = vst.msk [vmem:[#allocation2 + $0xe1] sm:$0xff] %vm280_vm1, %v353_v30  ;;  %v7643_v36 = vpack.c.bf16 %v453_v34, %v452_v33  ;;  %v404_v37 = vld [vmem:[#allocation2 + $0x20] sm:$0xff] }
  0x4c   : > { %387 = vst.msk [vmem:[#allocation2 + $0xf1] sm:$0xff] %vm280_vm1, %v354_v31  ;;  %388 = vst.msk [vmem:[#allocation2 + $0xf9] sm:$0xff] %vm280_vm1, %v355_v32  ;;  %v454_v39 = vld [vmem:[#allocation2 + $0x31] sm:$0xff]  ;;  %v7647_v41 = vpack.c.bf16 %v404_v37, %v403_v35  ;;  %v455_v42 = vld [vmem:[#allocation2 + $0x39] sm:$0xff] }
  0x4d   : > { %v405_v40 = vld [vmem:[#allocation2 + $0x30] sm:$0xff]  ;;  %v406_v43 = vld [vmem:[#allocation2 + $0x38] sm:$0xff]  ;;  %6654 = vmatmul.mubr.msk.bf16.vlgmr.msra.gmra.mxu0 %vm280_vm1, %v7643_v36  ;;  %v7651_v44 = vpack.c.bf16 %v455_v42, %v454_v39  ;;  %v407_v50 = vld [vmem:[#allocation2 + $0x48] sm:$0xff]  ;;  %389 = vst.msk [vmem:[#allocation2 + $0x109] sm:$0xff] %vm280_vm1, %v356_v4 }
  0x4e   : > { %v7653_v45 = vpack.c.bf16 %v406_v43, %v405_v40  ;;  %6688 = vmatmul.mubr.msk.bf16.vlgmr.msra.gmra.mxu1 %vm280_vm1, %v7647_v41  ;;  %6720 = vmatpush3.bf16.msra.mxu0 %v1024_v38  ;;  %v456_v48 = vld [vmem:[#allocation2 + $0x49] sm:$0xff]  ;;  %v457_v49 = vld [vmem:[#allocation2 + $0x51] sm:$0xff]  ;;  %v458_v52 = vld [vmem:[#allocation2 + $0x61] sm:$0xff]  ;;  %390 = vst.msk [vmem:[#allocation2 + $0x111] sm:$0xff] %vm280_vm1, %v357_v5 }
  0x4f   : > { %6657 = vmatprep.mubr.msk.bf16.mxu0 %vm280_vm1, %v7651_v44  ;;  %v408_v51 = vld [vmem:[#allocation2 + $0x50] sm:$0xff]  ;;  %v409_v54 = vld [vmem:[#allocation2 + $0x60] sm:$0xff]  ;;  %v410_v55 = vld [vmem:[#allocation2 + $0x68] sm:$0xff]  ;;  %6754 = vmatpush3.bf16.msra.mxu1 %v1318_v46  ;;  %v7670_v56 = vpack.c.bf16 %v457_v49, %v456_v48  ;;  %391 = vst.msk [vmem:[#allocation2 + $0x121] sm:$0xff] %vm280_vm1, %v358_v6 }
  0x50   : > { %6691 = vmatprep.mubr.msk.bf16.mxu1 %vm280_vm1, %v7653_v45  ;;  %v459_v53 = vld [vmem:[#allocation2 + $0x69] sm:$0xff]  ;;  %7267 = vmatprep.subr.msk.bf16.mxu0 %vm548_vm0, %v7660_v47  ;;  %v7672_v57 = vpack.c.bf16 %v408_v51, %v407_v50  ;;  %v7676_v59 = vpack.c.bf16 %v410_v55, %v409_v54  ;;  %v460_v60 = vld [vmem:[#allocation2 + $0x79] sm:$0xff]  ;;  %v461_v61 = vld [vmem:[#allocation2 + $0x81] sm:$0xff]  ;;  %392 = vst.msk [vmem:[#allocation2 + $0x129] sm:$0xff] %vm280_vm1, %v359_v7 }
  0x51   : > { %v7674_v58 = vpack.c.bf16 %v459_v53, %v458_v52  ;;  %v411_v62 = vld [vmem:[#allocation2 + $0x78] sm:$0xff]  ;;  %v412_v63 = vld [vmem:[#allocation2 + $0x80] sm:$0xff]  ;;  %v413_v2 = vld [vmem:[#allocation2 + $0x90] sm:$0xff]  ;;  %v7693_v9 = vpack.c.bf16 %v461_v61, %v460_v60  ;;  %393 = vst.msk [vmem:[#allocation2 + $0x139] sm:$0xff] %vm280_vm1, %v360_v8 }
  0x52   : > { %v462_v0 = vld [vmem:[#allocation2 + $0x91] sm:$0xff]  ;;  %v463_v1 = vld [vmem:[#allocation2 + $0x99] sm:$0xff]  ;;  %v7701_v13 = vpack.c.bf16 %v412_v63, %v411_v62  ;;  %394 = vst.msk [vmem:[#allocation2 + $0x141] sm:$0xff] %vm280_vm1, %v361_v10  ;;  %395 = vst.msk [vmem:[#allocation2 + $0x151] sm:$0xff] %vm280_vm1, %v362_v11 }
  0x53   : > { %v414_v3 = vld [vmem:[#allocation2 + $0x98] sm:$0xff]  ;;  %v7703_v14 = vpack.c.bf16 %v463_v1, %v462_v0  ;;  %396 = vst.msk [vmem:[#allocation2 + $0x159] sm:$0xff] %vm280_vm1, %v363_v12  ;;  %397 = vst.msk [vmem:[#allocation2 + $0x169] sm:$0xff] %vm280_vm1, %v364_v15  ;;  %v464_v18 = vld [vmem:[#allocation2 + $0xa9] sm:$0xff] }
  0x54   : > { %v7710_v17 = vpack.c.bf16 %v414_v3, %v413_v2  ;;  %398 = vst.msk [vmem:[#allocation2 + $0x171] sm:$0xff] %vm280_vm1, %v365_v16  ;;  %v465_v19 = vld [vmem:[#allocation2 + $0xb1] sm:$0xff]  ;;  %v415_v20 = vld [vmem:[#allocation2 + $0xa8] sm:$0xff]  ;;  %v417_v24 = vld [vmem:[#allocation2 + $0xc0] sm:$0xff] }
  0x55   : > { %6658 = vmatmul.mubr.msk.bf16.gmra.mxu0 %vm280_vm1, %v7670_v56  ;;  %v416_v21 = vld [vmem:[#allocation2 + $0xb0] sm:$0xff]  ;;  %v466_v22 = vld [vmem:[#allocation2 + $0xc1] sm:$0xff]  ;;  %v7722_v26 = vpack.c.bf16 %v465_v19, %v464_v18  ;;  %v468_v30 = vld [vmem:[#allocation2 + $0xd9] sm:$0xff] }
  0x56   : > { %6692 = vmatmul.mubr.msk.bf16.gmra.mxu1 %vm280_vm1, %v7672_v57  ;;  %6661 = vmatprep.mubr.msk.bf16.mxu0 %vm280_vm1, %v7674_v58  ;;  %v467_v23 = vld [vmem:[#allocation2 + $0xc9] sm:$0xff]  ;;  %v7724_v27 = vpack.c.bf16 %v416_v21, %v415_v20  ;;  %v469_v31 = vld [vmem:[#allocation2 + $0xe1] sm:$0xff]  ;;  %v419_v32 = vld [vmem:[#allocation2 + $0xd8] sm:$0xff] }
  0x57   : > { %6695 = vmatprep.mubr.msk.bf16.mxu1 %vm280_vm1, %v7676_v59  ;;  %v418_v25 = vld [vmem:[#allocation2 + $0xc8] sm:$0xff]  ;;  %v7726_v28 = vpack.c.bf16 %v467_v23, %v466_v22  ;;  %v420_v33 = vld [vmem:[#allocation2 + $0xe0] sm:$0xff]  ;;  %v470_v34 = vld [vmem:[#allocation2 + $0xf1] sm:$0xff]  ;;  %v7738_v39 = vpack.c.bf16 %v469_v31, %v468_v30 }
  0x58   : > { %v7728_v29 = vpack.c.bf16 %v418_v25, %v417_v24  ;;  %v471_v35 = vld [vmem:[#allocation2 + $0xf9] sm:$0xff]  ;;  %v421_v37 = vld [vmem:[#allocation2 + $0xf0] sm:$0xff]  ;;  %v7740_v40 = vpack.c.bf16 %v420_v33, %v419_v32  ;;  %v423_v52 = vld [vmem:[#allocation2 + $0x108] sm:$0xff] }
  0x59   : > { %v422_v38 = vld [vmem:[#allocation2 + $0xf8] sm:$0xff]  ;;  %v7742_v42 = vpack.c.bf16 %v471_v35, %v470_v34  ;;  %v366_v46 = vld [vmem:[%s7599_s14 + $0xf0] sm:$0xff]  ;;  %v474_v54 = vld [vmem:[#allocation2 + $0x121] sm:$0xff] }
  0x5a   : > { %v7744_v43 = vpack.c.bf16 %v422_v38, %v421_v37  ;;  %v367_v48 = vld [vmem:[%s7599_s14 + $0xf8] sm:$0xff]  ;;  %v6117_v49 = vld [vmem:[%s9967_s1 + $0x14] sm:$0xf]  ;;  %399 = vst.msk [vmem:[#allocation2 + $0x181] sm:$0xff] %vm280_vm1, %v366_v46  ;;  %v472_v50 = vld [vmem:[#allocation2 + $0x109] sm:$0xff]  ;;  %v1612_v37 = vsel %vm548_vm0, %v7660_v47, 0 }
  0x5b   : > { %400 = vst.msk [vmem:[#allocation2 + $0x189] sm:$0xff] %vm280_vm1, %v367_v48  ;;  %7268 = vmatprep.subr.msk.bf16.mxu1 %vm548_vm0, %v6117_v49  ;;  %v473_v51 = vld [vmem:[#allocation2 + $0x111] sm:$0xff]  ;;  %v475_v55 = vld [vmem:[#allocation2 + $0x129] sm:$0xff]  ;;  %v425_v60 = vld [vmem:[#allocation2 + $0x120] sm:$0xff]  ;;  %v1906_v46 = vsel %vm548_vm0, %v6117_v49, 0 }
  0x5c   : > { %v424_v53 = vld [vmem:[#allocation2 + $0x110] sm:$0xff]  ;;  %v426_v61 = vld [vmem:[#allocation2 + $0x128] sm:$0xff]  ;;  %v7762_v62 = vpack.c.bf16 %v473_v51, %v472_v50  ;;  %v7766_v0 = vpack.c.bf16 %v475_v55, %v474_v54  ;;  %v476_v2 = vld [vmem:[#allocation2 + $0x139] sm:$0xff] }
  0x5d   : > { %6662 = vmatmul.mubr.msk.bf16.gmra.mxu0 %vm280_vm1, %v7693_v9  ;;  %v7764_v63 = vpack.c.bf16 %v424_v53, %v423_v52  ;;  %v7768_v1 = vpack.c.bf16 %v426_v61, %v425_v60  ;;  %v477_v3 = vld [vmem:[#allocation2 + $0x141] sm:$0xff]  ;;  %v427_v4 = vld [vmem:[#allocation2 + $0x138] sm:$0xff]  ;;  %v429_v8 = vld [vmem:[#allocation2 + $0x150] sm:$0xff] }
  0x5e   : > { %6696 = vmatmul.mubr.msk.bf16.gmra.mxu1 %vm280_vm1, %v7701_v13  ;;  %6665 = vmatprep.mubr.msk.bf16.mxu0 %vm280_vm1, %v7703_v14  ;;  %v428_v5 = vld [vmem:[#allocation2 + $0x140] sm:$0xff]  ;;  %v478_v6 = vld [vmem:[#allocation2 + $0x151] sm:$0xff]  ;;  %v7778_v11 = vpack.c.bf16 %v477_v3, %v476_v2  ;;  %v480_v18 = vld [vmem:[#allocation2 + $0x169] sm:$0xff] }
  0x5f   : > { %6699 = vmatprep.mubr.msk.bf16.mxu1 %vm280_vm1, %v7710_v17  ;;  %v479_v7 = vld [vmem:[#allocation2 + $0x159] sm:$0xff]  ;;  %v7780_v12 = vpack.c.bf16 %v428_v5, %v427_v4  ;;  %v481_v19 = vld [vmem:[#allocation2 + $0x171] sm:$0xff]  ;;  %v925_v20 = vld [vmem:[#allocation2 + $0x2] sm:$0xff] }
  0x60   : > { %v430_v10 = vld [vmem:[#allocation2 + $0x158] sm:$0xff]  ;;  %v7782_v15 = vpack.c.bf16 %v479_v7, %v478_v6  ;;  %v431_v21 = vld [vmem:[#allocation2 + $0x168] sm:$0xff]  ;;  %v432_v22 = vld [vmem:[#allocation2 + $0x170] sm:$0xff]  ;;  %v7794_v24 = vpack.c.bf16 %v481_v19, %v480_v18 }
  0x61   : > { %v7784_v16 = vpack.c.bf16 %v430_v10, %v429_v8  ;;  %v926_v23 = vld [vmem:[#allocation2 + $0xa] sm:$0xff]  ;;  %v7796_v25 = vpack.c.bf16 %v432_v22, %v431_v21  ;;  %v927_v31 = vld [vmem:[#allocation2 + $0x1a] sm:$0xff]  ;;  %v928_v32 = vld [vmem:[#allocation2 + $0x22] sm:$0xff] }
  0x62   : > { %v957_v30 = vpack.c.bf16 %v926_v23, %v925_v20  ;;  %v929_v33 = vld [vmem:[#allocation2 + $0x32] sm:$0xff]  ;;  %v930_v34 = vld [vmem:[#allocation2 + $0x3a] sm:$0xff]  ;;  %v7805_v35 = vpack.c.bf16 %v928_v32, %v927_v31  ;;  %v933_v49 = vld [vmem:[#allocation2 + $0x62] sm:$0xff] }
  0x63   : > { %v7809_v38 = vpack.c.bf16 %v930_v34, %v929_v33  ;;  %v7817_v48 = vld [vmem:[%s9967_s1 + $0x18] sm:$0xf]  ;;  %v7824_v47 = vld [vmem:[%s9967_s1 + $0x1c] sm:$0xf]  ;;  %v934_v51 = vld [vmem:[#allocation2 + $0x6a] sm:$0xff] }
  0x64   : > { %v932_v50 = vld [vmem:[#allocation2 + $0x52] sm:$0xff]  ;;  %v7836_v53 = vpack.c.bf16 %v934_v51, %v933_v49  ;;  %v935_v54 = vld [vmem:[#allocation2 + $0x7a] sm:$0xff]  ;;  %v936_v55 = vld [vmem:[#allocation2 + $0x82] sm:$0xff] }
  0x65   : > { %6666 = vmatmul.mubr.msk.bf16.gmra.mxu0 %vm280_vm1, %v7722_v26  ;;  %v937_v60 = vld [vmem:[#allocation2 + $0x92] sm:$0xff]  ;;  %v938_v61 = vld [vmem:[#allocation2 + $0x9a] sm:$0xff]  ;;  %v7846_v2 = vpack.c.bf16 %v936_v55, %v935_v54  ;;  %v939_v4 = vld [vmem:[#allocation2 + $0xaa] sm:$0xff] }
  0x66   : > { %6700 = vmatmul.mubr.msk.bf16.gmra.mxu1 %vm280_vm1, %v7724_v27  ;;  %6669 = vmatprep.mubr.msk.bf16.mxu0 %vm280_vm1, %v7726_v28  ;;  %v7848_v3 = vpack.c.bf16 %v938_v61, %v937_v60  ;;  %v940_v5 = vld [vmem:[#allocation2 + $0xb2] sm:$0xff]  ;;  %v941_v6 = vld [vmem:[#allocation2 + $0xc2] sm:$0xff]  ;;  %v942_v7 = vld [vmem:[#allocation2 + $0xca] sm:$0xff] }
  0x67   : > { %6703 = vmatprep.mubr.msk.bf16.mxu1 %vm280_vm1, %v7728_v29  ;;  %v7858_v8 = vpack.c.bf16 %v940_v5, %v939_v4  ;;  %v7860_v10 = vpack.c.bf16 %v942_v7, %v941_v6  ;;  %v943_v18 = vld [vmem:[#allocation2 + $0xda] sm:$0xff]  ;;  %v944_v19 = vld [vmem:[#allocation2 + $0xe2] sm:$0xff]  ;;  %v945_v20 = vld [vmem:[#allocation2 + $0xf2] sm:$0xff]  ;;  %v2201_v7 = vsel %vm548_vm0, %v7817_v48, 0 }
  0x68   : > { %v946_v21 = vld [vmem:[#allocation2 + $0xfa] sm:$0xff]  ;;  %v7870_v22 = vpack.c.bf16 %v944_v19, %v943_v18  ;;  %v948_v31 = vld [vmem:[#allocation2 + $0x112] sm:$0xff]  ;;  %v949_v32 = vld [vmem:[#allocation2 + $0x122] sm:$0xff]  ;;  %v2495_v18 = vsel %vm548_vm0, %v7824_v47, 0 }
  0x69   : > { %v967_v23 = vpack.c.bf16 %v946_v21, %v945_v20  ;;  %v950_v33 = vld [vmem:[#allocation2 + $0x12a] sm:$0xff]  ;;  %v954_v49 = vld [vmem:[#allocation2 + $0x15a] sm:$0xff]  ;;  %v956_v60 = vld [vmem:[#allocation2 + $0x172] sm:$0xff] }
  0x6a   : > { %v955_v55 = vld [vmem:[#allocation2 + $0x16a] sm:$0xff]  ;;  %v1249_v61 = vld [vmem:[#allocation2 + $0x180] sm:$0xff] }
  0x6b   : > { %v1250_v4 = vld [vmem:[#allocation2 + $0x188] sm:$0xff]  ;;  %v972_v5 = vpack.c.bf16 %v956_v60, %v955_v55  ;;  %v6168_v19 = vld [vmem:[%s9967_s1 + $0x20] sm:$0xf] }
  0x6c   : > { %v7891_v6 = vpack.c.bf16 %v1250_v4, %v1249_v61 }
  0x6d   : > { %6670 = vmatmul.mubr.msk.bf16.gmra.mxu0 %vm280_vm1, %v7738_v39 }
  0x6e   : > { %6704 = vmatmul.mubr.msk.bf16.gmra.mxu1 %vm280_vm1, %v7740_v40  ;;  %6673 = vmatprep.mubr.msk.bf16.mxu0 %vm280_vm1, %v7742_v42 }
  0x6f   : > { %6707 = vmatprep.mubr.msk.bf16.mxu1 %vm280_vm1, %v7744_v43 }
  0x75   : > { %6674 = vmatmul.mubr.msk.bf16.gmra.mxu0 %vm280_vm1, %v7762_v62 }
  0x76   : > { %6708 = vmatmul.mubr.msk.bf16.gmra.mxu1 %vm280_vm1, %v7764_v63  ;;  %6677 = vmatprep.mubr.msk.bf16.mxu0 %vm280_vm1, %v7766_v0 }
  0x77   : > { %6711 = vmatprep.mubr.msk.bf16.mxu1 %vm280_vm1, %v7768_v1 }
  0x7d   : > { %6678 = vmatmul.mubr.msk.bf16.gmra.mxu0 %vm280_vm1, %v7778_v11 }
  0x7e   : > { %6712 = vmatmul.mubr.msk.bf16.gmra.mxu1 %vm280_vm1, %v7780_v12  ;;  %6681 = vmatprep.mubr.msk.bf16.mxu0 %vm280_vm1, %v7782_v15 }
  0x7f   : > { %6715 = vmatprep.mubr.msk.bf16.mxu1 %vm280_vm1, %v7784_v16 }
  0x85   : > { %6682 = vmatmul.mubr.msk.bf16.gmra.mxu0 %vm280_vm1, %v7794_v24 }
  0x86   : > { %6716 = vmatmul.mubr.msk.bf16.gmra.mxu1 %vm280_vm1, %v7796_v25  ;;  %6721 = vmatprep.mubr.msk.bf16.mxu0 %vm280_vm1, %v957_v30  ;;  %v947_v30 = vld [vmem:[#allocation2 + $0x10a] sm:$0xff] }
  0x87   : > { %6755 = vmatprep.mubr.msk.bf16.mxu1 %vm280_vm1, %v7647_v41  ;;  %v931_v41 = vld [vmem:[#allocation2 + $0x4a] sm:$0xff]  ;;  %v968_v34 = vpack.c.bf16 %v948_v31, %v947_v30 }
  0x88   : > { %v7832_v52 = vpack.c.bf16 %v932_v50, %v931_v41  ;;  %v952_v41 = vld [vmem:[#allocation2 + $0x142] sm:$0xff]  ;;  %v953_v50 = vld [vmem:[#allocation2 + $0x152] sm:$0xff] }
  0x89   : > { %v971_v54 = vpack.c.bf16 %v954_v49, %v953_v50 }
  0x8d   : > { %6722 = vmatmul.mubr.msk.bf16.vlgmr.msra.gmra.mxu0 %vm280_vm1, %v7805_v35 }
  0x8e   : > { %6788 = vmatpush3.bf16.msra.mxu0 %v1612_v37  ;;  %6756 = vmatmul.mubr.msk.bf16.vlgmr.msra.gmra.mxu1 %vm280_vm1, %v7653_v45  ;;  %v969_v37 = vpack.c.bf16 %v950_v33, %v949_v32 }
  0x8f   : > { %6725 = vmatprep.mubr.msk.bf16.mxu0 %vm280_vm1, %v7809_v38  ;;  %6759 = vmatprep.mubr.msk.bf16.mxu1 %vm280_vm1, %v7672_v57 }
  0x90   : > { %6822 = vmatpush3.bf16.msra.mxu1 %v1906_v46  ;;  %7269 = vmatprep.subr.msk.bf16.mxu0 %vm548_vm0, %v7817_v48  ;;  %v951_v46 = vld [vmem:[#allocation2 + $0x13a] sm:$0xff]  ;;  %v1837_v48 = vld [vmem:[#allocation2 + $0x182] sm:$0xff] }
  0x91   : > { %7270 = vmatprep.subr.msk.bf16.mxu1 %vm548_vm0, %v7824_v47  ;;  %v970_v51 = vpack.c.bf16 %v952_v41, %v951_v46  ;;  %v1838_v47 = vld [vmem:[#allocation2 + $0x18a] sm:$0xff] }
  0x92   : > { %v7960_v21 = vpack.c.bf16 %v1838_v47, %v1837_v48 }
  0x95   : > { %6726 = vmatmul.mubr.msk.bf16.gmra.mxu0 %vm280_vm1, %v7832_v52 }
  0x96   : > { %6760 = vmatmul.mubr.msk.bf16.gmra.mxu1 %vm280_vm1, %v7676_v59  ;;  %6729 = vmatprep.mubr.msk.bf16.mxu0 %vm280_vm1, %v7836_v53 }
  0x97   : > { %6763 = vmatprep.mubr.msk.bf16.mxu1 %vm280_vm1, %v7701_v13 }
  0x9d   : > { %6730 = vmatmul.mubr.msk.bf16.gmra.mxu0 %vm280_vm1, %v7846_v2 }
  0x9e   : > { %6764 = vmatmul.mubr.msk.bf16.gmra.mxu1 %vm280_vm1, %v7710_v17  ;;  %6733 = vmatprep.mubr.msk.bf16.mxu0 %vm280_vm1, %v7848_v3 }
  0x9f   : > { %6767 = vmatprep.mubr.msk.bf16.mxu1 %vm280_vm1, %v7724_v27 }
  0xa5   : > { %6734 = vmatmul.mubr.msk.bf16.gmra.mxu0 %vm280_vm1, %v7858_v8 }
  0xa6   : > { %6768 = vmatmul.mubr.msk.bf16.gmra.mxu1 %vm280_vm1, %v7728_v29  ;;  %6737 = vmatprep.mubr.msk.bf16.mxu0 %vm280_vm1, %v7860_v10 }
  0xa7   : > { %6771 = vmatprep.mubr.msk.bf16.mxu1 %vm280_vm1, %v7740_v40 }
  0xad   : > { %6738 = vmatmul.mubr.msk.bf16.gmra.mxu0 %vm280_vm1, %v7870_v22 }
  0xae   : > { %6772 = vmatmul.mubr.msk.bf16.gmra.mxu1 %vm280_vm1, %v7744_v43  ;;  %6741 = vmatprep.mubr.msk.bf16.mxu0 %vm280_vm1, %v967_v23 }
  0xaf   : > { %6775 = vmatprep.mubr.msk.bf16.mxu1 %vm280_vm1, %v7764_v63 }
  0xb5   : > { %6742 = vmatmul.mubr.msk.bf16.gmra.mxu0 %vm280_vm1, %v968_v34 }
  0xb6   : > { %6776 = vmatmul.mubr.msk.bf16.gmra.mxu1 %vm280_vm1, %v7768_v1  ;;  %6745 = vmatprep.mubr.msk.bf16.mxu0 %vm280_vm1, %v969_v37 }
  0xb7   : > { %6779 = vmatprep.mubr.msk.bf16.mxu1 %vm280_vm1, %v7780_v12 }
  0xbd   : > { %6746 = vmatmul.mubr.msk.bf16.gmra.mxu0 %vm280_vm1, %v970_v51 }
  0xbe   : > { %6780 = vmatmul.mubr.msk.bf16.gmra.mxu1 %vm280_vm1, %v7784_v16  ;;  %6749 = vmatprep.mubr.msk.bf16.mxu0 %vm280_vm1, %v971_v54 }
  0xbf   : > { %6783 = vmatprep.mubr.msk.bf16.mxu1 %vm280_vm1, %v7796_v25 }
  0xc5   : > { %6750 = vmatmul.mubr.msk.bf16.gmra.mxu0 %vm280_vm1, %v972_v5 }
  0xc6   : > { %6784 = vmatmul.mubr.msk.bf16.gmra.mxu1 %vm280_vm1, %v7891_v6  ;;  %6789 = vmatprep.mubr.msk.bf16.mxu0 %vm280_vm1, %v7643_v36  ;;  %v1543_v36 = vld [vmem:[#allocation2 + $0x181] sm:$0xff] }
  0xc7   : > { %6823 = vmatprep.mubr.msk.bf16.mxu1 %vm280_vm1, %v7805_v35  ;;  %v1544_v35 = vld [vmem:[#allocation2 + $0x189] sm:$0xff] }
  0xc8   : > { %v7958_v20 = vpack.c.bf16 %v1544_v35, %v1543_v36 }
  0xcd   : > { %6790 = vmatmul.mubr.msk.bf16.vlgmr.msra.gmra.mxu0 %vm280_vm1, %v7651_v44 }
  0xce   : > { %6856 = vmatpush3.bf16.msra.mxu0 %v2201_v7  ;;  %6824 = vmatmul.mubr.msk.bf16.vlgmr.msra.gmra.mxu1 %vm280_vm1, %v7809_v38 }
  0xcf   : > { %6793 = vmatprep.mubr.msk.bf16.mxu0 %vm280_vm1, %v7670_v56  ;;  %6827 = vmatprep.mubr.msk.bf16.mxu1 %vm280_vm1, %v7832_v52 }
  0xd0   : > { %6890 = vmatpush3.bf16.msra.mxu1 %v2495_v18  ;;  %7271 = vmatprep.subr.msk.bf16.mxu0 %vm548_vm0, %v6168_v19 }
  0xd5   : > { %6794 = vmatmul.mubr.msk.bf16.gmra.mxu0 %vm280_vm1, %v7674_v58 }
  0xd6   : > { %6828 = vmatmul.mubr.msk.bf16.gmra.mxu1 %vm280_vm1, %v7836_v53  ;;  %6797 = vmatprep.mubr.msk.bf16.mxu0 %vm280_vm1, %v7693_v9 }
  0xd7   : > { %6831 = vmatprep.mubr.msk.bf16.mxu1 %vm280_vm1, %v7846_v2 }
  0xdd   : > { %6798 = vmatmul.mubr.msk.bf16.gmra.mxu0 %vm280_vm1, %v7703_v14 }
  0xde   : > { %6832 = vmatmul.mubr.msk.bf16.gmra.mxu1 %vm280_vm1, %v7848_v3  ;;  %6801 = vmatprep.mubr.msk.bf16.mxu0 %vm280_vm1, %v7722_v26 }
  0xdf   : > { %6835 = vmatprep.mubr.msk.bf16.mxu1 %vm280_vm1, %v7858_v8 }
  0xe5   : > { %6802 = vmatmul.mubr.msk.bf16.gmra.mxu0 %vm280_vm1, %v7726_v28 }
  0xe6   : > { %6836 = vmatmul.mubr.msk.bf16.gmra.mxu1 %vm280_vm1, %v7860_v10  ;;  %6805 = vmatprep.mubr.msk.bf16.mxu0 %vm280_vm1, %v7738_v39 }
  0xe7   : > { %6839 = vmatprep.mubr.msk.bf16.mxu1 %vm280_vm1, %v7870_v22 }
  0xed   : > { %6806 = vmatmul.mubr.msk.bf16.gmra.mxu0 %vm280_vm1, %v7742_v42 }
  0xee   : > { %6840 = vmatmul.mubr.msk.bf16.gmra.mxu1 %vm280_vm1, %v967_v23  ;;  %6809 = vmatprep.mubr.msk.bf16.mxu0 %vm280_vm1, %v7762_v62  ;;  %v2789_v23 = vsel %vm548_vm0, %v6168_v19, 0 }
  0xef   : > { %6843 = vmatprep.mubr.msk.bf16.mxu1 %vm280_vm1, %v968_v34 }
  0xf5   : > { %6810 = vmatmul.mubr.msk.bf16.gmra.mxu0 %vm280_vm1, %v7766_v0 }
  0xf6   : > { %6844 = vmatmul.mubr.msk.bf16.gmra.mxu1 %vm280_vm1, %v969_v37  ;;  %6813 = vmatprep.mubr.msk.bf16.mxu0 %vm280_vm1, %v7778_v11 }
  0xf7   : > { %6847 = vmatprep.mubr.msk.bf16.mxu1 %vm280_vm1, %v970_v51 }
  0xfd   : > { %6814 = vmatmul.mubr.msk.bf16.gmra.mxu0 %vm280_vm1, %v7782_v15 }
  0xfe   : > { %6848 = vmatmul.mubr.msk.bf16.gmra.mxu1 %vm280_vm1, %v971_v54  ;;  %6817 = vmatprep.mubr.msk.bf16.mxu0 %vm280_vm1, %v7794_v24 }
  0xff   : > { %6851 = vmatprep.mubr.msk.bf16.mxu1 %vm280_vm1, %v972_v5 }
 0x105   : > { %6818 = vmatmul.mubr.msk.bf16.gmra.mxu0 %vm280_vm1, %v7958_v20 }
 0x106   : > { %6852 = vmatmul.mubr.msk.bf16.gmra.mxu1 %vm280_vm1, %v7960_v21  ;;  %6857 = vmatprep.mubr.msk.bf16.mxu0 %vm280_vm1, %v7653_v45 }
 0x107   : > { %6891 = vmatprep.mubr.msk.bf16.mxu1 %vm280_vm1, %v7651_v44 }
 0x10d   : > { %v6655_v30 = vpop.f32.mrf.mxu0  ;;  %6858 = vmatmul.mubr.msk.bf16.vlgmr.msra.gmra.mxu0 %vm280_vm1, %v7672_v57 }
 0x10e   : > { %v6689_v31 = vpop.f32.mrf.mxu1  ;;  %6924 = vmatpush3.bf16.msra.mxu0 %v2789_v23  ;;  %6892 = vmatmul.mubr.msk.bf16.vlgmr.msra.gmra.mxu1 %vm280_vm1, %v7670_v56 }
 0x10f   : > { %v7975_v32 = vadd.f32 %v6689_v31, %v6655_v30  ;;  %v586_v33 = vpop.f32.mrf.mxu0  ;;  %6861 = vmatprep.mubr.msk.bf16.mxu0 %vm280_vm1, %v7676_v59  ;;  %6895 = vmatprep.mubr.msk.bf16.mxu1 %vm280_vm1, %v7674_v58 }
 0x110   : > { %v798_v44 = vpop.f32.mrf.mxu1 }
 0x111   : > { %v7981_v45 = vadd.f32 %v798_v44, %v586_v33  ;;  %v6656_v34 = vpop.f32.mrf.mxu0 }
 0x112   : > { %v6690_v37 = vpop.f32.mrf.mxu1 }
 0x113   : > { %v7983_v57 = vadd.f32 %v6690_v37, %v6656_v34  ;;  %v589_v46 = vpop.f32.mrf.mxu0 }
 0x114   : > { %v801_v41 = vpop.f32.mrf.mxu1 }
 0x115   : > { %v7985_v50 = vadd.f32 %v801_v41, %v589_v46  ;;  %v6659_v56 = vpop.f32.mrf.mxu0  ;;  %6862 = vmatmul.mubr.msk.bf16.gmra.mxu0 %vm280_vm1, %v7701_v13 }
 0x116   : > { %v6693_v49 = vpop.f32.mrf.mxu1  ;;  %6896 = vmatmul.mubr.msk.bf16.gmra.mxu1 %vm280_vm1, %v7693_v9  ;;  %6865 = vmatprep.mubr.msk.bf16.mxu0 %vm280_vm1, %v7710_v17 }
 0x117   : > { %v7993_v58 = vadd.f32 %v6693_v49, %v6659_v56  ;;  %v602_v59 = vpop.f32.mrf.mxu0  ;;  %6899 = vmatprep.mubr.msk.bf16.mxu1 %vm280_vm1, %v7703_v14 }
 0x118   : > { %v814_v51 = vpop.f32.mrf.mxu1 }
 0x119   : > { %v7997_v54 = vadd.f32 %v814_v51, %v602_v59  ;;  %v6660_v55 = vpop.f32.mrf.mxu0 }
 0x11a   : > { %v6694_v60 = vpop.f32.mrf.mxu1 }
 0x11b   : > { %v7999_v61 = vadd.f32 %v6694_v60, %v6660_v55  ;;  %v605_v13 = vpop.f32.mrf.mxu0 }
 0x11c   : > { %v817_v4 = vpop.f32.mrf.mxu1 }
 0x11d   : > { %v8001_v5 = vadd.f32 %v817_v4, %v605_v13  ;;  %v6663_v9 = vpop.f32.mrf.mxu0  ;;  %6866 = vmatmul.mubr.msk.bf16.gmra.mxu0 %vm280_vm1, %v7724_v27 }
 0x11e   : > { %v6697_v17 = vpop.f32.mrf.mxu1  ;;  %6900 = vmatmul.mubr.msk.bf16.gmra.mxu1 %vm280_vm1, %v7722_v26  ;;  %6869 = vmatprep.mubr.msk.bf16.mxu0 %vm280_vm1, %v7728_v29 }
 0x11f   : > { %v8009_v14 = vadd.f32 %v6697_v17, %v6663_v9  ;;  %v618_v7 = vpop.f32.mrf.mxu0  ;;  %6903 = vmatprep.mubr.msk.bf16.mxu1 %vm280_vm1, %v7726_v28 }
 0x120   : > { %v830_v18 = vpop.f32.mrf.mxu1 }
 0x121   : > { %v8013_v19 = vadd.f32 %v830_v18, %v618_v7  ;;  %v6664_v36 = vpop.f32.mrf.mxu0 }
 0x122   : > { %v6698_v35 = vpop.f32.mrf.mxu1 }
 0x123   : > { %v8015_v48 = vadd.f32 %v6698_v35, %v6664_v36  ;;  %v621_v27 = vpop.f32.mrf.mxu0 }
 0x124   : > { %v833_v47 = vpop.f32.mrf.mxu1 }
 0x125   : > { %v8017_v23 = vadd.f32 %v833_v47, %v621_v27  ;;  %v6667_v26 = vpop.f32.mrf.mxu0  ;;  %6870 = vmatmul.mubr.msk.bf16.gmra.mxu0 %vm280_vm1, %v7740_v40  ;;  %v2133_v27 = vld [vmem:[#allocation2 + $0x1a0] sm:$0xff] }
 0x126   : > { %v6701_v29 = vpop.f32.mrf.mxu1  ;;  %6904 = vmatmul.mubr.msk.bf16.gmra.mxu1 %vm280_vm1, %v7738_v39  ;;  %6873 = vmatprep.mubr.msk.bf16.mxu0 %vm280_vm1, %v7744_v43 }
 0x127   : > { %v8025_v28 = vadd.f32 %v6701_v29, %v6667_v26  ;;  %v634_v30 = vpop.f32.mrf.mxu0  ;;  %6907 = vmatprep.mubr.msk.bf16.mxu1 %vm280_vm1, %v7742_v42  ;;  %v2426_v29 = vld [vmem:[#allocation2 + $0x199] sm:$0xff] }
 0x128   : > { %v846_v31 = vpop.f32.mrf.mxu1 }
 0x129   : > { %v8029_v33 = vadd.f32 %v846_v31, %v634_v30  ;;  %v6668_v44 = vpop.f32.mrf.mxu0  ;;  %v2427_v30 = vld [vmem:[#allocation2 + $0x1a1] sm:$0xff] }
 0x12a   : > { %v6702_v34 = vpop.f32.mrf.mxu1 }
 0x12b   : > { %v8031_v37 = vadd.f32 %v6702_v34, %v6668_v44  ;;  %v637_v40 = vpop.f32.mrf.mxu0 }
 0x12c   : > { %v849_v46 = vpop.f32.mrf.mxu1 }
 0x12d   : > { %v8033_v41 = vadd.f32 %v849_v46, %v637_v40  ;;  %v6671_v39 = vpop.f32.mrf.mxu0  ;;  %6874 = vmatmul.mubr.msk.bf16.gmra.mxu0 %vm280_vm1, %v7764_v63 }
 0x12e   : > { %v6705_v43 = vpop.f32.mrf.mxu1  ;;  %6908 = vmatmul.mubr.msk.bf16.gmra.mxu1 %vm280_vm1, %v7762_v62  ;;  %6877 = vmatprep.mubr.msk.bf16.mxu0 %vm280_vm1, %v7768_v1 }
 0x12f   : > { %v8041_v42 = vadd.f32 %v6705_v43, %v6671_v39  ;;  %v650_v56 = vpop.f32.mrf.mxu0  ;;  %6911 = vmatprep.mubr.msk.bf16.mxu1 %vm280_vm1, %v7766_v0 }
 0x130   : > { %v862_v49 = vpop.f32.mrf.mxu1 }
 0x131   : > { %v8045_v59 = vadd.f32 %v862_v49, %v650_v56  ;;  %v6672_v51 = vpop.f32.mrf.mxu0 }
 0x132   : > { %v6706_v55 = vpop.f32.mrf.mxu1 }
 0x133   : > { %v8047_v60 = vadd.f32 %v6706_v55, %v6672_v51  ;;  %v8049_v63 = vpop.f32.mrf.mxu0 }
 0x134   : > { %v8051_v13 = vpop.f32.mrf.mxu1 }
 0x135   : > { %v6675_v62 = vpop.f32.mrf.mxu0  ;;  %6878 = vmatmul.mubr.msk.bf16.gmra.mxu0 %vm280_vm1, %v7780_v12 }
 0x136   : > { %v6709_v1 = vpop.f32.mrf.mxu1  ;;  %6912 = vmatmul.mubr.msk.bf16.gmra.mxu1 %vm280_vm1, %v7778_v11  ;;  %6881 = vmatprep.mubr.msk.bf16.mxu0 %vm280_vm1, %v7784_v16 }
 0x137   : > { %v8059_v0 = vadd.f32 %v6709_v1, %v6675_v62  ;;  %v666_v4 = vpop.f32.mrf.mxu0  ;;  %6915 = vmatprep.mubr.msk.bf16.mxu1 %vm280_vm1, %v7782_v15  ;;  %v2132_v15 = vld [vmem:[#allocation2 + $0x198] sm:$0xff] }
 0x138   : > { %v878_v9 = vpop.f32.mrf.mxu1  ;;  %v2149_v34 = vpack.c.bf16 %v2133_v27, %v2132_v15 }
 0x139   : > { %v8063_v17 = vadd.f32 %v878_v9, %v666_v4  ;;  %v6676_v7 = vpop.f32.mrf.mxu0 }
 0x13a   : > { %v6710_v18 = vpop.f32.mrf.mxu1 }
 0x13b   : > { %v8065_v36 = vadd.f32 %v6710_v18, %v6676_v7  ;;  %v8067_v12 = vpop.f32.mrf.mxu0 }
 0x13c   : > { %v8069_v35 = vpop.f32.mrf.mxu1 }
 0x13d   : > { %v6679_v11 = vpop.f32.mrf.mxu0  ;;  %6882 = vmatmul.mubr.msk.bf16.gmra.mxu0 %vm280_vm1, %v7796_v25 }
 0x13e   : > { %v6713_v16 = vpop.f32.mrf.mxu1  ;;  %6916 = vmatmul.mubr.msk.bf16.gmra.mxu1 %vm280_vm1, %v7794_v24  ;;  %6885 = vmatprep.mubr.msk.bf16.mxu0 %vm280_vm1, %v7891_v6  ;;  %v2443_v24 = vpack.c.bf16 %v2427_v30, %v2426_v29 }
 0x13f   : > { %v8077_v47 = vadd.f32 %v6713_v16, %v6679_v11  ;;  %v682_v26 = vpop.f32.mrf.mxu0  ;;  %6919 = vmatprep.mubr.msk.bf16.mxu1 %vm280_vm1, %v7958_v20 }
 0x140   : > { %v894_v31 = vpop.f32.mrf.mxu1 }
 0x141   : > { %v8081_v44 = vadd.f32 %v894_v31, %v682_v26  ;;  %v6680_v25 = vpop.f32.mrf.mxu0 }
 0x142   : > { %v6714_v40 = vpop.f32.mrf.mxu1 }
 0x143   : > { %v8083_v46 = vadd.f32 %v6714_v40, %v6680_v25  ;;  %v8085_v6 = vpop.f32.mrf.mxu0 }
 0x144   : > { %v8087_v39 = vpop.f32.mrf.mxu1 }
 0x145   : > { %v6683_v43 = vpop.f32.mrf.mxu0  ;;  %6886 = vmatmul.mubr.msk.bf16.gmra.mxu0 %vm280_vm1, %v2149_v34 }
 0x146   : > { %v6717_v56 = vpop.f32.mrf.mxu1  ;;  %6920 = vmatmul.mubr.msk.bf16.gmra.mxu1 %vm280_vm1, %v2443_v24  ;;  %6925 = vmatprep.mubr.msk.bf16.mxu0 %vm280_vm1, %v7809_v38 }
 0x147   : > { %v8093_v20 = vadd.f32 %v6717_v56, %v6683_v43  ;;  %v698_v49 = vpop.f32.mrf.mxu0 }
 0x148   : > { %v910_v51 = vpop.f32.mrf.mxu1 }
 0x149   : > { %v8095_v55 = vadd.f32 %v910_v51, %v698_v49  ;;  %v6684_v62 = vpop.f32.mrf.mxu0 }
 0x14a   : > { %v6718_v1 = vpop.f32.mrf.mxu1 }
 0x14b   : > { %v8097_v4 = vadd.f32 %v6718_v1, %v6684_v62  ;;  %v8099_v9 = vpop.f32.mrf.mxu0 }
 0x14c   : > { %v8101_v7 = vpop.f32.mrf.mxu1 }
 0x14d   : > { %v6723_v18 = vpop.f32.mrf.mxu0  ;;  %6926 = vmatmul.mubr.msk.bf16.vlgmr.msra.gmra.mxu0 %vm280_vm1, %v7832_v52 }
 0x14e   : > { %v1189_v38 = vadd.f32 %v6723_v18, %v7975_v32  ;;  %v6757_v11 = vpop.f32.mrf.mxu1  ;;  %6929 = vmatprep.mubr.msk.bf16.mxu0 %vm280_vm1, %v7836_v53 }
 0x14f   : > { %v1060_v16 = vpop.f32.mrf.mxu0 }
 0x150   : > { %v1187_v15 = vadd.f32 %v1060_v16, %v7981_v45  ;;  %v8109_v27 = vadd.f32 %v6757_v11, %v1189_v38  ;;  %v1354_v26 = vpop.f32.mrf.mxu1  ;;  %v2706_v16 = vld [vmem:[#allocation2 + $0xf2] sm:$0xff] }
 0x151   : > { %v6724_v29 = vpop.f32.mrf.mxu0 }
 0x152   : > { %v1190_v30 = vadd.f32 %v6724_v29, %v7983_v57  ;;  %v8112_v31 = vadd.f32 %v1354_v26, %v1187_v15  ;;  %v6758_v25 = vpop.f32.mrf.mxu1  ;;  %v2707_v15 = vld [vmem:[#allocation2 + $0xfa] sm:$0xff] }
 0x153   : > { %v1063_v34 = vpop.f32.mrf.mxu0 }
 0x154   : > { %v8115_v52 = vadd.f32 %v1063_v34, %v7985_v50  ;;  %v8117_v32 = vadd.f32 %v6758_v25, %v1190_v30  ;;  %v8119_v40 = vpop.f32.mrf.mxu1 }
 0x155   : > { %v6727_v53 = vpop.f32.mrf.mxu0  ;;  %6930 = vmatmul.mubr.msk.bf16.gmra.mxu0 %vm280_vm1, %v7846_v2 }
 0x156   : > { %v1193_v45 = vadd.f32 %v6727_v53, %v7993_v58  ;;  %v6761_v24 = vpop.f32.mrf.mxu1  ;;  %6933 = vmatprep.mubr.msk.bf16.mxu0 %vm280_vm1, %v7848_v3  ;;  %v2730_v53 = vpack.c.bf16 %v2707_v15, %v2706_v16 }
 0x157   : > { %v1076_v57 = vpop.f32.mrf.mxu0 }
 0x158   : > { %v1191_v43 = vadd.f32 %v1076_v57, %v7997_v54  ;;  %v8127_v56 = vadd.f32 %v6761_v24, %v1193_v45  ;;  %v1370_v50 = vpop.f32.mrf.mxu1 }
 0x159   : > { %v6728_v49 = vpop.f32.mrf.mxu0 }
 0x15a   : > { %v1194_v51 = vadd.f32 %v6728_v49, %v7999_v61  ;;  %v8130_v62 = vadd.f32 %v1370_v50, %v1191_v43  ;;  %v6762_v1 = vpop.f32.mrf.mxu1  ;;  %v2709_v50 = vld [vmem:[#allocation2 + $0x112] sm:$0xff] }
 0x15b   : > { %v1079_v18 = vpop.f32.mrf.mxu0 }
 0x15c   : > { %v8133_v2 = vadd.f32 %v1079_v18, %v8001_v5  ;;  %v8135_v58 = vadd.f32 %v6762_v1, %v1194_v51  ;;  %v8137_v38 = vpop.f32.mrf.mxu1  ;;  %v2710_v51 = vld [vmem:[#allocation2 + $0x122] sm:$0xff]  ;;  %v2711_v1 = vld [vmem:[#allocation2 + $0x12a] sm:$0xff] }
 0x15d   : > { %v6731_v3 = vpop.f32.mrf.mxu0  ;;  %6934 = vmatmul.mubr.msk.bf16.gmra.mxu0 %vm280_vm1, %v7858_v8 }
 0x15e   : > { %v1197_v54 = vadd.f32 %v6731_v3, %v8009_v14  ;;  %v6765_v11 = vpop.f32.mrf.mxu1  ;;  %6937 = vmatprep.mubr.msk.bf16.mxu0 %vm280_vm1, %v7860_v10 }
 0x15f   : > { %v1092_v61 = vpop.f32.mrf.mxu0 }
 0x160   : > { %v1195_v5 = vadd.f32 %v1092_v61, %v8013_v19  ;;  %v8145_v26 = vadd.f32 %v6765_v11, %v1197_v54  ;;  %v1386_v29 = vpop.f32.mrf.mxu1 }
 0x161   : > { %v6732_v30 = vpop.f32.mrf.mxu0 }
 0x162   : > { %v1198_v25 = vadd.f32 %v6732_v30, %v8015_v48  ;;  %v8148_v34 = vadd.f32 %v1386_v29, %v1195_v5  ;;  %v6766_v8 = vpop.f32.mrf.mxu1  ;;  %v2708_v48 = vld [vmem:[#allocation2 + $0x10a] sm:$0xff]  ;;  %v2732_v5 = vpack.c.bf16 %v2711_v1, %v2710_v51 }
 0x163   : > { %v1095_v14 = vpop.f32.mrf.mxu0  ;;  %v2731_v11 = vpack.c.bf16 %v2709_v50, %v2708_v48  ;;  %v2715_v48 = vld [vmem:[#allocation2 + $0x15a] sm:$0xff] }
 0x164   : > { %v8151_v45 = vadd.f32 %v1095_v14, %v8017_v23  ;;  %v8153_v10 = vadd.f32 %v6766_v8, %v1198_v25  ;;  %v8155_v24 = vpop.f32.mrf.mxu1  ;;  %v6187_v23 = vld [vmem:[%s9970_s4 + $0x4] sm:$0xf] }
 0x165   : > { %v6735_v57 = vpop.f32.mrf.mxu0  ;;  %6938 = vmatmul.mubr.msk.bf16.gmra.mxu0 %vm280_vm1, %v7870_v22  ;;  %7272 = vmatprep.subr.msk.bf16.mxu1 %vm548_vm0, %v6187_v23  ;;  %v3329_v18 = vsel %vm548_vm0, %v6187_v23, 0 }
 0x166   : > { %v1201_v19 = vadd.f32 %v6735_v57, %v8025_v28  ;;  %v6769_v43 = vpop.f32.mrf.mxu1  ;;  %6941 = vmatprep.mubr.msk.bf16.mxu0 %vm280_vm1, %v2730_v53  ;;  %6958 = vmatpush3.bf16.msra.mxu1 %v3329_v18  ;;  %v2713_v57 = vld [vmem:[#allocation2 + $0x142] sm:$0xff] }
 0x167   : > { %v1108_v49 = vpop.f32.mrf.mxu0 }
 0x168   : > { %v1199_v22 = vadd.f32 %v1108_v49, %v8029_v33  ;;  %v8167_v3 = vadd.f32 %v6769_v43, %v1201_v19  ;;  %v1402_v28 = vpop.f32.mrf.mxu1  ;;  %v2714_v43 = vld [vmem:[#allocation2 + $0x152] sm:$0xff] }
 0x169   : > { %v6736_v54 = vpop.f32.mrf.mxu0 }
 0x16a   : > { %v1202_v61 = vadd.f32 %v6736_v54, %v8031_v37  ;;  %v8170_v16 = vadd.f32 %v1402_v28, %v1199_v22  ;;  %v6770_v15 = vpop.f32.mrf.mxu1  ;;  %v2712_v37 = vld [vmem:[#allocation2 + $0x13a] sm:$0xff]  ;;  %v2734_v22 = vpack.c.bf16 %v2715_v48, %v2714_v43 }
 0x16b   : > { %v1111_v29 = vpop.f32.mrf.mxu0  ;;  %v2733_v51 = vpack.c.bf16 %v2713_v57, %v2712_v37 }
 0x16c   : > { %v8173_v30 = vadd.f32 %v1111_v29, %v8033_v41  ;;  %v8175_v25 = vadd.f32 %v6770_v15, %v1202_v61  ;;  %v8177_v8 = vpop.f32.mrf.mxu1 }
 0x16d   : > { %v6739_v33 = vpop.f32.mrf.mxu0  ;;  %6942 = vmatmul.mubr.msk.bf16.gmra.mxu0 %vm280_vm1, %v2731_v11 }
 0x16e   : > { %v1205_v53 = vadd.f32 %v6739_v33, %v8041_v42  ;;  %v6773_v14 = vpop.f32.mrf.mxu1  ;;  %6945 = vmatprep.mubr.msk.bf16.mxu0 %vm280_vm1, %v2732_v5  ;;  %v2716_v5 = vld [vmem:[#allocation2 + $0x16a] sm:$0xff] }
 0x16f   : > { %v1124_v19 = vpop.f32.mrf.mxu0 }
 0x170   : > { %v1203_v41 = vadd.f32 %v1124_v19, %v8045_v59  ;;  %v8183_v50 = vadd.f32 %v6773_v14, %v1205_v53  ;;  %v1418_v23 = vpop.f32.mrf.mxu1 }
 0x171   : > { %v6740_v49 = vpop.f32.mrf.mxu0 }
 0x172   : > { %v1206_v1 = vadd.f32 %v6740_v49, %v8047_v60  ;;  %v8186_v18 = vadd.f32 %v1418_v23, %v1203_v41  ;;  %v6774_v42 = vpop.f32.mrf.mxu1  ;;  %v2717_v60 = vld [vmem:[#allocation2 + $0x172] sm:$0xff] }
 0x173   : > { %v8188_v28 = vpop.f32.mrf.mxu0  ;;  %v2735_v57 = vpack.c.bf16 %v2717_v60, %v2716_v5 }
 0x174   : > { %v8190_v54 = vadd.f32 %v6774_v42, %v1206_v1  ;;  %v8192_v11 = vpop.f32.mrf.mxu1  ;;  %v2720_v1 = vld [vmem:[#allocation2 + $0x19a] sm:$0xff] }
 0x175   : > { %v6743_v61 = vpop.f32.mrf.mxu0  ;;  %6946 = vmatmul.mubr.msk.bf16.gmra.mxu0 %vm280_vm1, %v2733_v51 }
 0x176   : > { %v1209_v59 = vadd.f32 %v6743_v61, %v8059_v0  ;;  %v6777_v15 = vpop.f32.mrf.mxu1  ;;  %6949 = vmatprep.mubr.msk.bf16.mxu0 %vm280_vm1, %v2734_v22 }
 0x177   : > { %v1140_v29 = vpop.f32.mrf.mxu0 }
 0x178   : > { %v1207_v33 = vadd.f32 %v1140_v29, %v8063_v17  ;;  %v8198_v53 = vadd.f32 %v6777_v15, %v1209_v59  ;;  %v1434_v14 = vpop.f32.mrf.mxu1 }
 0x179   : > { %v6744_v37 = vpop.f32.mrf.mxu0 }
 0x17a   : > { %v1210_v19 = vadd.f32 %v6744_v37, %v8065_v36  ;;  %v8201_v43 = vadd.f32 %v1434_v14, %v1207_v33  ;;  %v6778_v48 = vpop.f32.mrf.mxu1  ;;  %v2721_v36 = vld [vmem:[#allocation2 + $0x1a2] sm:$0xff] }
 0x17b   : > { %v8203_v41 = vpop.f32.mrf.mxu0  ;;  %v2737_v5 = vpack.c.bf16 %v2721_v36, %v2720_v1 }
 0x17c   : > { %v8205_v0 = vadd.f32 %v6778_v48, %v1210_v19  ;;  %v8207_v23 = vpop.f32.mrf.mxu1 }
 0x17d   : > { %v6747_v49 = vpop.f32.mrf.mxu0  ;;  %6950 = vmatmul.mubr.msk.bf16.gmra.mxu0 %vm280_vm1, %v2735_v57 }
 0x17e   : > { %v1213_v17 = vadd.f32 %v6747_v49, %v8077_v47  ;;  %v6781_v51 = vpop.f32.mrf.mxu1  ;;  %6953 = vmatprep.mubr.msk.bf16.mxu0 %vm280_vm1, %v7960_v21 }
 0x17f   : > { %v1156_v42 = vpop.f32.mrf.mxu0 }
 0x180   : > { %v1211_v22 = vadd.f32 %v1156_v42, %v8081_v44  ;;  %v8214_v61 = vadd.f32 %v6781_v51, %v1213_v17  ;;  %v1450_v59 = vpop.f32.mrf.mxu1 }
 0x181   : > { %v6748_v15 = vpop.f32.mrf.mxu0 }
 0x182   : > { %v1214_v60 = vadd.f32 %v6748_v15, %v8083_v46  ;;  %v8217_v29 = vadd.f32 %v1450_v59, %v1211_v22  ;;  %v6782_v33 = vpop.f32.mrf.mxu1 }
 0x183   : > { %v8219_v47 = vpop.f32.mrf.mxu0 }
 0x184   : > { %v8221_v14 = vadd.f32 %v6782_v33, %v1214_v60  ;;  %v8223_v21 = vpop.f32.mrf.mxu1 }
 0x185   : > { %v6751_v37 = vpop.f32.mrf.mxu0  ;;  %6954 = vmatmul.mubr.msk.bf16.gmra.mxu0 %vm280_vm1, %v2737_v5 }
 0x186   : > { %v1217_v44 = vadd.f32 %v6751_v37, %v8093_v20  ;;  %v6785_v57 = vpop.f32.mrf.mxu1 }
 0x187   : > { %v1172_v19 = vpop.f32.mrf.mxu0 }
 0x188   : > { %v1215_v48 = vadd.f32 %v1172_v19, %v8095_v55  ;;  %v8228_v49 = vadd.f32 %v6785_v57, %v1217_v44  ;;  %v1466_v46 = vpop.f32.mrf.mxu1 }
 0x189   : > { %v6752_v17 = vpop.f32.mrf.mxu0 }
 0x18a   : > { %v1218_v51 = vadd.f32 %v6752_v17, %v8097_v4  ;;  %v8231_v1 = vadd.f32 %v1466_v46, %v1215_v48  ;;  %v6786_v36 = vpop.f32.mrf.mxu1 }
 0x18b   : > { %v8233_v42 = vpop.f32.mrf.mxu0 }
 0x18c   : > { %v8235_v22 = vadd.f32 %v6786_v36, %v1218_v51  ;;  %v8237_v59 = vpop.f32.mrf.mxu1 }
 0x18d   : > { %v6791_v20 = vpop.f32.mrf.mxu0 }
 0x18e   : > { %v8240_v15 = vadd.f32 %v6791_v20, %v8109_v27  ;;  %v8242_v55 = vpop.f32.mrf.mxu1 }
 0x18f   : > { %v1648_v5 = vpop.f32.mrf.mxu0 }
 0x190   : > { %v8245_v60 = vadd.f32 %v1648_v5, %v8112_v31  ;;  %v8247_v4 = vpop.f32.mrf.mxu1 }
 0x191   : > { %v6792_v33 = vpop.f32.mrf.mxu0 }
 0x192   : > { %v8250_v37 = vadd.f32 %v6792_v33, %v8117_v32  ;;  %v8252_v44 = vpop.f32.mrf.mxu1 }
 0x193   : > { %v8254_v57 = vpop.f32.mrf.mxu0 }
 0x194   : > { %v8256_v19 = vpop.f32.mrf.mxu1 }
 0x195   : > { %v6795_v27 = vpop.f32.mrf.mxu0 }
 0x196   : > { %v8259_v48 = vadd.f32 %v6795_v27, %v8127_v56  ;;  %v8261_v46 = vpop.f32.mrf.mxu1 }
 0x197   : > { %9976 = vst [vmem:[#allocation4_spill] sm:$0xff] %v8261_v46  ;;  %v1664_v31 = vpop.f32.mrf.mxu0 }
 0x198   : > { %v8264_v17 = vadd.f32 %v1664_v31, %v8130_v62  ;;  %v8266_v51 = vpop.f32.mrf.mxu1 }
 0x199   : > { %9978 = vst [vmem:[#allocation6_spill] sm:$0xff] %v8266_v51  ;;  %v6796_v32 = vpop.f32.mrf.mxu0 }
 0x19a   : > { %9977 = vst [vmem:[#allocation5_spill] sm:$0xff] %v8264_v17  ;;  %v8269_v36 = vadd.f32 %v6796_v32, %v8135_v58  ;;  %v8271_v20 = vpop.f32.mrf.mxu1 }
 0x19b   : > { %9980 = vst [vmem:[#allocation8_spill] sm:$0xff] %v8271_v20  ;;  %v8273_v5 = vpop.f32.mrf.mxu0 }
 0x19c   : > { %9979 = vst [vmem:[#allocation7_spill] sm:$0xff] %v8269_v36  ;;  %v8275_v33 = vpop.f32.mrf.mxu1 }
 0x19d   : > { %9981 = vst [vmem:[#allocation9_spill] sm:$0xff] %v8275_v33  ;;  %v6799_v56 = vpop.f32.mrf.mxu0  ;;  %v3229_v33 = vld [vmem:[%s9970_s4] sm:$0xf] }
 0x19e   : > { %v8278_v27 = vadd.f32 %v6799_v56, %v8145_v26  ;;  %v8280_v46 = vpop.f32.mrf.mxu1  ;;  %7273 = vmatprep.subr.msk.bf16.mxu0 %vm548_vm0, %v3229_v33  ;;  %v3541_v56 = vsel %vm548_vm0, %v3229_v33, 0 }
 0x19f   : > { %9983 = vst [vmem:[#allocation11_spill] sm:$0xff] %v8280_v46  ;;  %v1680_v62 = vpop.f32.mrf.mxu0  ;;  %6992 = vmatpush3.bf16.msra.mxu0 %v3541_v56 }
 0x1a0   : > { %9982 = vst [vmem:[#allocation10_spill] sm:$0xff] %v8278_v27  ;;  %v8283_v31 = vadd.f32 %v1680_v62, %v8148_v34  ;;  %v8285_v51 = vpop.f32.mrf.mxu1  ;;  %v3230_v34 = vld [vmem:[#allocation3 + $0x1] sm:$0xff]  ;;  %v3231_v62 = vld [vmem:[#allocation3 + $0x9] sm:$0xff] }
 0x1a1   : > { %9985 = vst [vmem:[#allocation13_spill] sm:$0xff] %v8285_v51  ;;  %v6800_v58 = vpop.f32.mrf.mxu0 }
 0x1a2   : > { %9984 = vst [vmem:[#allocation12_spill] sm:$0xff] %v8283_v31  ;;  %v8288_v32 = vadd.f32 %v6800_v58, %v8153_v10  ;;  %v8290_v20 = vpop.f32.mrf.mxu1  ;;  %v3181_v31 = vld [vmem:[#allocation3] sm:$0xff]  ;;  %v3262_v10 = vpack.c.bf16 %v3231_v62, %v3230_v34  ;;  %v3182_v58 = vld [vmem:[#allocation3 + $0x8] sm:$0xff] }
 0x1a3   : > { %9987 = vst [vmem:[#allocation15_spill] sm:$0xff] %v8290_v20  ;;  %v8295_v26 = vpop.f32.mrf.mxu0  ;;  %v3213_v20 = vpack.c.bf16 %v3182_v58, %v3181_v31 }
 0x1a4   : > { %9986 = vst [vmem:[#allocation14_spill] sm:$0xff] %v8288_v32  ;;  %v8299_v51 = vpop.f32.mrf.mxu1  ;;  %6959 = vmatprep.mubr.msk.bf16.mxu1 %vm280_vm1, %v3262_v10 }
 0x1a5   : > { %v6803_v32 = vpop.f32.mrf.mxu0  ;;  %6993 = vmatprep.mubr.msk.bf16.mxu0 %vm280_vm1, %v3213_v20 }
 0x1a6   : > { %v8302_v46 = vadd.f32 %v6803_v32, %v8167_v3  ;;  %v8304_v27 = vpop.f32.mrf.mxu1 }
 0x1a7   : > { %v1696_v36 = vpop.f32.mrf.mxu0 }
 0x1a8   : > { %v8309_v33 = vadd.f32 %v1696_v36, %v8170_v16  ;;  %v8311_v17 = vpop.f32.mrf.mxu1  ;;  %v8330_v16 = vld [vmem:[%s9970_s4 + $0x8] sm:$0xf] }
 0x1a9   : > { %v6804_v56 = vpop.f32.mrf.mxu0  ;;  %9993 = vst [vmem:[#allocation21_spill] sm:$0xff] %v8330_v16  ;;  %7274 = vmatprep.subr.msk.bf16.mxu1 %vm548_vm0, %v8330_v16 }
 0x1aa   : > { %v8314_v34 = vadd.f32 %v6804_v56, %v8175_v25  ;;  %v8316_v31 = vpop.f32.mrf.mxu1 }
 0x1ab   : > { %9989 = vst [vmem:[#allocation17_spill] sm:$0xff] %v8316_v31  ;;  %v8318_v3 = vpop.f32.mrf.mxu0 }
 0x1ac   : > { %9988 = vst [vmem:[#allocation16_spill] sm:$0xff] %v8314_v34  ;;  %v8320_v32 = vpop.f32.mrf.mxu1 }
 0x1ad   : > { %9990 = vst [vmem:[#allocation18_spill] sm:$0xff] %v8320_v32  ;;  %v6807_v62 = vpop.f32.mrf.mxu0 }
 0x1ae   : > { %v8323_v10 = vadd.f32 %v6807_v62, %v8183_v50  ;;  %v8325_v20 = vpop.f32.mrf.mxu1 }
 0x1af   : > { %9992 = vst [vmem:[#allocation20_spill] sm:$0xff] %v8325_v20  ;;  %v1712_v36 = vpop.f32.mrf.mxu0 }
 0x1b0   : > { %9991 = vst [vmem:[#allocation19_spill] sm:$0xff] %v8323_v10  ;;  %v8335_v25 = vadd.f32 %v1712_v36, %v8186_v18  ;;  %v8337_v58 = vpop.f32.mrf.mxu1 }
 0x1b1   : > { %9995 = vst [vmem:[#allocation23_spill] sm:$0xff] %v8337_v58  ;;  %v6808_v56 = vpop.f32.mrf.mxu0 }
 0x1b2   : > { %9994 = vst [vmem:[#allocation22_spill] sm:$0xff] %v8335_v25  ;;  %v8340_v50 = vadd.f32 %v6808_v56, %v8190_v54  ;;  %v8342_v62 = vpop.f32.mrf.mxu1 }
 0x1b3   : > { %9997 = vst [vmem:[#allocation25_spill] sm:$0xff] %v8342_v62  ;;  %v8344_v20 = vpop.f32.mrf.mxu0 }
 0x1b4   : > { %9996 = vst [vmem:[#allocation24_spill] sm:$0xff] %v8340_v50  ;;  %9998 = vst [vmem:[#allocation26_spill] sm:$0xff] %v8344_v20  ;;  %v8346_v10 = vpop.f32.mrf.mxu1 }
 0x1b5   : > { %9999 = vst [vmem:[#allocation27_spill] sm:$0xff] %v8346_v10  ;;  %v6811_v32 = vpop.f32.mrf.mxu0 }
 0x1b6   : > { %v8349_v31 = vadd.f32 %v6811_v32, %v8198_v53  ;;  %v8351_v16 = vpop.f32.mrf.mxu1 }
 0x1b7   : > { %10001 = vst [vmem:[#allocation29_spill] sm:$0xff] %v8351_v16  ;;  %v1728_v18 = vpop.f32.mrf.mxu0 }
 0x1b8   : > { %10000 = vst [vmem:[#allocation28_spill] sm:$0xff] %v8349_v31  ;;  %v8354_v36 = vadd.f32 %v1728_v18, %v8201_v43  ;;  %v8356_v58 = vpop.f32.mrf.mxu1 }
 0x1b9   : > { %10003 = vst [vmem:[#allocation31_spill] sm:$0xff] %v8356_v58  ;;  %v6812_v54 = vpop.f32.mrf.mxu0 }
 0x1ba   : > { %10002 = vst [vmem:[#allocation30_spill] sm:$0xff] %v8354_v36  ;;  %v8359_v56 = vadd.f32 %v6812_v54, %v8205_v0  ;;  %v8361_v62 = vpop.f32.mrf.mxu1 }
 0x1bb   : > { %10005 = vst [vmem:[#allocation33_spill] sm:$0xff] %v8361_v62  ;;  %v8363_v50 = vpop.f32.mrf.mxu0 }
 0x1bc   : > { %10004 = vst [vmem:[#allocation32_spill] sm:$0xff] %v8359_v56  ;;  %10006 = vst [vmem:[#allocation34_spill] sm:$0xff] %v8363_v50  ;;  %v8365_v10 = vpop.f32.mrf.mxu1 }
 0x1bd   : > { %10007 = vst [vmem:[#allocation35_spill] sm:$0xff] %v8365_v10  ;;  %v6815_v53 = vpop.f32.mrf.mxu0 }
 0x1be   : > { %v8368_v32 = vadd.f32 %v6815_v53, %v8214_v61  ;;  %v8370_v16 = vpop.f32.mrf.mxu1 }
 0x1bf   : > { %10009 = vst [vmem:[#allocation37_spill] sm:$0xff] %v8370_v16  ;;  %v1744_v43 = vpop.f32.mrf.mxu0 }
 0x1c0   : > { %10008 = vst [vmem:[#allocation36_spill] sm:$0xff] %v8368_v32  ;;  %v8373_v18 = vadd.f32 %v1744_v43, %v8217_v29  ;;  %v8375_v58 = vpop.f32.mrf.mxu1  ;;  %v8436_v32 = vld [vmem:[%s9970_s4 + $0xc] sm:$0xf] }
 0x1c1   : > { %10011 = vst [vmem:[#allocation39_spill] sm:$0xff] %v8375_v58  ;;  %v6816_v0 = vpop.f32.mrf.mxu0  ;;  %10028 = vst [vmem:[#allocation56_spill] sm:$0xff] %v8436_v32  ;;  %7275 = vmatprep.subr.msk.bf16.mxu0 %vm548_vm0, %v8436_v32 }
 0x1c2   : > { %10010 = vst [vmem:[#allocation38_spill] sm:$0xff] %v8373_v18  ;;  %v8378_v54 = vadd.f32 %v6816_v0, %v8221_v14  ;;  %v8380_v62 = vpop.f32.mrf.mxu1 }
 0x1c3   : > { %10013 = vst [vmem:[#allocation41_spill] sm:$0xff] %v8380_v62  ;;  %v8382_v56 = vpop.f32.mrf.mxu0 }
 0x1c4   : > { %10012 = vst [vmem:[#allocation40_spill] sm:$0xff] %v8378_v54  ;;  %10014 = vst [vmem:[#allocation42_spill] sm:$0xff] %v8382_v56  ;;  %v8384_v10 = vpop.f32.mrf.mxu1 }
 0x1c5   : > { %10015 = vst [vmem:[#allocation43_spill] sm:$0xff] %v8384_v10  ;;  %v6819_v61 = vpop.f32.mrf.mxu0 }
 0x1c6   : > { %v8387_v53 = vadd.f32 %v6819_v61, %v8228_v49  ;;  %v8389_v16 = vpop.f32.mrf.mxu1 }
 0x1c7   : > { %10017 = vst [vmem:[#allocation45_spill] sm:$0xff] %v8389_v16  ;;  %v1760_v29 = vpop.f32.mrf.mxu0 }
 0x1c8   : > { %10016 = vst [vmem:[#allocation44_spill] sm:$0xff] %v8387_v53  ;;  %v8392_v43 = vadd.f32 %v1760_v29, %v8231_v1  ;;  %v8394_v58 = vpop.f32.mrf.mxu1 }
 0x1c9   : > { %10019 = vst [vmem:[#allocation47_spill] sm:$0xff] %v8394_v58  ;;  %v6820_v14 = vpop.f32.mrf.mxu0 }
 0x1ca   : > { %10018 = vst [vmem:[#allocation46_spill] sm:$0xff] %v8392_v43  ;;  %v8397_v0 = vadd.f32 %v6820_v14, %v8235_v22  ;;  %v8399_v62 = vpop.f32.mrf.mxu1 }
 0x1cb   : > { %10021 = vst [vmem:[#allocation49_spill] sm:$0xff] %v8399_v62  ;;  %v8401_v54 = vpop.f32.mrf.mxu0 }
 0x1cc   : > { %10020 = vst [vmem:[#allocation48_spill] sm:$0xff] %v8397_v0  ;;  %10022 = vst [vmem:[#allocation50_spill] sm:$0xff] %v8401_v54  ;;  %v8403_v10 = vpop.f32.mrf.mxu1 }
 0x1cd   : > { %10023 = vst [vmem:[#allocation51_spill] sm:$0xff] %v8403_v10  ;;  %v6859_v49 = vpop.f32.mrf.mxu0 }
 0x1ce   : > { %v8405_v61 = vpop.f32.mrf.mxu1 }
 0x1cf   : > { %v2237_v16 = vpop.f32.mrf.mxu0 }
 0x1d0   : > { %v8407_v53 = vpop.f32.mrf.mxu1 }
 0x1d1   : > { %v8409_v1 = vpop.f32.mrf.mxu0 }
 0x1d2   : > { %v8411_v29 = vpop.f32.mrf.mxu1 }
 0x1d3   : > { %v8413_v58 = vpop.f32.mrf.mxu0 }
 0x1d4   : > { %v8417_v14 = vpop.f32.mrf.mxu1 }
 0x1d5   : > { %v8415_v22 = vpop.f32.mrf.mxu0 }
 0x1d6   : > { %v8423_v10 = vpop.f32.mrf.mxu1 }
 0x1d7   : > { %v8419_v62 = vpop.f32.mrf.mxu0 }
 0x1d8   : > { %v8429_v18 = vpop.f32.mrf.mxu1 }
 0x1d9   : > { %v8421_v0 = vpop.f32.mrf.mxu0  ;;  %10026 = vst [vmem:[#allocation54_spill] sm:$0xff] %v8429_v18 }
 0x1da   : > { %v8442_v50 = vpop.f32.mrf.mxu1 }
 0x1db   : > { %v8425_v54 = vpop.f32.mrf.mxu0  ;;  %10030 = vst [vmem:[#allocation58_spill] sm:$0xff] %v8442_v50 }
 0x1dc   : > { %10024 = vst [vmem:[#allocation52_spill] sm:$0xff] %v8425_v54 }
 0x1dd   : > { %v8427_v43 = vpop.f32.mrf.mxu0 }
 0x1de   : > { %10025 = vst [vmem:[#allocation53_spill] sm:$0xff] %v8427_v43  ;;  %v8448_v43 = vpop.f32.mrf.mxu1 }
 0x1df   : > { %v8431_v56 = vpop.f32.mrf.mxu0  ;;  %10033 = vst [vmem:[#allocation61_spill] sm:$0xff] %v8448_v43 }
 0x1e0   : > { %10027 = vst [vmem:[#allocation55_spill] sm:$0xff] %v8431_v56  ;;  %v8454_v54 = vpop.f32.mrf.mxu1 }
 0x1e1   : > { %v8438_v36 = vpop.f32.mrf.mxu0  ;;  %10036 = vst [vmem:[#allocation64_spill] sm:$0xff] %v8454_v54 }
 0x1e2   : > { %10029 = vst [vmem:[#allocation57_spill] sm:$0xff] %v8438_v36  ;;  %v8460_v34 = vpop.f32.mrf.mxu1 }
 0x1e3   : > { %v8444_v31 = vpop.f32.mrf.mxu0  ;;  %10039 = vst [vmem:[#allocation67_spill] sm:$0xff] %v8460_v34 }
 0x1e4   : > { %10031 = vst [vmem:[#allocation59_spill] sm:$0xff] %v8444_v31  ;;  %v8466_v31 = vpop.f32.mrf.mxu1 }
 0x1e5   : > { %v8446_v25 = vpop.f32.mrf.mxu0  ;;  %10042 = vst [vmem:[#allocation70_spill] sm:$0xff] %v8466_v31 }
 0x1e6   : > { %10032 = vst [vmem:[#allocation60_spill] sm:$0xff] %v8446_v25 }
 0x1e7   : > { %v8450_v20 = vpop.f32.mrf.mxu0 }
 0x1e8   : > { %10034 = vst [vmem:[#allocation62_spill] sm:$0xff] %v8450_v20  ;;  %v8472_v20 = vpop.f32.mrf.mxu1 }
 0x1e9   : > { %v8452_v56 = vpop.f32.mrf.mxu0 }
 0x1ea   : > { %10035 = vst [vmem:[#allocation63_spill] sm:$0xff] %v8452_v56 }
 0x1eb   : > { %v8456_v18 = vpop.f32.mrf.mxu0 }
 0x1ec   : > { %10037 = vst [vmem:[#allocation65_spill] sm:$0xff] %v8456_v18  ;;  %v8478_v18 = vpop.f32.mrf.mxu1 }
 0x1ed   : > { %v8458_v36 = vpop.f32.mrf.mxu0 }
 0x1ee   : > { %10038 = vst [vmem:[#allocation66_spill] sm:$0xff] %v8458_v36 }
 0x1ef   : > { %v8462_v32 = vpop.f32.mrf.mxu0 }
 0x1f0   : > { %10040 = vst [vmem:[#allocation68_spill] sm:$0xff] %v8462_v32  ;;  %v8484_v32 = vpop.f32.mrf.mxu1 }
 0x1f1   : > { %v8464_v50 = vpop.f32.mrf.mxu0  ;;  %10049 = vst [vmem:[#allocation77_spill] sm:$0xff] %v8484_v32 }
 0x1f2   : > { %10041 = vst [vmem:[#allocation69_spill] sm:$0xff] %v8464_v50 }
 0x1f3   : > { %v8468_v25 = vpop.f32.mrf.mxu0 }
 0x1f4   : > { %10043 = vst [vmem:[#allocation71_spill] sm:$0xff] %v8468_v25  ;;  %v8490_v25 = vpop.f32.mrf.mxu1 }
 0x1f5   : > { %v8470_v43 = vpop.f32.mrf.mxu0 }
 0x1f6   : > { %10044 = vst [vmem:[#allocation72_spill] sm:$0xff] %v8470_v43  ;;  %v8504_v32 = vpop.f32.mrf.mxu1 }
 0x1f7   : > { %v8474_v56 = vpop.f32.mrf.mxu0 }
 0x1f8   : > { %10045 = vst [vmem:[#allocation73_spill] sm:$0xff] %v8474_v56  ;;  %v866_v56 = vadd.f32 %v8051_v13, %v8049_v63 }
 0x1f9   : > { %v8476_v54 = vpop.f32.mrf.mxu0 }
 0x1fa   : > { %10046 = vst [vmem:[#allocation74_spill] sm:$0xff] %v8476_v54  ;;  %v1204_v63 = vadd.f32 %v8188_v28, %v866_v56 }
 0x1fb   : > { %v8480_v36 = vpop.f32.mrf.mxu0 }
 0x1fc   : > { %10047 = vst [vmem:[#allocation75_spill] sm:$0xff] %v8480_v36  ;;  %v882_v36 = vadd.f32 %v8069_v35, %v8067_v12  ;;  %v2069_v35 = vadd.f32 %v8247_v4, %v8245_v60  ;;  %v1494_v60 = vadd.f32 %v8177_v8, %v8173_v30  ;;  %v10053_v30 = vld [vmem:[#allocation4_spill] sm:$0xff] }
 0x1fd   : > { %v8482_v34 = vpop.f32.mrf.mxu0  ;;  %v2075_v8 = vadd.f32 %v10053_v30, %v8259_v48  ;;  %v10057_v48 = vld [vmem:[#allocation8_spill] sm:$0xff] }
 0x1fe   : > { %10048 = vst [vmem:[#allocation76_spill] sm:$0xff] %v8482_v34  ;;  %v1482_v34 = vadd.f32 %v8119_v40, %v8115_v52  ;;  %v1208_v12 = vadd.f32 %v8203_v41, %v882_v36  ;;  %v2364_v28 = vadd.f32 %v2237_v16, %v2069_v35  ;;  %v8525_v41 = vpop.f32.mrf.mxu1 }
 0x1ff   : > { %v8486_v50 = vpop.f32.mrf.mxu0 }
 0x200   : > { %10050 = vst [vmem:[#allocation78_spill] sm:$0xff] %v8486_v50  ;;  %v2071_v50 = vadd.f32 %v8242_v55, %v8240_v15  ;;  %v1776_v52 = vadd.f32 %v8254_v57, %v1482_v34  ;;  %v1486_v15 = vadd.f32 %v8137_v38, %v8133_v2  ;;  %v1490_v55 = vadd.f32 %v8155_v24, %v8151_v45 }
 0x201   : > { %v8488_v31 = vpop.f32.mrf.mxu0  ;;  %v1498_v2 = vadd.f32 %v8192_v11, %v1204_v63  ;;  %v8570_v63 = vld [vmem:[%s9969_s3] ss:$0 sm:$0xff] }
 0x202   : > { %10051 = vst [vmem:[#allocation79_spill] sm:$0xff] %v8488_v31  ;;  %v898_v31 = vadd.f32 %v8087_v39, %v8085_v6  ;;  %v2366_v40 = vadd.f32 %v6859_v49, %v2071_v50  ;;  %v1780_v38 = vadd.f32 %v8273_v5, %v1486_v15  ;;  %v2070_v4 = vadd.f32 %v8256_v19, %v1776_v52  ;;  %v10054_v19 = vld [vmem:[#allocation5_spill] sm:$0xff]  ;;  %v10055_v5 = vld [vmem:[#allocation6_spill] sm:$0xff]  ;;  %v10056_v50 = vld [vmem:[#allocation7_spill] sm:$0xff] }
 0x203   : > { %v8492_v43 = vpop.f32.mrf.mxu0  ;;  %v1784_v11 = vadd.f32 %v8295_v26, %v1490_v55  ;;  %v2073_v34 = vadd.f32 %v10055_v5, %v10054_v19  ;;  %v2076_v36 = vadd.f32 %v10057_v48, %v10056_v50  ;;  %v10058_v26 = vld [vmem:[#allocation9_spill] sm:$0xff]  ;;  %v10060_v49 = vld [vmem:[#allocation11_spill] sm:$0xff]  ;;  %v10065_v5 = vld [vmem:[#allocation16_spill] sm:$0xff] }
 0x204   : > { %10052 = vst [vmem:[#allocation80_spill] sm:$0xff] %v8492_v43  ;;  %v914_v43 = vadd.f32 %v8101_v7, %v8099_v9  ;;  %v1212_v6 = vadd.f32 %v8219_v47, %v898_v31  ;;  %v2072_v7 = vadd.f32 %v8252_v44, %v8250_v37  ;;  %v2660_v37 = vadd.f32 %v8405_v61, %v2366_v40 }
 0x205   : > { %v8496_v54 = vpop.f32.mrf.mxu0  ;;  %v2365_v31 = vadd.f32 %v8413_v58, %v2070_v4  ;;  %v2074_v56 = vadd.f32 %v10058_v26, %v1780_v38  ;;  %v10061_v58 = vld [vmem:[#allocation12_spill] sm:$0xff]  ;;  %v2368_v55 = vadd.f32 %v8419_v62, %v2073_v34  ;;  %v2371_v62 = vadd.f32 %v8421_v0, %v2076_v36  ;;  %v10066_v34 = vld [vmem:[#allocation17_spill] sm:$0xff] }
 0x206   : > { %v1216_v39 = vadd.f32 %v8233_v42, %v914_v43  ;;  %v8536_v42 = vadd.f32 %v8207_v23, %v1208_v12  ;;  %v2367_v44 = vadd.f32 %v8409_v1, %v2072_v7  ;;  %v8542_v45 = vadd.f32 %v8223_v21, %v1212_v6  ;;  %v8553_v23 = vld [vmem:[%s9968_s2] ss:$0 sm:$0xff]  ;;  %v10059_v43 = vld [vmem:[#allocation10_spill] sm:$0xff]  ;;  %v10062_v12 = vld [vmem:[#allocation13_spill] sm:$0xff] }
 0x207   : > { %v8511_v13 = vpop.f32.mrf.mxu0  ;;  %v2658_v21 = vadd.f32 %v8407_v53, %v2364_v28  ;;  %v2079_v61 = vadd.f32 %v10060_v49, %v10059_v43  ;;  %v2370_v1 = vadd.f32 %v8415_v22, %v2075_v8  ;;  %v2077_v35 = vadd.f32 %v10062_v12, %v10061_v58  ;;  %v10063_v6 = vld [vmem:[#allocation14_spill] sm:$0xff]  ;;  %v10072_v58 = vld [vmem:[#allocation53_spill] sm:$0xff] }
 0x208   : > { %v8545_v24 = vadd.f32 %v8237_v59, %v1216_v39  ;;  %v8559_v59 = vpop.f32.mrf.mxu1  ;;  %v2661_v52 = vadd.f32 %v8411_v29, %v2367_v44  ;;  %v10064_v39 = vld [vmem:[#allocation15_spill] sm:$0xff]  ;;  %v8579_v28 = vadd.f32 %v8299_v51, %v1784_v11  ;;  %v1788_v22 = vadd.f32 %v8318_v3, %v1494_v60  ;;  %v10070_v43 = vld [vmem:[#allocation26_spill] sm:$0xff] }
 0x209   : > { %v8521_v9 = vpop.f32.mrf.mxu0  ;;  %v2080_v7 = vadd.f32 %v10064_v39, %v10063_v6  ;;  %v2659_v4 = vadd.f32 %v8417_v14, %v2365_v31  ;;  %v8590_v8 = vadd.f32 %v8304_v27, %v8302_v46  ;;  %v8594_v51 = vadd.f32 %v8311_v17, %v8309_v33  ;;  %v10067_v46 = vld [vmem:[#allocation18_spill] sm:$0xff]  ;;  %v10069_v31 = vld [vmem:[#allocation52_spill] sm:$0xff] }
 0x20a   : > { %v2664_v3 = vadd.f32 %v8423_v10, %v2370_v1  ;;  %v8605_v27 = vadd.f32 %v10067_v46, %v1788_v22  ;;  %v10068_v17 = vld [vmem:[#allocation54_spill] sm:$0xff]  ;;  %v2369_v10 = vadd.f32 %v10069_v31, %v2074_v56  ;;  %v1792_v49 = vadd.f32 %v10070_v43, %v1498_v2  ;;  %v10081_v46 = vld [vmem:[#allocation25_spill] sm:$0xff] }
 0x20b   : > { %v8533_v47 = vpop.f32.mrf.mxu0  ;;  %v2662_v33 = vadd.f32 %v10068_v17, %v2368_v55  ;;  %v10071_v1 = vld [vmem:[#allocation58_spill] sm:$0xff]  ;;  %v2374_v12 = vadd.f32 %v10072_v58, %v2079_v61  ;;  %v10074_v55 = vld [vmem:[#allocation19_spill] sm:$0xff]  ;;  %v10086_v58 = vld [vmem:[#allocation29_spill] sm:$0xff] }
 0x20d   : > { %v6927_v57 = vpop.f32.mrf.mxu0 }
 0x20e   : > { %v2954_v16 = vadd.f32 %v6927_v57, %v2660_v37  ;;  %v8584_v37 = vpop.f32.mrf.mxu1 }
 0x20f   : > { %v2825_v53 = vpop.f32.mrf.mxu0 }
 0x210   : > { %v2993_v40 = vmul.f32 %v8553_v23, %v2954_v16  ;;  %v2952_v15 = vadd.f32 %v2825_v53, %v2658_v21  ;;  %v8602_v21 = vadd.f32 %v10066_v34, %v10065_v5  ;;  %v8609_v0 = vpop.f32.mrf.mxu1  ;;  %v2665_v53 = vadd.f32 %v10071_v1, %v2371_v62  ;;  %v10080_v34 = vld [vmem:[#allocation24_spill] sm:$0xff] }
 0x211   : > { %v6928_v38 = vpop.f32.mrf.mxu0  ;;  %v8641_v17 = vadd.f32 %v10081_v46, %v10080_v34 }
 0x212   : > { %v3032_v29 = vadd.f32 %v8570_v63, %v2993_v40  ;;  %v2991_v44 = vmul.f32 %v8553_v23, %v2952_v15  ;;  %v2955_v30 = vadd.f32 %v6928_v38, %v2661_v52  ;;  %v10073_v40 = vld [vmem:[#allocation21_spill] sm:$0xff]  ;;  %v10075_v38 = vld [vmem:[#allocation20_spill] sm:$0xff] }
 0x213   : > { %v2828_v14 = vpop.f32.mrf.mxu0  ;;  %v8619_v56 = vsel %vm548_vm0, %v10073_v40, 0  ;;  %v8626_v2 = vadd.f32 %v10075_v38, %v10074_v55 }
 0x214   : > { %v3064_v60 = vmax.f32 %v3032_v29, 0.0  ;;  %v3030_v11 = vadd.f32 %v8570_v63, %v2991_v44  ;;  %v2994_v57 = vmul.f32 %v8553_v23, %v2955_v30  ;;  %v2953_v19 = vadd.f32 %v2828_v14, %v2659_v4  ;;  %v10076_v4 = vld [vmem:[#allocation22_spill] sm:$0xff]  ;;  %v10077_v29 = vld [vmem:[#allocation23_spill] sm:$0xff]  ;;  %v10078_v44 = vld [vmem:[#allocation61_spill] sm:$0xff] }
 0x215   : > { %v6931_v16 = vpop.f32.mrf.mxu0  ;;  %v8630_v61 = vadd.f32 %v10077_v29, %v10076_v4  ;;  %v2663_v30 = vadd.f32 %v10078_v44, %v2369_v10  ;;  %v10083_v10 = vld [vmem:[#allocation64_spill] sm:$0xff]  ;;  %v10090_v44 = vld [vmem:[#allocation30_spill] sm:$0xff] }
 0x216   : > { %3151 = vst.msk [vmem:[#allocation3 + $0x31] sm:$0xff] %vm280_vm1, %v3064_v60  ;;  %v3062_v50 = vmax.f32 %v3030_v11, 0.0  ;;  %v3033_v48 = vadd.f32 %v8570_v63, %v2994_v57  ;;  %v2992_v36 = vmul.f32 %v8553_v23, %v2953_v19  ;;  %v2958_v26 = vadd.f32 %v6931_v16, %v2664_v3  ;;  %v10079_v3 = vld [vmem:[#allocation55_spill] sm:$0xff]  ;;  %v8634_v60 = vpop.f32.mrf.mxu1  ;;  %v10084_v16 = vld [vmem:[#allocation57_spill] sm:$0xff] }
 0x217   : > { %v2841_v52 = vpop.f32.mrf.mxu0  ;;  %v2372_v62 = vadd.f32 %v10079_v3, %v2077_v35  ;;  %v2668_v35 = vadd.f32 %v10083_v10, %v2374_v12  ;;  %v10095_v10 = vld [vmem:[#allocation32_spill] sm:$0xff] }
 0x218   : > { %3149 = vst.msk [vmem:[#allocation3 + $0x19] sm:$0xff] %vm280_vm1, %v3062_v50  ;;  %v3065_v15 = vmax.f32 %v3033_v48, 0.0  ;;  %v3031_v6 = vadd.f32 %v8570_v63, %v2992_v36  ;;  %v2997_v39 = vmul.f32 %v8553_v23, %v2958_v26  ;;  %v2956_v22 = vadd.f32 %v2841_v52, %v2662_v33  ;;  %v10082_v33 = vld [vmem:[#allocation27_spill] sm:$0xff] }
 0x219   : > { %v6932_v14 = vpop.f32.mrf.mxu0  ;;  %v8644_v31 = vadd.f32 %v10082_v33, %v1792_v49  ;;  %v2375_v50 = vadd.f32 %v10084_v16, %v2080_v7  ;;  %v10087_v49 = vld [vmem:[#allocation34_spill] sm:$0xff]  ;;  %v10089_v7 = vld [vmem:[#allocation59_spill] sm:$0xff] }
 0x21a   : > { %3152 = vst.msk [vmem:[#allocation3 + $0x39] sm:$0xff] %vm280_vm1, %v3065_v15  ;;  %v3063_v11 = vmax.f32 %v3031_v6, 0.0  ;;  %v3036_v57 = vadd.f32 %v8570_v63, %v2997_v39  ;;  %v2995_v19 = vmul.f32 %v8553_v23, %v2956_v22  ;;  %v2959_v5 = vadd.f32 %v6932_v14, %v2665_v53  ;;  %v10085_v53 = vld [vmem:[#allocation28_spill] sm:$0xff]  ;;  %v10088_v15 = vld [vmem:[#allocation67_spill] sm:$0xff]  ;;  %v8660_v22 = vpop.f32.mrf.mxu1 }
 0x21b   : > { %v2844_v48 = vpop.f32.mrf.mxu0  ;;  %v8653_v52 = vadd.f32 %v10086_v58, %v10085_v53  ;;  %v1796_v40 = vadd.f32 %v10087_v49, %v8536_v42  ;;  %v2666_v12 = vadd.f32 %v10088_v15, %v2372_v62  ;;  %v2373_v6 = vadd.f32 %v10089_v7, %v8579_v28  ;;  %v10092_v42 = vld [vmem:[#allocation70_spill] sm:$0xff]  ;;  %v10093_v14 = vld [vmem:[#allocation60_spill] sm:$0xff] }
 0x21c   : > { %3150 = vst.msk [vmem:[#allocation3 + $0x21] sm:$0xff] %vm280_vm1, %v3063_v11  ;;  %v3068_v36 = vmax.f32 %v3036_v57, 0.0  ;;  %v3034_v26 = vadd.f32 %v8570_v63, %v2995_v19  ;;  %v2998_v43 = vmul.f32 %v8553_v23, %v2959_v5  ;;  %v2957_v1 = vadd.f32 %v2844_v48, %v2663_v30  ;;  %v10091_v30 = vld [vmem:[#allocation31_spill] sm:$0xff]  ;;  %v10094_v11 = vld [vmem:[#allocation62_spill] sm:$0xff] }
 0x21d   : > { %v6935_v39 = vpop.f32.mrf.mxu0  ;;  %v8667_v3 = vadd.f32 %v10091_v30, %v10090_v44  ;;  %v2669_v62 = vadd.f32 %v10092_v42, %v2375_v50  ;;  %v2378_v28 = vadd.f32 %v10093_v14, %v8590_v8  ;;  %v2376_v57 = vadd.f32 %v10094_v11, %v8594_v51  ;;  %v10097_v50 = vld [vmem:[#allocation35_spill] sm:$0xff] }
 0x21e   : > { %3155 = vst.msk [vmem:[#allocation3 + $0x61] sm:$0xff] %vm280_vm1, %v3068_v36  ;;  %v3066_v55 = vmax.f32 %v3034_v26, 0.0  ;;  %v3037_v38 = vadd.f32 %v8570_v63, %v2998_v43  ;;  %v2996_v4 = vmul.f32 %v8553_v23, %v2957_v1  ;;  %v2962_v29 = vadd.f32 %v6935_v39, %v2668_v35  ;;  %v10096_v35 = vld [vmem:[#allocation33_spill] sm:$0xff]  ;;  %v10098_v51 = vld [vmem:[#allocation63_spill] sm:$0xff]  ;;  %v8687_v43 = vpop.f32.mrf.mxu1 }
 0x21f   : > { %v2857_v19 = vpop.f32.mrf.mxu0  ;;  %v8679_v16 = vadd.f32 %v10096_v35, %v10095_v10  ;;  %v8682_v48 = vadd.f32 %v10097_v50, %v1796_v40  ;;  %v2667_v8 = vadd.f32 %v8472_v20, %v2373_v6  ;;  %v2379_v36 = vadd.f32 %v10098_v51, %v8602_v21  ;;  %v10100_v20 = vld [vmem:[#allocation65_spill] sm:$0xff]  ;;  %v3185_v50 = vld [vmem:[#allocation3 + $0x30] sm:$0xff] }
 0x220   : > { %3153 = vst.msk [vmem:[#allocation3 + $0x49] sm:$0xff] %vm280_vm1, %v3066_v55  ;;  %v3069_v5 = vmax.f32 %v3037_v38, 0.0  ;;  %v3035_v34 = vadd.f32 %v8570_v63, %v2996_v4  ;;  %v3001_v46 = vmul.f32 %v8553_v23, %v2962_v29  ;;  %v2960_v33 = vadd.f32 %v2857_v19, %v2666_v12  ;;  %v10099_v12 = vld [vmem:[#allocation77_spill] sm:$0xff]  ;;  %v10101_v4 = vld [vmem:[#allocation56_spill] sm:$0xff] }
 0x221   : > { %v6936_v26 = vpop.f32.mrf.mxu0  ;;  %v3235_v15 = vld [vmem:[#allocation3 + $0x39] sm:$0xff]  ;;  %v2672_v40 = vadd.f32 %v8478_v18, %v2378_v28  ;;  %v2670_v7 = vadd.f32 %v10099_v12, %v2376_v57  ;;  %v2377_v6 = vadd.f32 %v10100_v20, %v8605_v27  ;;  %v3234_v38 = vld [vmem:[#allocation3 + $0x31] sm:$0xff]  ;;  %v4097_v29 = vsel %vm548_vm0, %v10101_v4, 0 }
 0x222   : > { %3156 = vst.msk [vmem:[#allocation3 + $0x69] sm:$0xff] %vm280_vm1, %v3069_v5  ;;  %v3067_v1 = vmax.f32 %v3035_v34, 0.0  ;;  %v3040_v53 = vadd.f32 %v8570_v63, %v3001_v46  ;;  %v2999_v58 = vmul.f32 %v8553_v23, %v2960_v33  ;;  %v2963_v49 = vadd.f32 %v6936_v26, %v2669_v62  ;;  %v3232_v62 = vld [vmem:[#allocation3 + $0x19] sm:$0xff]  ;;  %v8708_v34 = vpop.f32.mrf.mxu1  ;;  %v10103_v51 = vld [vmem:[#allocation68_spill] sm:$0xff] }
 0x223   : > { %v2860_v21 = vpop.f32.mrf.mxu0  ;;  %v3233_v39 = vld [vmem:[#allocation3 + $0x21] sm:$0xff]  ;;  %v3183_v14 = vld [vmem:[#allocation3 + $0x18] sm:$0xff]  ;;  %v2673_v27 = vadd.f32 %v8490_v25, %v2379_v36  ;;  %v8706_v5 = vpack.c.bf16 %v3235_v15, %v3234_v38  ;;  %v2380_v36 = vadd.f32 %v10103_v51, %v8630_v61 }
 0x224   : > { %v3184_v55 = vld [vmem:[#allocation3 + $0x20] sm:$0xff]  ;;  %3154 = vst.msk [vmem:[#allocation3 + $0x51] sm:$0xff] %vm280_vm1, %v3067_v1  ;;  %v3072_v44 = vmax.f32 %v3040_v53, 0.0  ;;  %v3038_v30 = vadd.f32 %v8570_v63, %v2999_v58  ;;  %v3002_v42 = vmul.f32 %v8553_v23, %v2963_v49  ;;  %v2961_v18 = vadd.f32 %v2860_v21, %v2667_v8  ;;  %v3186_v28 = vld [vmem:[#allocation3 + $0x38] sm:$0xff]  ;;  %v8748_v4 = vpop.f32.mrf.mxu1 }
 0x225   : > { %v6939_v11 = vpop.f32.mrf.mxu0  ;;  %v8702_v57 = vpack.c.bf16 %v3233_v39, %v3232_v62  ;;  %v8704_v19 = vpack.c.bf16 %v3184_v55, %v3183_v14  ;;  %v10102_v25 = vld [vmem:[#allocation66_spill] sm:$0xff]  ;;  %v8721_v1 = vpack.c.bf16 %v3186_v28, %v3185_v50  ;;  %v10105_v12 = vld [vmem:[#allocation37_spill] sm:$0xff]  ;;  %v2671_v55 = vadd.f32 %v8504_v32, %v2377_v6  ;;  %v10108_v62 = vld [vmem:[#allocation71_spill] sm:$0xff] }
 0x226   : > { %3159 = vst.msk [vmem:[#allocation3 + $0x91] sm:$0xff] %vm280_vm1, %v3072_v44  ;;  %v3070_v46 = vmax.f32 %v3038_v30, 0.0  ;;  %v3041_v33 = vadd.f32 %v8570_v63, %v3002_v42  ;;  %v3000_v10 = vmul.f32 %v8553_v23, %v2961_v18  ;;  %v2966_v35 = vadd.f32 %v6939_v11, %v2672_v40  ;;  %v8726_v53 = vld [vmem:[%s9970_s4 + $0x10] sm:$0xf]  ;;  %v10104_v40 = vld [vmem:[#allocation36_spill] sm:$0xff] }
 0x227   : > { %v2382_v8 = vadd.f32 %v10102_v25, %v8626_v2  ;;  %6960 = vmatmul.mubr.msk.bf16.vlgmr.msra.gmra.mxu1 %vm280_vm1, %v8702_v57  ;;  %6994 = vmatmul.mubr.msk.bf16.vlgmr.msra.gmra.mxu0 %vm280_vm1, %v8704_v19  ;;  %v2873_v26 = vpop.f32.mrf.mxu0  ;;  %v8731_v2 = vld [vmem:[%s9970_s4 + $0x14] sm:$0xf]  ;;  %v8741_v20 = vadd.f32 %v10105_v12, %v10104_v40  ;;  %v2381_v14 = vadd.f32 %v10108_v62, %v8644_v31  ;;  %v3236_v50 = vld [vmem:[#allocation3 + $0x49] sm:$0xff] }
 0x228   : > { %3157 = vst.msk [vmem:[#allocation3 + $0x79] sm:$0xff] %vm280_vm1, %v3070_v46  ;;  %v3073_v61 = vmax.f32 %v3041_v33, 0.0  ;;  %v3039_v58 = vadd.f32 %v8570_v63, %v3000_v10  ;;  %v3005_v49 = vmul.f32 %v8553_v23, %v2966_v35  ;;  %7026 = vmatpush3.bf16.msra.mxu1 %v8619_v56  ;;  %v2964_v15 = vadd.f32 %v2873_v26, %v2670_v7  ;;  %v10106_v21 = vld [vmem:[#allocation42_spill] sm:$0xff]  ;;  %v3187_v25 = vld [vmem:[#allocation3 + $0x48] sm:$0xff]  ;;  %v8774_v26 = vpop.f32.mrf.mxu1  ;;  %v10109_v12 = vld [vmem:[#allocation72_spill] sm:$0xff] }
 0x229   : > { %6963 = vmatprep.mubr.msk.bf16.mxu1 %vm280_vm1, %v8706_v5  ;;  %v1800_v39 = vadd.f32 %v10106_v21, %v8542_v45  ;;  %6997 = vmatprep.mubr.msk.bf16.mxu0 %vm280_vm1, %v8721_v1  ;;  %v6940_v38 = vpop.f32.mrf.mxu0  ;;  %v3239_v42 = vld [vmem:[#allocation3 + $0x69] sm:$0xff]  ;;  %v2676_v32 = vadd.f32 %v8525_v41, %v2382_v8  ;;  %v10107_v45 = vld [vmem:[#allocation69_spill] sm:$0xff]  ;;  %v3238_v46 = vld [vmem:[#allocation3 + $0x61] sm:$0xff]  ;;  %v2386_v21 = vadd.f32 %v10109_v12, %v8653_v52 }
 0x22a   : > { %7060 = vmatpush3.bf16.msra.mxu0 %v4097_v29  ;;  %3160 = vst.msk [vmem:[#allocation3 + $0x99] sm:$0xff] %vm280_vm1, %v3073_v61  ;;  %v3071_v56 = vmax.f32 %v3039_v58, 0.0  ;;  %v3044_v7 = vadd.f32 %v8570_v63, %v3005_v49  ;;  %v3003_v44 = vmul.f32 %v8553_v23, %v2964_v15  ;;  %v2967_v30 = vadd.f32 %v6940_v38, %v2673_v27  ;;  %v3190_v18 = vld [vmem:[#allocation3 + $0x68] sm:$0xff]  ;;  %v10111_v52 = vld [vmem:[#allocation38_spill] sm:$0xff] }
 0x22b   : > { %7276 = vmatprep.subr.msk.bf16.mxu1 %vm548_vm0, %v8726_v53  ;;  %7277 = vmatprep.subr.msk.bf16.mxu0 %vm548_vm0, %v8731_v2  ;;  %v2383_v6 = vadd.f32 %v10107_v45, %v8641_v17  ;;  %v2674_v29 = vadd.f32 %v8559_v59, %v2380_v36  ;;  %v2876_v28 = vpop.f32.mrf.mxu0  ;;  %v3237_v27 = vld [vmem:[#allocation3 + $0x51] sm:$0xff]  ;;  %v3189_v17 = vld [vmem:[#allocation3 + $0x60] sm:$0xff]  ;;  %v8770_v31 = vpack.c.bf16 %v3239_v42, %v3238_v46 }
 0x22c   : > { %v3188_v11 = vld [vmem:[#allocation3 + $0x50] sm:$0xff]  ;;  %3158 = vst.msk [vmem:[#allocation3 + $0x81] sm:$0xff] %vm280_vm1, %v3071_v56  ;;  %v3076_v33 = vmax.f32 %v3044_v7, 0.0  ;;  %v3042_v10 = vadd.f32 %v8570_v63, %v3003_v44  ;;  %v3006_v35 = vmul.f32 %v8553_v23, %v2967_v30  ;;  %v2965_v41 = vadd.f32 %v2876_v28, %v2671_v55  ;;  %v10110_v55 = vld [vmem:[#allocation73_spill] sm:$0xff] }
 0x22d   : > { %v6943_v8 = vpop.f32.mrf.mxu0  ;;  %v8766_v59 = vpack.c.bf16 %v3237_v27, %v3236_v50  ;;  %v8768_v51 = vpack.c.bf16 %v3188_v11, %v3187_v25  ;;  %v8772_v36 = vpack.c.bf16 %v3190_v18, %v3189_v17  ;;  %v2677_v40 = vadd.f32 %v8584_v37, %v2383_v6  ;;  %v10113_v18 = vld [vmem:[#allocation40_spill] sm:$0xff]  ;;  %v10115_v6 = vld [vmem:[#allocation43_spill] sm:$0xff] }
 0x22e   : > { %3163 = vst.msk [vmem:[#allocation3 + $0xc1] sm:$0xff] %vm280_vm1, %v3076_v33  ;;  %v3074_v61 = vmax.f32 %v3042_v10, 0.0  ;;  %v3045_v58 = vadd.f32 %v8570_v63, %v3006_v35  ;;  %v3004_v49 = vmul.f32 %v8553_v23, %v2965_v41  ;;  %v2970_v15 = vadd.f32 %v6943_v8, %v2676_v32  ;;  %v10114_v32 = vld [vmem:[#allocation41_spill] sm:$0xff] }
 0x22f   : > { %v2384_v38 = vadd.f32 %v10110_v55, %v8667_v3  ;;  %6964 = vmatmul.mubr.msk.bf16.gmra.mxu1 %vm280_vm1, %v8766_v59  ;;  %6998 = vmatmul.mubr.msk.bf16.gmra.mxu0 %vm280_vm1, %v8768_v51  ;;  %v2889_v56 = vpop.f32.mrf.mxu0  ;;  %v10112_v3 = vld [vmem:[#allocation39_spill] sm:$0xff]  ;;  %v8799_v45 = vadd.f32 %v10114_v32, %v10113_v18  ;;  %v8802_v62 = vadd.f32 %v10115_v6, %v1800_v39  ;;  %v10116_v39 = vld [vmem:[#allocation74_spill] sm:$0xff]  ;;  %v3191_v55 = vld [vmem:[#allocation3 + $0x78] sm:$0xff] }
 0x230   : > { %3161 = vst.msk [vmem:[#allocation3 + $0xa9] sm:$0xff] %vm280_vm1, %v3074_v61  ;;  %v3077_v7 = vmax.f32 %v3045_v58, 0.0  ;;  %v3043_v44 = vadd.f32 %v8570_v63, %v3004_v49  ;;  %v3009_v37 = vmul.f32 %v8553_v23, %v2970_v15  ;;  %v2968_v30 = vadd.f32 %v2889_v56, %v2674_v29  ;;  %6967 = vmatprep.mubr.msk.bf16.mxu1 %vm280_vm1, %v8770_v31  ;;  %v8805_v29 = vpop.f32.mrf.mxu1  ;;  %v3242_v49 = vld [vmem:[#allocation3 + $0x91] sm:$0xff] }
 0x231   : > { %7001 = vmatprep.mubr.msk.bf16.mxu0 %vm280_vm1, %v8772_v36  ;;  %v2093_v42 = vadd.f32 %v10112_v3, %v10111_v52  ;;  %v2675_v28 = vadd.f32 %v8609_v0, %v2381_v14  ;;  %v6944_v27 = vpop.f32.mrf.mxu0  ;;  %v3243_v35 = vld [vmem:[#allocation3 + $0x99] sm:$0xff]  ;;  %v2680_v50 = vadd.f32 %v8634_v60, %v2386_v21  ;;  %v2387_v25 = vadd.f32 %v10116_v39, %v8679_v16  ;;  %v10117_v14 = vld [vmem:[#allocation75_spill] sm:$0xff]  ;;  %v3193_v16 = vld [vmem:[#allocation3 + $0x90] sm:$0xff] }
 0x232   : > { %3164 = vst.msk [vmem:[#allocation3 + $0xc9] sm:$0xff] %vm280_vm1, %v3077_v7  ;;  %v3075_v11 = vmax.f32 %v3043_v44, 0.0  ;;  %v3048_v46 = vadd.f32 %v8570_v63, %v3009_v37  ;;  %v3007_v33 = vmul.f32 %v8553_v23, %v2968_v30  ;;  %v2971_v10 = vadd.f32 %v6944_v27, %v2677_v40  ;;  %v3194_v41 = vld [vmem:[#allocation3 + $0x98] sm:$0xff]  ;;  %v8827_v44 = vpop.f32.mrf.mxu1  ;;  %v10118_v32 = vld [vmem:[#allocation76_spill] sm:$0xff] }
 0x233   : > { %v2678_v0 = vadd.f32 %v8660_v22, %v2384_v38  ;;  %v2385_v17 = vadd.f32 %v10117_v14, %v8682_v48  ;;  %v2892_v8 = vpop.f32.mrf.mxu0  ;;  %v3241_v61 = vld [vmem:[#allocation3 + $0x81] sm:$0xff]  ;;  %v3240_v21 = vld [vmem:[#allocation3 + $0x79] sm:$0xff]  ;;  %v8823_v48 = vpack.c.bf16 %v3243_v35, %v3242_v49  ;;  %v8825_v7 = vpack.c.bf16 %v3194_v41, %v3193_v16 }
 0x234   : > { %v3192_v58 = vld [vmem:[#allocation3 + $0x80] sm:$0xff]  ;;  %3162 = vst.msk [vmem:[#allocation3 + $0xb1] sm:$0xff] %vm280_vm1, %v3075_v11  ;;  %v3080_v15 = vmax.f32 %v3048_v46, 0.0  ;;  %v3046_v40 = vadd.f32 %v8570_v63, %v3007_v33  ;;  %v3010_v12 = vmul.f32 %v8553_v23, %v2971_v10  ;;  %v2969_v60 = vadd.f32 %v2892_v8, %v2675_v28 }
 0x235   : > { %v6947_v56 = vpop.f32.mrf.mxu0  ;;  %v8819_v22 = vpack.c.bf16 %v3241_v61, %v3240_v21  ;;  %v8821_v38 = vpack.c.bf16 %v3192_v58, %v3191_v55  ;;  %v2681_v18 = vadd.f32 %v8687_v43, %v2387_v25  ;;  %v2390_v6 = vadd.f32 %v10118_v32, %v8741_v20  ;;  %v10119_v28 = vld [vmem:[#allocation78_spill] sm:$0xff]  ;;  %v10120_v20 = vld [vmem:[#allocation44_spill] sm:$0xff]  ;;  %v6921_v58 = vpop.f32.mrf.mxu1  ;;  %v10125_v55 = vld [vmem:[#allocation79_spill] sm:$0xff] }
 0x236   : > { %3167 = vst.msk [vmem:[#allocation3 + $0xf1] sm:$0xff] %vm280_vm1, %v3080_v15  ;;  %v3078_v37 = vmax.f32 %v3046_v40, 0.0  ;;  %v3049_v30 = vadd.f32 %v8570_v63, %v3010_v12  ;;  %v3008_v52 = vmul.f32 %v8553_v23, %v2969_v60  ;;  %v2974_v3 = vadd.f32 %v6947_v56, %v2680_v50  ;;  %v10122_v41 = vld [vmem:[#allocation46_spill] sm:$0xff]  ;;  %v10123_v50 = vld [vmem:[#allocation47_spill] sm:$0xff] }
 0x237   : > { %v2388_v27 = vadd.f32 %v10119_v28, %v2093_v42  ;;  %6968 = vmatmul.mubr.msk.bf16.gmra.mxu1 %vm280_vm1, %v8819_v22  ;;  %7002 = vmatmul.mubr.msk.bf16.gmra.mxu0 %vm280_vm1, %v8821_v38  ;;  %v2905_v11 = vpop.f32.mrf.mxu0  ;;  %v10121_v42 = vld [vmem:[#allocation45_spill] sm:$0xff]  ;;  %v2097_v39 = vadd.f32 %v10123_v50, %v10122_v41  ;;  %v10124_v25 = vld [vmem:[#allocation50_spill] sm:$0xff]  ;;  %v2679_v8 = vadd.f32 %v8708_v34, %v2385_v17  ;;  %v10126_v34 = vld [vmem:[#allocation80_spill] sm:$0xff] }
 0x238   : > { %3165 = vst.msk [vmem:[#allocation3 + $0xd9] sm:$0xff] %vm280_vm1, %v3078_v37  ;;  %v3081_v46 = vmax.f32 %v3049_v30, 0.0  ;;  %v3047_v33 = vadd.f32 %v8570_v63, %v3008_v52  ;;  %v3013_v10 = vmul.f32 %v8553_v23, %v2974_v3  ;;  %v2972_v43 = vadd.f32 %v2905_v11, %v2678_v0  ;;  %6971 = vmatprep.mubr.msk.bf16.mxu1 %vm280_vm1, %v8823_v48  ;;  %v3246_v52 = vld [vmem:[#allocation3 + $0xc1] sm:$0xff] }
 0x239   : > { %7005 = vmatprep.mubr.msk.bf16.mxu0 %vm280_vm1, %v8825_v7  ;;  %v2099_v35 = vadd.f32 %v10121_v42, %v10120_v20  ;;  %v1804_v14 = vadd.f32 %v10124_v25, %v8545_v24  ;;  %v6948_v61 = vpop.f32.mrf.mxu0  ;;  %v3247_v12 = vld [vmem:[#allocation3 + $0xc9] sm:$0xff]  ;;  %v2684_v21 = vadd.f32 %v8748_v4, %v2390_v6  ;;  %v2391_v16 = vadd.f32 %v10125_v55, %v8799_v45  ;;  %v3197_v45 = vld [vmem:[#allocation3 + $0xc0] sm:$0xff] }
 0x23a   : > { %3168 = vst.msk [vmem:[#allocation3 + $0xf9] sm:$0xff] %vm280_vm1, %v3081_v46  ;;  %v3079_v0 = vmax.f32 %v3047_v33, 0.0  ;;  %v3052_v49 = vadd.f32 %v8570_v63, %v3013_v10  ;;  %v3011_v15 = vmul.f32 %v8553_v23, %v2972_v43  ;;  %v2975_v40 = vadd.f32 %v6948_v61, %v2681_v18  ;;  %v3198_v60 = vld [vmem:[#allocation3 + $0xc8] sm:$0xff]  ;;  %v2643_v33 = vpop.f32.mrf.mxu1 }
 0x23b   : > { %v2682_v24 = vadd.f32 %v8774_v26, %v2388_v27  ;;  %v2389_v17 = vadd.f32 %v10126_v34, %v8802_v62  ;;  %v2908_v56 = vpop.f32.mrf.mxu0  ;;  %v3245_v37 = vld [vmem:[#allocation3 + $0xb1] sm:$0xff]  ;;  %v3244_v6 = vld [vmem:[#allocation3 + $0xa9] sm:$0xff]  ;;  %v8870_v62 = vpack.c.bf16 %v3247_v12, %v3246_v52  ;;  %v8872_v46 = vpack.c.bf16 %v3198_v60, %v3197_v45 }
 0x23c   : > { %v3196_v30 = vld [vmem:[#allocation3 + $0xb0] sm:$0xff]  ;;  %3166 = vst.msk [vmem:[#allocation3 + $0xe1] sm:$0xff] %vm280_vm1, %v3079_v0  ;;  %v3084_v3 = vmax.f32 %v3052_v49, 0.0  ;;  %v3050_v18 = vadd.f32 %v8570_v63, %v3011_v15  ;;  %v3014_v32 = vmul.f32 %v8553_v23, %v2975_v40  ;;  %v2973_v4 = vadd.f32 %v2908_v56, %v2679_v8  ;;  %v3195_v28 = vld [vmem:[#allocation3 + $0xa8] sm:$0xff]  ;;  %v6922_v60 = vpop.f32.mrf.mxu1 }
 0x23d   : > { %v6951_v11 = vpop.f32.mrf.mxu0  ;;  %v8866_v26 = vpack.c.bf16 %v3245_v37, %v3244_v6  ;;  %v8868_v27 = vpack.c.bf16 %v3196_v30, %v3195_v28  ;;  %v2685_v41 = vadd.f32 %v8805_v29, %v2391_v16  ;;  %v2394_v50 = vadd.f32 %v8496_v54, %v2099_v35  ;;  %v10127_v54 = vld [vmem:[#allocation48_spill] sm:$0xff]  ;;  %v10129_v35 = vld [vmem:[#allocation51_spill] sm:$0xff] }
 0x23e   : > { %3171 = vst.msk [vmem:[#allocation3 + $0x121] sm:$0xff] %vm280_vm1, %v3084_v3  ;;  %v3082_v10 = vmax.f32 %v3050_v18, 0.0  ;;  %v3053_v43 = vadd.f32 %v8570_v63, %v3014_v32  ;;  %v3012_v20 = vmul.f32 %v8553_v23, %v2973_v4  ;;  %v2978_v42 = vadd.f32 %v6951_v11, %v2684_v21  ;;  %v3250_v18 = vld [vmem:[#allocation3 + $0xf1] sm:$0xff] }
 0x23f   : > { %v2392_v25 = vadd.f32 %v8511_v13, %v2097_v39  ;;  %6972 = vmatmul.mubr.msk.bf16.gmra.mxu1 %vm280_vm1, %v8866_v26  ;;  %7006 = vmatmul.mubr.msk.bf16.gmra.mxu0 %vm280_vm1, %v8868_v27  ;;  %v2921_v8 = vpop.f32.mrf.mxu0  ;;  %v10128_v13 = vld [vmem:[#allocation49_spill] sm:$0xff]  ;;  %v2098_v39 = vadd.f32 %v10129_v35, %v1804_v14  ;;  %v2683_v40 = vadd.f32 %v8827_v44, %v2389_v17 }
 0x240   : > { %3169 = vst.msk [vmem:[#allocation3 + $0x109] sm:$0xff] %vm280_vm1, %v3082_v10  ;;  %v3085_v61 = vmax.f32 %v3053_v43, 0.0  ;;  %v3051_v0 = vadd.f32 %v8570_v63, %v3012_v20  ;;  %v3017_v49 = vmul.f32 %v8553_v23, %v2978_v42  ;;  %v2976_v15 = vadd.f32 %v2921_v8, %v2682_v24  ;;  %6975 = vmatprep.mubr.msk.bf16.mxu1 %vm280_vm1, %v8870_v62  ;;  %v3248_v45 = vld [vmem:[#allocation3 + $0xd9] sm:$0xff]  ;;  %v2646_v20 = vpop.f32.mrf.mxu1 }
 0x241   : > { %7009 = vmatprep.mubr.msk.bf16.mxu0 %vm280_vm1, %v8872_v46  ;;  %v2100_v29 = vadd.f32 %v10128_v13, %v10127_v54  ;;  %v6952_v12 = vpop.f32.mrf.mxu0  ;;  %v3251_v34 = vld [vmem:[#allocation3 + $0xf9] sm:$0xff]  ;;  %v2688_v37 = vadd.f32 %v6921_v58, %v2394_v50  ;;  %v2686_v52 = vadd.f32 %v2643_v33, %v2392_v25  ;;  %v2393_v14 = vadd.f32 %v8533_v47, %v2098_v39  ;;  %v3201_v58 = vld [vmem:[#allocation3 + $0xf0] sm:$0xff] }
 0x242   : > { %3172 = vst.msk [vmem:[#allocation3 + $0x129] sm:$0xff] %vm280_vm1, %v3085_v61  ;;  %v3083_v21 = vmax.f32 %v3051_v0, 0.0  ;;  %v3056_v55 = vadd.f32 %v8570_v63, %v3017_v49  ;;  %v3015_v16 = vmul.f32 %v8553_v23, %v2976_v15  ;;  %v2979_v24 = vadd.f32 %v6952_v12, %v2685_v41  ;;  %v3202_v56 = vld [vmem:[#allocation3 + $0xf8] sm:$0xff] }
 0x243   : > { %v2395_v30 = vadd.f32 %v8521_v9, %v2100_v29  ;;  %v2924_v3 = vpop.f32.mrf.mxu0  ;;  %v3249_v44 = vld [vmem:[#allocation3 + $0xe1] sm:$0xff]  ;;  %v3199_v11 = vld [vmem:[#allocation3 + $0xd8] sm:$0xff]  ;;  %v8907_v47 = vpack.c.bf16 %v3251_v34, %v3250_v18  ;;  %v8909_v43 = vpack.c.bf16 %v3202_v56, %v3201_v58  ;;  %v2687_v13 = vadd.f32 %v2646_v20, %v2393_v14 }
 0x244   : > { %v3200_v17 = vld [vmem:[#allocation3 + $0xe0] sm:$0xff]  ;;  %3170 = vst.msk [vmem:[#allocation3 + $0x111] sm:$0xff] %vm280_vm1, %v3083_v21  ;;  %v3088_v32 = vmax.f32 %v3056_v55, 0.0  ;;  %v3054_v4 = vadd.f32 %v8570_v63, %v3015_v16  ;;  %v3018_v6 = vmul.f32 %v8553_v23, %v2979_v24  ;;  %v2977_v28 = vadd.f32 %v2924_v3, %v2683_v40 }
 0x245   : > { %v6955_v10 = vpop.f32.mrf.mxu0  ;;  %v8903_v9 = vpack.c.bf16 %v3249_v44, %v3248_v45  ;;  %v8905_v33 = vpack.c.bf16 %v3200_v17, %v3199_v11  ;;  %v2689_v8 = vadd.f32 %v6922_v60, %v2395_v30  ;;  %v3254_v3 = vld [vmem:[#allocation3 + $0x121] sm:$0xff] }
 0x246   : > { %3175 = vst.msk [vmem:[#allocation3 + $0x151] sm:$0xff] %vm280_vm1, %v3088_v32  ;;  %v3086_v42 = vmax.f32 %v3054_v4, 0.0  ;;  %v3057_v41 = vadd.f32 %v8570_v63, %v3018_v6  ;;  %v3016_v50 = vmul.f32 %v8553_v23, %v2977_v28  ;;  %v2982_v25 = vadd.f32 %v6955_v10, %v2688_v37  ;;  %v3205_v32 = vld [vmem:[#allocation3 + $0x120] sm:$0xff] }
 0x247   : > { %6976 = vmatmul.mubr.msk.bf16.gmra.mxu1 %vm280_vm1, %v8903_v9  ;;  %7010 = vmatmul.mubr.msk.bf16.gmra.mxu0 %vm280_vm1, %v8905_v33  ;;  %v2937_v61 = vpop.f32.mrf.mxu0  ;;  %v3203_v14 = vld [vmem:[#allocation3 + $0x108] sm:$0xff] }
 0x248   : > { %3173 = vst.msk [vmem:[#allocation3 + $0x139] sm:$0xff] %vm280_vm1, %v3086_v42  ;;  %v3089_v0 = vmax.f32 %v3057_v41, 0.0  ;;  %v3055_v49 = vadd.f32 %v8570_v63, %v3016_v50  ;;  %v3021_v15 = vmul.f32 %v8553_v23, %v2982_v25  ;;  %v2980_v54 = vadd.f32 %v2937_v61, %v2686_v52  ;;  %6979 = vmatprep.mubr.msk.bf16.mxu1 %vm280_vm1, %v8907_v47  ;;  %v3252_v52 = vld [vmem:[#allocation3 + $0x109] sm:$0xff] }
 0x249   : > { %7013 = vmatprep.mubr.msk.bf16.mxu0 %vm280_vm1, %v8909_v43  ;;  %v6956_v29 = vpop.f32.mrf.mxu0  ;;  %v3255_v60 = vld [vmem:[#allocation3 + $0x129] sm:$0xff] }
 0x24a   : > { %3176 = vst.msk [vmem:[#allocation3 + $0x159] sm:$0xff] %vm280_vm1, %v3089_v0  ;;  %v3087_v35 = vmax.f32 %v3055_v49, 0.0  ;;  %v3060_v39 = vadd.f32 %v8570_v63, %v3021_v15  ;;  %v3019_v40 = vmul.f32 %v8553_v23, %v2980_v54  ;;  %v2983_v12 = vadd.f32 %v6956_v29, %v2689_v8  ;;  %v3206_v24 = vld [vmem:[#allocation3 + $0x128] sm:$0xff] }
 0x24b   : > { %v2940_v21 = vpop.f32.mrf.mxu0  ;;  %v3253_v55 = vld [vmem:[#allocation3 + $0x111] sm:$0xff]  ;;  %v8935_v18 = vpack.c.bf16 %v3255_v60, %v3254_v3  ;;  %v8940_v45 = vpack.c.bf16 %v3206_v24, %v3205_v32  ;;  %v3704_v54 = vld [vmem:[#allocation3 + $0x2] sm:$0xff] }
 0x24c   : > { %v3204_v16 = vld [vmem:[#allocation3 + $0x110] sm:$0xff]  ;;  %3174 = vst.msk [vmem:[#allocation3 + $0x141] sm:$0xff] %vm280_vm1, %v3087_v35  ;;  %v3092_v34 = vmax.f32 %v3060_v39, 0.0  ;;  %v3058_v56 = vadd.f32 %v8570_v63, %v3019_v40  ;;  %v3022_v37 = vmul.f32 %v8553_v23, %v2983_v12  ;;  %v2981_v30 = vadd.f32 %v2940_v21, %v2687_v13  ;;  %v3712_v3 = vld [vmem:[#allocation3 + $0x62] sm:$0xff] }
 0x24d   : > { %v8931_v44 = vpack.c.bf16 %v3253_v55, %v3252_v52  ;;  %v8933_v17 = vpack.c.bf16 %v3204_v16, %v3203_v14  ;;  %v3258_v61 = vld [vmem:[#allocation3 + $0x151] sm:$0xff]  ;;  %v3706_v55 = vld [vmem:[#allocation3 + $0x1a] sm:$0xff]  ;;  %v3707_v16 = vld [vmem:[#allocation3 + $0x22] sm:$0xff]  ;;  %v4685_v52 = vsel %vm548_vm0, %v8731_v2, 0 }
 0x24e   : > { %3179 = vst.msk [vmem:[#allocation3 + $0x181] sm:$0xff] %vm280_vm1, %v3092_v34  ;;  %v3090_v4 = vmax.f32 %v3058_v56, 0.0  ;;  %v3061_v6 = vadd.f32 %v8570_v63, %v3022_v37  ;;  %v3020_v28 = vmul.f32 %v8553_v23, %v2981_v30  ;;  %v3209_v0 = vld [vmem:[#allocation3 + $0x150] sm:$0xff]  ;;  %v3709_v34 = vld [vmem:[#allocation3 + $0x3a] sm:$0xff]  ;;  %v8981_v56 = vpack.c.bf16 %v3707_v16, %v3706_v55  ;;  %v3728_v16 = vld [vmem:[#allocation3 + $0x122] sm:$0xff] }
 0x24f   : > { %6980 = vmatmul.mubr.msk.bf16.gmra.mxu1 %vm280_vm1, %v8931_v44  ;;  %7014 = vmatmul.mubr.msk.bf16.gmra.mxu0 %vm280_vm1, %v8933_v17  ;;  %v3256_v10 = vld [vmem:[#allocation3 + $0x139] sm:$0xff]  ;;  %v3705_v13 = vld [vmem:[#allocation3 + $0xa] sm:$0xff]  ;;  %v4391_v37 = vsel %vm548_vm0, %v8726_v53, 0 }
 0x250   : > { %3177 = vst.msk [vmem:[#allocation3 + $0x169] sm:$0xff] %vm280_vm1, %v3090_v4  ;;  %v3093_v11 = vmax.f32 %v3061_v6, 0.0  ;;  %v3059_v58 = vadd.f32 %v8570_v63, %v3020_v28  ;;  %6983 = vmatprep.mubr.msk.bf16.mxu1 %vm280_vm1, %v8935_v18  ;;  %7017 = vmatprep.mubr.msk.bf16.mxu0 %vm280_vm1, %v8940_v45  ;;  %v3207_v20 = vld [vmem:[#allocation3 + $0x138] sm:$0xff]  ;;  %v3736_v21 = vpack.c.bf16 %v3705_v13, %v3704_v54  ;;  %v9001_v53 = vld [vmem:[%s9970_s4 + $0x1c] sm:$0xf]  ;;  %v3723_v13 = vld [vmem:[#allocation3 + $0xe2] sm:$0xff] }
 0x251   : > { %v3259_v42 = vld [vmem:[#allocation3 + $0x159] sm:$0xff]  ;;  %v3710_v2 = vld [vmem:[#allocation3 + $0x4a] sm:$0xff] }
 0x252   : > { %3180 = vst.msk [vmem:[#allocation3 + $0x189] sm:$0xff] %vm280_vm1, %v3093_v11  ;;  %v3091_v23 = vmax.f32 %v3059_v58, 0.0  ;;  %v3210_v25 = vld [vmem:[#allocation3 + $0x158] sm:$0xff]  ;;  %v8958_v49 = vpack.c.bf16 %v3259_v42, %v3258_v61  ;;  %v3713_v32 = vld [vmem:[#allocation3 + $0x6a] sm:$0xff]  ;;  %v3715_v11 = vld [vmem:[#allocation3 + $0x82] sm:$0xff] }
 0x253   : > { %v3257_v41 = vld [vmem:[#allocation3 + $0x141] sm:$0xff]  ;;  %v8960_v15 = vpack.c.bf16 %v3210_v25, %v3209_v0  ;;  %v3708_v24 = vld [vmem:[#allocation3 + $0x32] sm:$0xff]  ;;  %v9013_v6 = vpack.c.bf16 %v3713_v32, %v3712_v3  ;;  %v3718_v42 = vld [vmem:[#allocation3 + $0xaa] sm:$0xff] }
 0x254   : > { %v3208_v50 = vld [vmem:[#allocation3 + $0x140] sm:$0xff]  ;;  %3178 = vst.msk [vmem:[#allocation3 + $0x171] sm:$0xff] %vm280_vm1, %v3091_v23  ;;  %v8954_v8 = vpack.c.bf16 %v3257_v41, %v3256_v10  ;;  %v8985_v30 = vpack.c.bf16 %v3709_v34, %v3708_v24  ;;  %v3711_v14 = vld [vmem:[#allocation3 + $0x52] sm:$0xff]  ;;  %v3721_v25 = vld [vmem:[#allocation3 + $0xca] sm:$0xff] }
 0x255   : > { %v8956_v63 = vpack.c.bf16 %v3208_v50, %v3207_v20  ;;  %v9011_v4 = vpack.c.bf16 %v3711_v14, %v3710_v2  ;;  %v3714_v28 = vld [vmem:[#allocation3 + $0x7a] sm:$0xff]  ;;  %v3716_v58 = vld [vmem:[#allocation3 + $0x92] sm:$0xff]  ;;  %v3720_v50 = vld [vmem:[#allocation3 + $0xc2] sm:$0xff] }
 0x256   : > { %v3717_v23 = vld [vmem:[#allocation3 + $0x9a] sm:$0xff]  ;;  %v9023_v10 = vpack.c.bf16 %v3715_v11, %v3714_v28  ;;  %v3719_v41 = vld [vmem:[#allocation3 + $0xb2] sm:$0xff]  ;;  %v9037_v0 = vpack.c.bf16 %v3721_v25, %v3720_v50  ;;  %v3729_v24 = vld [vmem:[#allocation3 + $0x12a] sm:$0xff] }
 0x257   : > { %6984 = vmatmul.mubr.msk.bf16.gmra.mxu1 %vm280_vm1, %v8954_v8  ;;  %7018 = vmatmul.mubr.msk.bf16.gmra.mxu0 %vm280_vm1, %v8956_v63  ;;  %v3260_v29 = vld [vmem:[#allocation3 + $0x169] sm:$0xff]  ;;  %v9025_v20 = vpack.c.bf16 %v3717_v23, %v3716_v58  ;;  %v9035_v61 = vpack.c.bf16 %v3719_v41, %v3718_v42  ;;  %v3722_v54 = vld [vmem:[#allocation3 + $0xda] sm:$0xff]  ;;  %v3727_v55 = vld [vmem:[#allocation3 + $0x112] sm:$0xff] }
 0x258   : > { %6987 = vmatprep.mubr.msk.bf16.mxu1 %vm280_vm1, %v8958_v49  ;;  %7021 = vmatprep.mubr.msk.bf16.mxu0 %vm280_vm1, %v8960_v15  ;;  %v3211_v39 = vld [vmem:[#allocation3 + $0x168] sm:$0xff]  ;;  %v3732_v14 = vld [vmem:[#allocation3 + $0x152] sm:$0xff]  ;;  %v3733_v3 = vld [vmem:[#allocation3 + $0x15a] sm:$0xff] }
 0x259   : > { %v3731_v2 = vld [vmem:[#allocation3 + $0x142] sm:$0xff]  ;;  %v3750_v28 = vpack.c.bf16 %v3733_v3, %v3732_v14 }
 0x25a   : > { %v4029_v23 = vld [vmem:[#allocation3 + $0x188] sm:$0xff]  ;;  %v4028_v42 = vld [vmem:[#allocation3 + $0x180] sm:$0xff] }
 0x25b   : > { %v3261_v35 = vld [vmem:[#allocation3 + $0x171] sm:$0xff]  ;;  %v9077_v50 = vpack.c.bf16 %v4029_v23, %v4028_v42 }
 0x25c   : > { %v3212_v40 = vld [vmem:[#allocation3 + $0x170] sm:$0xff]  ;;  %v8970_v12 = vpack.c.bf16 %v3261_v35, %v3260_v29  ;;  %v3725_v35 = vld [vmem:[#allocation3 + $0xfa] sm:$0xff] }
 0x25d   : > { %v8972_v60 = vpack.c.bf16 %v3212_v40, %v3211_v39  ;;  %v3724_v29 = vld [vmem:[#allocation3 + $0xf2] sm:$0xff]  ;;  %v9047_v39 = vpack.c.bf16 %v3723_v13, %v3722_v54  ;;  %v3734_v11 = vld [vmem:[#allocation3 + $0x16a] sm:$0xff]  ;;  %v5274_v54 = vsel %vm548_vm0, %v9001_v53, 0 }
 0x25e   : > { %v9049_v40 = vpack.c.bf16 %v3725_v35, %v3724_v29  ;;  %v3735_v58 = vld [vmem:[#allocation3 + $0x172] sm:$0xff] }
 0x25f   : > { %6988 = vmatmul.mubr.msk.bf16.gmra.mxu1 %vm280_vm1, %v8970_v12  ;;  %7022 = vmatmul.mubr.msk.bf16.gmra.mxu0 %vm280_vm1, %v8972_v60  ;;  %v3751_v41 = vpack.c.bf16 %v3735_v58, %v3734_v11  ;;  %v6322_v13 = vld [vmem:[%s9970_s4 + $0x20] sm:$0xf] }
 0x260   : > { %7061 = vmatprep.mubr.msk.bf16.mxu0 %vm280_vm1, %v8704_v19  ;;  %7027 = vmatprep.mubr.msk.bf16.mxu1 %vm280_vm1, %v3736_v21  ;;  %v8996_v19 = vld [vmem:[%s9970_s4 + $0x18] sm:$0xf] }
 0x261   : > { %v3726_v21 = vld [vmem:[#allocation3 + $0x10a] sm:$0xff]  ;;  %v4980_v25 = vsel %vm548_vm0, %v8996_v19, 0 }
 0x262   : > { %v9059_v34 = vpack.c.bf16 %v3727_v55, %v3726_v21  ;;  %v5568_v21 = vsel %vm548_vm0, %v6322_v13, 0 }
 0x267   : > { %7028 = vmatmul.mubr.msk.bf16.vlgmr.msra.gmra.mxu1 %vm280_vm1, %v8981_v56  ;;  %7062 = vmatmul.mubr.msk.bf16.vlgmr.msra.gmra.mxu0 %vm280_vm1, %v8721_v1 }
 0x268   : > { %7094 = vmatpush3.bf16.msra.mxu1 %v4391_v37  ;;  %7031 = vmatprep.mubr.msk.bf16.mxu1 %vm280_vm1, %v8985_v30  ;;  %v9061_v37 = vpack.c.bf16 %v3729_v24, %v3728_v16 }
 0x269   : > { %7065 = vmatprep.mubr.msk.bf16.mxu0 %vm280_vm1, %v8768_v51  ;;  %7128 = vmatpush3.bf16.msra.mxu0 %v4685_v52  ;;  %v3730_v52 = vld [vmem:[#allocation3 + $0x13a] sm:$0xff] }
 0x26a   : > { %7278 = vmatprep.subr.msk.bf16.mxu1 %vm548_vm0, %v8996_v19  ;;  %7279 = vmatprep.subr.msk.bf16.mxu0 %vm548_vm0, %v9001_v53  ;;  %v3749_v32 = vpack.c.bf16 %v3731_v2, %v3730_v52  ;;  %v4617_v19 = vld [vmem:[#allocation3 + $0x18a] sm:$0xff]  ;;  %v4322_v53 = vld [vmem:[#allocation3 + $0x181] sm:$0xff] }
 0x26f   : > { %7032 = vmatmul.mubr.msk.bf16.gmra.mxu1 %vm280_vm1, %v9011_v4  ;;  %7066 = vmatmul.mubr.msk.bf16.gmra.mxu0 %vm280_vm1, %v8772_v36 }
 0x270   : > { %7035 = vmatprep.mubr.msk.bf16.mxu1 %vm280_vm1, %v9013_v6  ;;  %7069 = vmatprep.mubr.msk.bf16.mxu0 %vm280_vm1, %v8821_v38 }
 0x277   : > { %7036 = vmatmul.mubr.msk.bf16.gmra.mxu1 %vm280_vm1, %v9023_v10  ;;  %7070 = vmatmul.mubr.msk.bf16.gmra.mxu0 %vm280_vm1, %v8825_v7 }
 0x278   : > { %7039 = vmatprep.mubr.msk.bf16.mxu1 %vm280_vm1, %v9025_v20  ;;  %7073 = vmatprep.mubr.msk.bf16.mxu0 %vm280_vm1, %v8868_v27 }
 0x27f   : > { %7040 = vmatmul.mubr.msk.bf16.gmra.mxu1 %vm280_vm1, %v9035_v61  ;;  %7074 = vmatmul.mubr.msk.bf16.gmra.mxu0 %vm280_vm1, %v8872_v46 }
 0x280   : > { %7043 = vmatprep.mubr.msk.bf16.mxu1 %vm280_vm1, %v9037_v0  ;;  %7077 = vmatprep.mubr.msk.bf16.mxu0 %vm280_vm1, %v8905_v33 }
 0x287   : > { %7044 = vmatmul.mubr.msk.bf16.gmra.mxu1 %vm280_vm1, %v9047_v39  ;;  %7078 = vmatmul.mubr.msk.bf16.gmra.mxu0 %vm280_vm1, %v8909_v43 }
 0x288   : > { %7047 = vmatprep.mubr.msk.bf16.mxu1 %vm280_vm1, %v9049_v40  ;;  %7081 = vmatprep.mubr.msk.bf16.mxu0 %vm280_vm1, %v8933_v17 }
 0x28f   : > { %7048 = vmatmul.mubr.msk.bf16.gmra.mxu1 %vm280_vm1, %v9059_v34  ;;  %7082 = vmatmul.mubr.msk.bf16.gmra.mxu0 %vm280_vm1, %v8940_v45 }
 0x290   : > { %7051 = vmatprep.mubr.msk.bf16.mxu1 %vm280_vm1, %v9061_v37  ;;  %7085 = vmatprep.mubr.msk.bf16.mxu0 %vm280_vm1, %v8956_v63 }
 0x297   : > { %7052 = vmatmul.mubr.msk.bf16.gmra.mxu1 %vm280_vm1, %v3749_v32  ;;  %7086 = vmatmul.mubr.msk.bf16.gmra.mxu0 %vm280_vm1, %v8960_v15 }
 0x298   : > { %7055 = vmatprep.mubr.msk.bf16.mxu1 %vm280_vm1, %v3750_v28  ;;  %7089 = vmatprep.mubr.msk.bf16.mxu0 %vm280_vm1, %v8972_v60 }
 0x29f   : > { %7056 = vmatmul.mubr.msk.bf16.gmra.mxu1 %vm280_vm1, %v3751_v41  ;;  %7090 = vmatmul.mubr.msk.bf16.gmra.mxu0 %vm280_vm1, %v9077_v50 }
 0x2a0   : > { %7095 = vmatprep.mubr.msk.bf16.mxu1 %vm280_vm1, %v8702_v57  ;;  %7129 = vmatprep.mubr.msk.bf16.mxu0 %vm280_vm1, %v8981_v56  ;;  %v4323_v57 = vld [vmem:[#allocation3 + $0x189] sm:$0xff] }
 0x2a1   : > { %v4616_v56 = vld [vmem:[#allocation3 + $0x182] sm:$0xff]  ;;  %v9147_v29 = vpack.c.bf16 %v4323_v57, %v4322_v53 }
 0x2a2   : > { %v9149_v35 = vpack.c.bf16 %v4617_v19, %v4616_v56 }
 0x2a7   : > { %7096 = vmatmul.mubr.msk.bf16.vlgmr.msra.gmra.mxu1 %vm280_vm1, %v8706_v5  ;;  %7130 = vmatmul.mubr.msk.bf16.vlgmr.msra.gmra.mxu0 %vm280_vm1, %v8985_v30 }
 0x2a8   : > { %7162 = vmatpush3.bf16.msra.mxu1 %v4980_v25  ;;  %7099 = vmatprep.mubr.msk.bf16.mxu1 %vm280_vm1, %v8766_v59 }
 0x2a9   : > { %7133 = vmatprep.mubr.msk.bf16.mxu0 %vm280_vm1, %v9011_v4  ;;  %7196 = vmatpush3.bf16.msra.mxu0 %v5274_v54 }
 0x2aa   : > { %7280 = vmatprep.subr.msk.bf16.mxu1 %vm548_vm0, %v6322_v13 }
 0x2af   : > { %7100 = vmatmul.mubr.msk.bf16.gmra.mxu1 %vm280_vm1, %v8770_v31  ;;  %7134 = vmatmul.mubr.msk.bf16.gmra.mxu0 %vm280_vm1, %v9013_v6 }
 0x2b0   : > { %7103 = vmatprep.mubr.msk.bf16.mxu1 %vm280_vm1, %v8819_v22  ;;  %7137 = vmatprep.mubr.msk.bf16.mxu0 %vm280_vm1, %v9023_v10 }
 0x2b7   : > { %7104 = vmatmul.mubr.msk.bf16.gmra.mxu1 %vm280_vm1, %v8823_v48  ;;  %7138 = vmatmul.mubr.msk.bf16.gmra.mxu0 %vm280_vm1, %v9025_v20 }
 0x2b8   : > { %7107 = vmatprep.mubr.msk.bf16.mxu1 %vm280_vm1, %v8866_v26  ;;  %7141 = vmatprep.mubr.msk.bf16.mxu0 %vm280_vm1, %v9035_v61 }
 0x2bf   : > { %7108 = vmatmul.mubr.msk.bf16.gmra.mxu1 %vm280_vm1, %v8870_v62  ;;  %7142 = vmatmul.mubr.msk.bf16.gmra.mxu0 %vm280_vm1, %v9037_v0 }
 0x2c0   : > { %7111 = vmatprep.mubr.msk.bf16.mxu1 %vm280_vm1, %v8903_v9  ;;  %7145 = vmatprep.mubr.msk.bf16.mxu0 %vm280_vm1, %v9047_v39 }
 0x2c7   : > { %7112 = vmatmul.mubr.msk.bf16.gmra.mxu1 %vm280_vm1, %v8907_v47  ;;  %7146 = vmatmul.mubr.msk.bf16.gmra.mxu0 %vm280_vm1, %v9049_v40 }
 0x2c8   : > { %7115 = vmatprep.mubr.msk.bf16.mxu1 %vm280_vm1, %v8931_v44  ;;  %7149 = vmatprep.mubr.msk.bf16.mxu0 %vm280_vm1, %v9059_v34 }
 0x2cf   : > { %7116 = vmatmul.mubr.msk.bf16.gmra.mxu1 %vm280_vm1, %v8935_v18  ;;  %7150 = vmatmul.mubr.msk.bf16.gmra.mxu0 %vm280_vm1, %v9061_v37 }
 0x2d0   : > { %7119 = vmatprep.mubr.msk.bf16.mxu1 %vm280_vm1, %v8954_v8  ;;  %7153 = vmatprep.mubr.msk.bf16.mxu0 %vm280_vm1, %v3749_v32 }
 0x2d7   : > { %7120 = vmatmul.mubr.msk.bf16.gmra.mxu1 %vm280_vm1, %v8958_v49  ;;  %7154 = vmatmul.mubr.msk.bf16.gmra.mxu0 %vm280_vm1, %v3750_v28 }
 0x2d8   : > { %7123 = vmatprep.mubr.msk.bf16.mxu1 %vm280_vm1, %v8970_v12  ;;  %7157 = vmatprep.mubr.msk.bf16.mxu0 %vm280_vm1, %v3751_v41 }
 0x2df   : > { %7124 = vmatmul.mubr.msk.bf16.gmra.mxu1 %vm280_vm1, %v9147_v29  ;;  %7158 = vmatmul.mubr.msk.bf16.gmra.mxu0 %vm280_vm1, %v9149_v35 }
 0x2e0   : > { %7163 = vmatprep.mubr.msk.bf16.mxu1 %vm280_vm1, %v8721_v1  ;;  %7197 = vmatprep.mubr.msk.bf16.mxu0 %vm280_vm1, %v8706_v5 }
 0x2e7   : > { %v6961_v55 = vpop.f32.mrf.mxu1  ;;  %v6995_v16 = vpop.f32.mrf.mxu0  ;;  %7164 = vmatmul.mubr.msk.bf16.vlgmr.msra.gmra.mxu1 %vm280_vm1, %v8768_v51  ;;  %7198 = vmatmul.mubr.msk.bf16.vlgmr.msra.gmra.mxu0 %vm280_vm1, %v8766_v59 }
 0x2e8   : > { %v9164_v24 = vadd.f32 %v6995_v16, %v6961_v55  ;;  %7230 = vmatpush3.bf16.msra.mxu1 %v5568_v21  ;;  %7167 = vmatprep.mubr.msk.bf16.mxu1 %vm280_vm1, %v8772_v36 }
 0x2e9   : > { %7201 = vmatprep.mubr.msk.bf16.mxu0 %vm280_vm1, %v8770_v31  ;;  %v3365_v5 = vpop.f32.mrf.mxu1  ;;  %v3577_v1 = vpop.f32.mrf.mxu0 }
 0x2ea   : > { %v9170_v52 = vadd.f32 %v3577_v1, %v3365_v5 }
 0x2eb   : > { %v6962_v2 = vpop.f32.mrf.mxu1  ;;  %v6996_v14 = vpop.f32.mrf.mxu0 }
 0x2ec   : > { %v9172_v3 = vadd.f32 %v6996_v14, %v6962_v2 }
 0x2ed   : > { %v3368_v51 = vpop.f32.mrf.mxu1  ;;  %v3580_v32 = vpop.f32.mrf.mxu0 }
 0x2ee   : > { %v9174_v59 = vadd.f32 %v3580_v32, %v3368_v51 }
 0x2ef   : > { %v6965_v28 = vpop.f32.mrf.mxu1  ;;  %v6999_v11 = vpop.f32.mrf.mxu0  ;;  %7168 = vmatmul.mubr.msk.bf16.gmra.mxu1 %vm280_vm1, %v8821_v38  ;;  %7202 = vmatmul.mubr.msk.bf16.gmra.mxu0 %vm280_vm1, %v8819_v22 }
 0x2f0   : > { %v9180_v31 = vadd.f32 %v6999_v11, %v6965_v28  ;;  %7171 = vmatprep.mubr.msk.bf16.mxu1 %vm280_vm1, %v8825_v7  ;;  %7205 = vmatprep.mubr.msk.bf16.mxu0 %vm280_vm1, %v8823_v48 }
 0x2f1   : > { %v3381_v36 = vpop.f32.mrf.mxu1  ;;  %v3593_v58 = vpop.f32.mrf.mxu0 }
 0x2f2   : > { %v9186_v23 = vadd.f32 %v3593_v58, %v3381_v36 }
 0x2f3   : > { %v6966_v42 = vpop.f32.mrf.mxu1  ;;  %v7000_v41 = vpop.f32.mrf.mxu0 }
 0x2f4   : > { %v9188_v25 = vadd.f32 %v7000_v41, %v6966_v42 }
 0x2f5   : > { %v3384_v38 = vpop.f32.mrf.mxu1  ;;  %v3596_v54 = vpop.f32.mrf.mxu0 }
 0x2f6   : > { %v9190_v13 = vadd.f32 %v3596_v54, %v3384_v38 }
 0x2f7   : > { %v6969_v22 = vpop.f32.mrf.mxu1  ;;  %v7003_v57 = vpop.f32.mrf.mxu0  ;;  %7172 = vmatmul.mubr.msk.bf16.gmra.mxu1 %vm280_vm1, %v8868_v27  ;;  %7206 = vmatmul.mubr.msk.bf16.gmra.mxu0 %vm280_vm1, %v8866_v26 }
 0x2f8   : > { %v9196_v48 = vadd.f32 %v7003_v57, %v6969_v22  ;;  %7175 = vmatprep.mubr.msk.bf16.mxu1 %vm280_vm1, %v8872_v46  ;;  %7209 = vmatprep.mubr.msk.bf16.mxu0 %vm280_vm1, %v8870_v62 }
 0x2f9   : > { %v3397_v7 = vpop.f32.mrf.mxu1  ;;  %v3609_v56 = vpop.f32.mrf.mxu0 }
 0x2fa   : > { %v9202_v19 = vadd.f32 %v3609_v56, %v3397_v7 }
 0x2fb   : > { %v6970_v53 = vpop.f32.mrf.mxu1  ;;  %v7004_v21 = vpop.f32.mrf.mxu0 }
 0x2fc   : > { %v9204_v55 = vadd.f32 %v7004_v21, %v6970_v53 }
 0x2fd   : > { %v3400_v27 = vpop.f32.mrf.mxu1  ;;  %v3612_v16 = vpop.f32.mrf.mxu0 }
 0x2fe   : > { %v9206_v5 = vadd.f32 %v3612_v16, %v3400_v27 }
 0x2ff   : > { %v6973_v26 = vpop.f32.mrf.mxu1  ;;  %v7007_v1 = vpop.f32.mrf.mxu0  ;;  %7176 = vmatmul.mubr.msk.bf16.gmra.mxu1 %vm280_vm1, %v8905_v33  ;;  %7210 = vmatmul.mubr.msk.bf16.gmra.mxu0 %vm280_vm1, %v8903_v9 }
 0x300   : > { %v9212_v62 = vadd.f32 %v7007_v1, %v6973_v26  ;;  %7179 = vmatprep.mubr.msk.bf16.mxu1 %vm280_vm1, %v8909_v43  ;;  %7213 = vmatprep.mubr.msk.bf16.mxu0 %vm280_vm1, %v8907_v47 }
 0x301   : > { %v3413_v46 = vpop.f32.mrf.mxu1  ;;  %v3625_v2 = vpop.f32.mrf.mxu0 }
 0x302   : > { %v9218_v14 = vadd.f32 %v3625_v2, %v3413_v46 }
 0x303   : > { %v6974_v51 = vpop.f32.mrf.mxu1  ;;  %v7008_v32 = vpop.f32.mrf.mxu0 }
 0x304   : > { %v9220_v28 = vadd.f32 %v7008_v32, %v6974_v51  ;;  %v4912_v51 = vld [vmem:[#allocation3 + $0x1a0] sm:$0xff] }
 0x305   : > { %v3416_v33 = vpop.f32.mrf.mxu1  ;;  %v3628_v11 = vpop.f32.mrf.mxu0  ;;  %v5205_v32 = vld [vmem:[#allocation3 + $0x199] sm:$0xff] }
 0x306   : > { %v9222_v36 = vadd.f32 %v3628_v11, %v3416_v33  ;;  %v5206_v33 = vld [vmem:[#allocation3 + $0x1a1] sm:$0xff] }
 0x307   : > { %v6977_v9 = vpop.f32.mrf.mxu1  ;;  %v7011_v58 = vpop.f32.mrf.mxu0  ;;  %7180 = vmatmul.mubr.msk.bf16.gmra.mxu1 %vm280_vm1, %v8933_v17  ;;  %7214 = vmatmul.mubr.msk.bf16.gmra.mxu0 %vm280_vm1, %v8931_v44 }
 0x308   : > { %v9228_v47 = vadd.f32 %v7011_v58, %v6977_v9  ;;  %7183 = vmatprep.mubr.msk.bf16.mxu1 %vm280_vm1, %v8940_v45  ;;  %7217 = vmatprep.mubr.msk.bf16.mxu0 %vm280_vm1, %v8935_v18 }
 0x309   : > { %v3429_v43 = vpop.f32.mrf.mxu1  ;;  %v3641_v42 = vpop.f32.mrf.mxu0 }
 0x30a   : > { %v9234_v41 = vadd.f32 %v3641_v42, %v3429_v43 }
 0x30b   : > { %v6978_v38 = vpop.f32.mrf.mxu1  ;;  %v7012_v54 = vpop.f32.mrf.mxu0 }
 0x30c   : > { %v9236_v22 = vadd.f32 %v7012_v54, %v6978_v38 }
 0x30d   : > { %v3432_v17 = vpop.f32.mrf.mxu1  ;;  %v3644_v57 = vpop.f32.mrf.mxu0 }
 0x30e   : > { %v9238_v7 = vadd.f32 %v3644_v57, %v3432_v17 }
 0x30f   : > { %v6981_v44 = vpop.f32.mrf.mxu1  ;;  %v7015_v56 = vpop.f32.mrf.mxu0  ;;  %7184 = vmatmul.mubr.msk.bf16.gmra.mxu1 %vm280_vm1, %v8956_v63  ;;  %7218 = vmatmul.mubr.msk.bf16.gmra.mxu0 %vm280_vm1, %v8954_v8 }
 0x310   : > { %v9244_v18 = vadd.f32 %v7015_v56, %v6981_v44  ;;  %7187 = vmatprep.mubr.msk.bf16.mxu1 %vm280_vm1, %v8960_v15  ;;  %7221 = vmatprep.mubr.msk.bf16.mxu0 %vm280_vm1, %v8958_v49  ;;  %v4911_v49 = vld [vmem:[#allocation3 + $0x198] sm:$0xff] }
 0x311   : > { %v3445_v45 = vpop.f32.mrf.mxu1  ;;  %v3657_v53 = vpop.f32.mrf.mxu0  ;;  %v4928_v42 = vpack.c.bf16 %v4912_v51, %v4911_v49 }
 0x312   : > { %v9250_v21 = vadd.f32 %v3657_v53, %v3445_v45 }
 0x313   : > { %v6982_v27 = vpop.f32.mrf.mxu1  ;;  %v7016_v16 = vpop.f32.mrf.mxu0 }
 0x314   : > { %v9252_v26 = vadd.f32 %v7016_v16, %v6982_v27 }
 0x315   : > { %v3448_v63 = vpop.f32.mrf.mxu1  ;;  %v3660_v1 = vpop.f32.mrf.mxu0 }
 0x316   : > { %v9254_v46 = vadd.f32 %v3660_v1, %v3448_v63 }
 0x317   : > { %v6985_v8 = vpop.f32.mrf.mxu1  ;;  %v7019_v2 = vpop.f32.mrf.mxu0  ;;  %7188 = vmatmul.mubr.msk.bf16.gmra.mxu1 %vm280_vm1, %v8972_v60  ;;  %7222 = vmatmul.mubr.msk.bf16.gmra.mxu0 %vm280_vm1, %v8970_v12  ;;  %v5222_v12 = vpack.c.bf16 %v5206_v33, %v5205_v32 }
 0x318   : > { %v9260_v15 = vadd.f32 %v7019_v2, %v6985_v8  ;;  %7191 = vmatprep.mubr.msk.bf16.mxu1 %vm280_vm1, %v9077_v50  ;;  %7225 = vmatprep.mubr.msk.bf16.mxu0 %vm280_vm1, %v9147_v29 }
 0x319   : > { %v3461_v11 = vpop.f32.mrf.mxu1  ;;  %v3673_v9 = vpop.f32.mrf.mxu0 }
 0x31a   : > { %v9266_v58 = vadd.f32 %v3673_v9, %v3461_v11 }
 0x31b   : > { %v6986_v60 = vpop.f32.mrf.mxu1  ;;  %v7020_v43 = vpop.f32.mrf.mxu0 }
 0x31c   : > { %v9268_v38 = vadd.f32 %v7020_v43, %v6986_v60 }
 0x31d   : > { %v3464_v54 = vpop.f32.mrf.mxu1  ;;  %v3676_v17 = vpop.f32.mrf.mxu0 }
 0x31e   : > { %v9270_v57 = vadd.f32 %v3676_v17, %v3464_v54 }
 0x31f   : > { %v6989_v50 = vpop.f32.mrf.mxu1  ;;  %v7023_v44 = vpop.f32.mrf.mxu0  ;;  %7192 = vmatmul.mubr.msk.bf16.gmra.mxu1 %vm280_vm1, %v4928_v42  ;;  %7226 = vmatmul.mubr.msk.bf16.gmra.mxu0 %vm280_vm1, %v5222_v12 }
 0x320   : > { %v9274_v29 = vadd.f32 %v7023_v44, %v6989_v50  ;;  %7231 = vmatprep.mubr.msk.bf16.mxu1 %vm280_vm1, %v8985_v30 }
 0x321   : > { %v3477_v56 = vpop.f32.mrf.mxu1  ;;  %v3689_v45 = vpop.f32.mrf.mxu0 }
 0x322   : > { %v9278_v53 = vadd.f32 %v3689_v45, %v3477_v56 }
 0x323   : > { %v6990_v27 = vpop.f32.mrf.mxu1  ;;  %v7024_v16 = vpop.f32.mrf.mxu0 }
 0x324   : > { %v9280_v63 = vadd.f32 %v7024_v16, %v6990_v27 }
 0x325   : > { %v3480_v1 = vpop.f32.mrf.mxu1  ;;  %v3692_v8 = vpop.f32.mrf.mxu0 }
 0x326   : > { %v9282_v2 = vadd.f32 %v3692_v8, %v3480_v1 }
 0x327   : > { %v7029_v49 = vpop.f32.mrf.mxu1  ;;  %v7063_v51 = vpop.f32.mrf.mxu0  ;;  %7232 = vmatmul.mubr.msk.bf16.vlgmr.msra.gmra.mxu1 %vm280_vm1, %v9011_v4 }
 0x328   : > { %v3968_v32 = vadd.f32 %v7029_v49, %v9164_v24  ;;  %7235 = vmatprep.mubr.msk.bf16.mxu1 %vm280_vm1, %v9013_v6 }
 0x329   : > { %v3839_v30 = vpop.f32.mrf.mxu1  ;;  %v4133_v33 = vpop.f32.mrf.mxu0 }
 0x32a   : > { %v9289_v11 = vadd.f32 %v7063_v51, %v3968_v32  ;;  %v3966_v9 = vadd.f32 %v3839_v30, %v9170_v52 }
 0x32b   : > { %v7030_v60 = vpop.f32.mrf.mxu1  ;;  %v7064_v43 = vpop.f32.mrf.mxu0 }
 0x32c   : > { %v9292_v42 = vadd.f32 %v4133_v33, %v3966_v9  ;;  %v3969_v12 = vadd.f32 %v7030_v60, %v9172_v3 }
 0x32d   : > { %v3842_v54 = vpop.f32.mrf.mxu1  ;;  %v4136_v17 = vpop.f32.mrf.mxu0 }
 0x32e   : > { %v9295_v4 = vadd.f32 %v7064_v43, %v3969_v12  ;;  %v3967_v24 = vadd.f32 %v3842_v54, %v9174_v59 }
 0x32f   : > { %v7033_v50 = vpop.f32.mrf.mxu1  ;;  %v7067_v6 = vpop.f32.mrf.mxu0  ;;  %7236 = vmatmul.mubr.msk.bf16.gmra.mxu1 %vm280_vm1, %v9023_v10 }
 0x330   : > { %v9300_v44 = vadd.f32 %v4136_v17, %v3967_v24  ;;  %v3972_v52 = vadd.f32 %v7033_v50, %v9180_v31  ;;  %7239 = vmatprep.mubr.msk.bf16.mxu1 %vm280_vm1, %v9025_v20 }
 0x331   : > { %v3855_v56 = vpop.f32.mrf.mxu1  ;;  %v4149_v3 = vpop.f32.mrf.mxu0 }
 0x332   : > { %v9305_v45 = vadd.f32 %v7067_v6, %v3972_v52  ;;  %v3970_v27 = vadd.f32 %v3855_v56, %v9186_v23 }
 0x333   : > { %v7034_v16 = vpop.f32.mrf.mxu1  ;;  %v7068_v59 = vpop.f32.mrf.mxu0 }
 0x334   : > { %v9308_v1 = vadd.f32 %v4149_v3, %v3970_v27  ;;  %v3973_v8 = vadd.f32 %v7034_v16, %v9188_v25 }
 0x335   : > { %v3858_v10 = vpop.f32.mrf.mxu1  ;;  %v4152_v49 = vpop.f32.mrf.mxu0 }
 0x336   : > { %v9311_v51 = vadd.f32 %v7068_v59, %v3973_v8  ;;  %v3971_v31 = vadd.f32 %v3858_v10, %v9190_v13 }
 0x337   : > { %v7037_v32 = vpop.f32.mrf.mxu1  ;;  %v7071_v20 = vpop.f32.mrf.mxu0  ;;  %7240 = vmatmul.mubr.msk.bf16.gmra.mxu1 %vm280_vm1, %v9035_v61 }
 0x338   : > { %v9316_v30 = vadd.f32 %v4152_v49, %v3971_v31  ;;  %v3976_v23 = vadd.f32 %v7037_v32, %v9196_v48  ;;  %7243 = vmatprep.mubr.msk.bf16.mxu1 %vm280_vm1, %v9037_v0 }
 0x339   : > { %v3871_v33 = vpop.f32.mrf.mxu1  ;;  %v4165_v25 = vpop.f32.mrf.mxu0 }
 0x33a   : > { %v9321_v9 = vadd.f32 %v7071_v20, %v3976_v23  ;;  %v3974_v60 = vadd.f32 %v3871_v33, %v9202_v19  ;;  %v5491_v33 = vld [vmem:[#allocation3 + $0x13a] sm:$0xff] }
 0x33b   : > { %v7038_v43 = vpop.f32.mrf.mxu1  ;;  %v7072_v13 = vpop.f32.mrf.mxu0 }
 0x33c   : > { %v9324_v12 = vadd.f32 %v4165_v25, %v3974_v60  ;;  %v3977_v54 = vadd.f32 %v7038_v43, %v9204_v55  ;;  %v5493_v43 = vld [vmem:[#allocation3 + $0x152] sm:$0xff] }
 0x33d   : > { %v3874_v61 = vpop.f32.mrf.mxu1  ;;  %v4168_v17 = vpop.f32.mrf.mxu0 }
 0x33e   : > { %v9327_v24 = vadd.f32 %v7072_v13, %v3977_v54  ;;  %v3975_v48 = vadd.f32 %v3874_v61, %v9206_v5  ;;  %v5494_v13 = vld [vmem:[#allocation3 + $0x15a] sm:$0xff] }
 0x33f   : > { %v7041_v50 = vpop.f32.mrf.mxu1  ;;  %v7075_v0 = vpop.f32.mrf.mxu0  ;;  %7244 = vmatmul.mubr.msk.bf16.gmra.mxu1 %vm280_vm1, %v9047_v39 }
 0x340   : > { %v9332_v6 = vadd.f32 %v4168_v17, %v3975_v48  ;;  %v3980_v19 = vadd.f32 %v7041_v50, %v9212_v62  ;;  %7247 = vmatprep.mubr.msk.bf16.mxu1 %vm280_vm1, %v9049_v40  ;;  %v5513_v50 = vpack.c.bf16 %v5494_v13, %v5493_v43 }
 0x341   : > { %v3887_v52 = vpop.f32.mrf.mxu1  ;;  %v4181_v55 = vpop.f32.mrf.mxu0 }
 0x342   : > { %v9337_v56 = vadd.f32 %v7075_v0, %v3980_v19  ;;  %v3978_v3 = vadd.f32 %v3887_v52, %v9218_v14 }
 0x343   : > { %v7042_v27 = vpop.f32.mrf.mxu1  ;;  %v7076_v5 = vpop.f32.mrf.mxu0 }
 0x344   : > { %v9340_v16 = vadd.f32 %v4181_v55, %v3978_v3  ;;  %v3981_v59 = vadd.f32 %v7042_v27, %v9220_v28 }
 0x345   : > { %v3890_v39 = vpop.f32.mrf.mxu1  ;;  %v4184_v8 = vpop.f32.mrf.mxu0 }
 0x346   : > { %v9343_v10 = vadd.f32 %v7076_v5, %v3981_v59  ;;  %v3979_v62 = vadd.f32 %v3890_v39, %v9222_v36  ;;  %v5492_v36 = vld [vmem:[#allocation3 + $0x142] sm:$0xff]  ;;  %v5495_v5 = vld [vmem:[#allocation3 + $0x16a] sm:$0xff]  ;;  %v5496_v59 = vld [vmem:[#allocation3 + $0x172] sm:$0xff] }
 0x347   : > { %v7045_v49 = vpop.f32.mrf.mxu1  ;;  %v7079_v40 = vpop.f32.mrf.mxu0  ;;  %7248 = vmatmul.mubr.msk.bf16.gmra.mxu1 %vm280_vm1, %v9059_v34  ;;  %v5512_v17 = vpack.c.bf16 %v5492_v36, %v5491_v33  ;;  %v5499_v36 = vld [vmem:[#allocation3 + $0x19a] sm:$0xff] }
 0x348   : > { %v9348_v31 = vadd.f32 %v4184_v8, %v3979_v62  ;;  %v3984_v14 = vadd.f32 %v7045_v49, %v9228_v47  ;;  %7251 = vmatprep.mubr.msk.bf16.mxu1 %vm280_vm1, %v9061_v37 }
 0x349   : > { %v3903_v32 = vpop.f32.mrf.mxu1  ;;  %v4197_v28 = vpop.f32.mrf.mxu0 }
 0x34a   : > { %v9353_v20 = vadd.f32 %v7079_v40, %v3984_v14  ;;  %v3982_v23 = vadd.f32 %v3903_v32, %v9234_v41  ;;  %v5514_v14 = vpack.c.bf16 %v5496_v59, %v5495_v5 }
 0x34b   : > { %v7046_v25 = vpop.f32.mrf.mxu1  ;;  %v7080_v60 = vpop.f32.mrf.mxu0 }
 0x34c   : > { %v9356_v34 = vadd.f32 %v4197_v28, %v3982_v23  ;;  %v3985_v54 = vadd.f32 %v7046_v25, %v9236_v22 }
 0x34d   : > { %v3906_v47 = vpop.f32.mrf.mxu1  ;;  %v4200_v61 = vpop.f32.mrf.mxu0 }
 0x34e   : > { %v9359_v37 = vadd.f32 %v7080_v60, %v3985_v54  ;;  %v3983_v48 = vadd.f32 %v3906_v47, %v9238_v7 }
 0x34f   : > { %v7049_v0 = vpop.f32.mrf.mxu1  ;;  %v7083_v41 = vpop.f32.mrf.mxu0  ;;  %7252 = vmatmul.mubr.msk.bf16.gmra.mxu1 %vm280_vm1, %v5512_v17 }
 0x350   : > { %v9363_v19 = vadd.f32 %v4200_v61, %v3983_v48  ;;  %v3988_v52 = vadd.f32 %v7049_v0, %v9244_v18  ;;  %7255 = vmatprep.mubr.msk.bf16.mxu1 %vm280_vm1, %v5513_v50 }
 0x351   : > { %v3919_v55 = vpop.f32.mrf.mxu1  ;;  %v4213_v22 = vpop.f32.mrf.mxu0 }
 0x352   : > { %v9367_v3 = vadd.f32 %v7083_v41, %v3988_v52  ;;  %v3986_v27 = vadd.f32 %v3919_v55, %v9250_v21 }
 0x353   : > { %v7050_v7 = vpop.f32.mrf.mxu1  ;;  %v7084_v39 = vpop.f32.mrf.mxu0 }
 0x354   : > { %v9370_v8 = vadd.f32 %v4213_v22, %v3986_v27  ;;  %v3989_v62 = vadd.f32 %v7050_v7, %v9252_v26  ;;  %v5500_v26 = vld [vmem:[#allocation3 + $0x1a2] sm:$0xff] }
 0x355   : > { %v3922_v49 = vpop.f32.mrf.mxu1  ;;  %v4216_v40 = vpop.f32.mrf.mxu0  ;;  %v5516_v47 = vpack.c.bf16 %v5500_v26, %v5499_v36 }
 0x356   : > { %v9373_v18 = vadd.f32 %v7084_v39, %v3989_v62  ;;  %v3987_v32 = vadd.f32 %v3922_v49, %v9254_v46 }
 0x357   : > { %v7053_v28 = vpop.f32.mrf.mxu1  ;;  %v7087_v23 = vpop.f32.mrf.mxu0  ;;  %7256 = vmatmul.mubr.msk.bf16.gmra.mxu1 %vm280_vm1, %v5514_v14 }
 0x358   : > { %v9377_v21 = vadd.f32 %v4216_v40, %v3987_v32  ;;  %v3992_v33 = vadd.f32 %v7053_v28, %v9260_v15  ;;  %7259 = vmatprep.mubr.msk.bf16.mxu1 %vm280_vm1, %v9149_v35 }
 0x359   : > { %v3935_v25 = vpop.f32.mrf.mxu1  ;;  %v4229_v60 = vpop.f32.mrf.mxu0 }
 0x35a   : > { %v9382_v43 = vadd.f32 %v7087_v23, %v3992_v33  ;;  %v3990_v13 = vadd.f32 %v3935_v25, %v9266_v58 }
 0x35b   : > { %v7054_v46 = vpop.f32.mrf.mxu1  ;;  %v7088_v54 = vpop.f32.mrf.mxu0 }
 0x35c   : > { %v9385_v61 = vadd.f32 %v4229_v60, %v3990_v13  ;;  %v3993_v17 = vadd.f32 %v7054_v46, %v9268_v38 }
 0x35d   : > { %v3938_v48 = vpop.f32.mrf.mxu1  ;;  %v4232_v15 = vpop.f32.mrf.mxu0 }
 0x35e   : > { %v9388_v50 = vadd.f32 %v7088_v54, %v3993_v17  ;;  %v3991_v35 = vadd.f32 %v3938_v48, %v9270_v57 }
 0x35f   : > { %v7057_v0 = vpop.f32.mrf.mxu1  ;;  %v7091_v41 = vpop.f32.mrf.mxu0  ;;  %7260 = vmatmul.mubr.msk.bf16.gmra.mxu1 %vm280_vm1, %v5516_v47 }
 0x360   : > { %v9392_v52 = vadd.f32 %v4232_v15, %v3991_v35  ;;  %v3996_v58 = vadd.f32 %v7057_v0, %v9274_v29 }
 0x361   : > { %v3951_v55 = vpop.f32.mrf.mxu1  ;;  %v4245_v22 = vpop.f32.mrf.mxu0 }
 0x362   : > { %v9395_v27 = vadd.f32 %v7091_v41, %v3996_v58  ;;  %v3994_v38 = vadd.f32 %v3951_v55, %v9278_v53 }
 0x363   : > { %v7058_v5 = vpop.f32.mrf.mxu1  ;;  %v7092_v59 = vpop.f32.mrf.mxu0 }
 0x364   : > { %v9398_v7 = vadd.f32 %v4245_v22, %v3994_v38  ;;  %v3997_v57 = vadd.f32 %v7058_v5, %v9280_v63 }
 0x365   : > { %v3954_v39 = vpop.f32.mrf.mxu1  ;;  %v4248_v62 = vpop.f32.mrf.mxu0 }
 0x366   : > { %v9401_v49 = vadd.f32 %v7092_v59, %v3997_v57  ;;  %v3995_v40 = vadd.f32 %v3954_v39, %v9282_v2 }
 0x367   : > { %v7097_v14 = vpop.f32.mrf.mxu1  ;;  %v9404_v29 = vpop.f32.mrf.mxu0 }
 0x368   : > { %v9406_v32 = vadd.f32 %v4248_v62, %v3995_v40  ;;  %v9409_v28 = vadd.f32 %v7097_v14, %v9289_v11 }
 0x369   : > { %v4427_v53 = vpop.f32.mrf.mxu1  ;;  %v9411_v23 = vpop.f32.mrf.mxu0 }
 0x36a   : > { %v9414_v33 = vadd.f32 %v4427_v53, %v9292_v42 }
 0x36b   : > { %v7098_v63 = vpop.f32.mrf.mxu1  ;;  %v9416_v36 = vpop.f32.mrf.mxu0 }
 0x36c   : > { %v9419_v26 = vadd.f32 %v7098_v63, %v9295_v4 }
 0x36d   : > { %v4430_v2 = vpop.f32.mrf.mxu1  ;;  %v9421_v25 = vpop.f32.mrf.mxu0 }
 0x36e   : > { %v9424_v60 = vadd.f32 %v4430_v2, %v9300_v44 }
 0x36f   : > { %v7101_v11 = vpop.f32.mrf.mxu1  ;;  %v9426_v13 = vpop.f32.mrf.mxu0 }
 0x370   : > { %v9429_v46 = vadd.f32 %v7101_v11, %v9305_v45 }
 0x371   : > { %v4443_v42 = vpop.f32.mrf.mxu1  ;;  %v9431_v54 = vpop.f32.mrf.mxu0 }
 0x372   : > { %v9434_v47 = vadd.f32 %v4443_v42, %v9308_v1 }
 0x373   : > { %v7102_v4 = vpop.f32.mrf.mxu1  ;;  %v9436_v17 = vpop.f32.mrf.mxu0 }
 0x374   : > { %v9439_v48 = vadd.f32 %v7102_v4, %v9311_v51 }
 0x375   : > { %v4446_v44 = vpop.f32.mrf.mxu1  ;;  %v9441_v15 = vpop.f32.mrf.mxu0 }
 0x376   : > { %v9444_v35 = vadd.f32 %v4446_v44, %v9316_v30 }
 0x377   : > { %v7105_v45 = vpop.f32.mrf.mxu1  ;;  %v9446_v0 = vpop.f32.mrf.mxu0 }
 0x378   : > { %v9449_v41 = vadd.f32 %v7105_v45, %v9321_v9 }
 0x379   : > { %v4459_v1 = vpop.f32.mrf.mxu1  ;;  %v9451_v58 = vpop.f32.mrf.mxu0 }
 0x37a   : > { %v9454_v55 = vadd.f32 %v4459_v1, %v9324_v12 }
 0x37b   : > { %v7106_v51 = vpop.f32.mrf.mxu1  ;;  %v9456_v22 = vpop.f32.mrf.mxu0 }
 0x37c   : > { %v9459_v38 = vadd.f32 %v7106_v51, %v9327_v24 }
 0x37d   : > { %v4462_v30 = vpop.f32.mrf.mxu1  ;;  %v9461_v5 = vpop.f32.mrf.mxu0 }
 0x37e   : > { %v9464_v59 = vadd.f32 %v4462_v30, %v9332_v6 }
 0x37f   : > { %v7109_v9 = vpop.f32.mrf.mxu1  ;;  %v9466_v57 = vpop.f32.mrf.mxu0 }
 0x380   : > { %v9469_v39 = vadd.f32 %v7109_v9, %v9337_v56 }
 0x381   : > { %v4475_v12 = vpop.f32.mrf.mxu1  ;;  %v9471_v62 = vpop.f32.mrf.mxu0 }
 0x382   : > { %v9474_v40 = vadd.f32 %v4475_v12, %v9340_v16 }
 0x383   : > { %v7110_v24 = vpop.f32.mrf.mxu1  ;;  %v9476_v14 = vpop.f32.mrf.mxu0 }
 0x384   : > { %10130 = vst [vmem:[#allocation4_spill] sm:$0xff] %v9476_v14  ;;  %v9479_v53 = vadd.f32 %v7110_v24, %v9343_v10 }
 0x385   : > { %v4478_v6 = vpop.f32.mrf.mxu1  ;;  %v9481_v63 = vpop.f32.mrf.mxu0 }
 0x386   : > { %10131 = vst [vmem:[#allocation5_spill] sm:$0xff] %v9481_v63  ;;  %v9484_v2 = vadd.f32 %v4478_v6, %v9348_v31 }
 0x387   : > { %v7113_v56 = vpop.f32.mrf.mxu1  ;;  %v9486_v11 = vpop.f32.mrf.mxu0 }
 0x388   : > { %10132 = vst [vmem:[#allocation6_spill] sm:$0xff] %v9484_v2  ;;  %10133 = vst [vmem:[#allocation7_spill] sm:$0xff] %v9486_v11  ;;  %v9489_v42 = vadd.f32 %v7113_v56, %v9353_v20 }
 0x389   : > { %v4491_v16 = vpop.f32.mrf.mxu1  ;;  %v9491_v4 = vpop.f32.mrf.mxu0 }
 0x38a   : > { %10134 = vst [vmem:[#allocation8_spill] sm:$0xff] %v9489_v42  ;;  %10135 = vst [vmem:[#allocation9_spill] sm:$0xff] %v9491_v4  ;;  %v9494_v44 = vadd.f32 %v4491_v16, %v9356_v34 }
 0x38b   : > { %v7114_v10 = vpop.f32.mrf.mxu1  ;;  %v9496_v45 = vpop.f32.mrf.mxu0 }
 0x38c   : > { %10136 = vst [vmem:[#allocation10_spill] sm:$0xff] %v9494_v44  ;;  %10137 = vst [vmem:[#allocation11_spill] sm:$0xff] %v9496_v45  ;;  %v9499_v1 = vadd.f32 %v7114_v10, %v9359_v37 }
 0x38d   : > { %v4494_v31 = vpop.f32.mrf.mxu1  ;;  %v9501_v51 = vpop.f32.mrf.mxu0 }
 0x38e   : > { %10138 = vst [vmem:[#allocation12_spill] sm:$0xff] %v9499_v1  ;;  %10139 = vst [vmem:[#allocation13_spill] sm:$0xff] %v9501_v51  ;;  %v9504_v30 = vadd.f32 %v4494_v31, %v9363_v19 }
 0x38f   : > { %v7117_v20 = vpop.f32.mrf.mxu1  ;;  %v9506_v9 = vpop.f32.mrf.mxu0 }
 0x390   : > { %10140 = vst [vmem:[#allocation14_spill] sm:$0xff] %v9504_v30  ;;  %10141 = vst [vmem:[#allocation15_spill] sm:$0xff] %v9506_v9  ;;  %v9509_v12 = vadd.f32 %v7117_v20, %v9367_v3 }
 0x391   : > { %v4507_v34 = vpop.f32.mrf.mxu1  ;;  %v9511_v24 = vpop.f32.mrf.mxu0 }
 0x392   : > { %10142 = vst [vmem:[#allocation16_spill] sm:$0xff] %v9509_v12  ;;  %10143 = vst [vmem:[#allocation17_spill] sm:$0xff] %v9511_v24  ;;  %v9514_v6 = vadd.f32 %v4507_v34, %v9370_v8 }
 0x393   : > { %v7118_v37 = vpop.f32.mrf.mxu1  ;;  %v9516_v56 = vpop.f32.mrf.mxu0 }
 0x394   : > { %10144 = vst [vmem:[#allocation18_spill] sm:$0xff] %v9514_v6  ;;  %10145 = vst [vmem:[#allocation54_spill] sm:$0xff] %v9516_v56  ;;  %v9519_v16 = vadd.f32 %v7118_v37, %v9373_v18 }
 0x395   : > { %v4510_v19 = vpop.f32.mrf.mxu1  ;;  %v9521_v10 = vpop.f32.mrf.mxu0 }
 0x396   : > { %10146 = vst [vmem:[#allocation52_spill] sm:$0xff] %v9519_v16  ;;  %10147 = vst [vmem:[#allocation26_spill] sm:$0xff] %v9521_v10  ;;  %v9524_v31 = vadd.f32 %v4510_v19, %v9377_v21 }
 0x397   : > { %v7121_v3 = vpop.f32.mrf.mxu1  ;;  %v9526_v20 = vpop.f32.mrf.mxu0 }
 0x398   : > { %10148 = vst [vmem:[#allocation58_spill] sm:$0xff] %v9524_v31  ;;  %10149 = vst [vmem:[#allocation53_spill] sm:$0xff] %v9526_v20  ;;  %v9529_v24 = vadd.f32 %v7121_v3, %v9382_v43 }
 0x399   : > { %v4523_v8 = vpop.f32.mrf.mxu1  ;;  %v9531_v34 = vpop.f32.mrf.mxu0 }
 0x39a   : > { %10150 = vst [vmem:[#allocation21_spill] sm:$0xff] %v9529_v24  ;;  %10151 = vst [vmem:[#allocation19_spill] sm:$0xff] %v9531_v34  ;;  %v9534_v56 = vadd.f32 %v4523_v8, %v9385_v61 }
 0x39b   : > { %v7122_v18 = vpop.f32.mrf.mxu1  ;;  %v9536_v37 = vpop.f32.mrf.mxu0 }
 0x39c   : > { %10152 = vst [vmem:[#allocation20_spill] sm:$0xff] %v9534_v56  ;;  %10153 = vst [vmem:[#allocation22_spill] sm:$0xff] %v9536_v37  ;;  %v9539_v10 = vadd.f32 %v7122_v18, %v9388_v50 }
 0x39d   : > { %v4526_v21 = vpop.f32.mrf.mxu1  ;;  %v9541_v19 = vpop.f32.mrf.mxu0 }
 0x39e   : > { %10154 = vst [vmem:[#allocation23_spill] sm:$0xff] %v9539_v10  ;;  %10155 = vst [vmem:[#allocation61_spill] sm:$0xff] %v9541_v19  ;;  %v9544_v20 = vadd.f32 %v4526_v21, %v9392_v52 }
 0x39f   : > { %v7125_v43 = vpop.f32.mrf.mxu1  ;;  %v9546_v3 = vpop.f32.mrf.mxu0 }
 0x3a0   : > { %10156 = vst [vmem:[#allocation55_spill] sm:$0xff] %v9544_v20  ;;  %10157 = vst [vmem:[#allocation24_spill] sm:$0xff] %v9546_v3  ;;  %v9549_v34 = vadd.f32 %v7125_v43, %v9395_v27 }
 0x3a1   : > { %v4539_v61 = vpop.f32.mrf.mxu1  ;;  %v9551_v8 = vpop.f32.mrf.mxu0 }
 0x3a2   : > { %10158 = vst [vmem:[#allocation25_spill] sm:$0xff] %v9549_v34  ;;  %10159 = vst [vmem:[#allocation27_spill] sm:$0xff] %v9551_v8  ;;  %v9554_v37 = vadd.f32 %v4539_v61, %v9398_v7 }
 0x3a3   : > { %v7126_v50 = vpop.f32.mrf.mxu1  ;;  %v9556_v18 = vpop.f32.mrf.mxu0 }
 0x3a4   : > { %10160 = vst [vmem:[#allocation64_spill] sm:$0xff] %v9554_v37  ;;  %10161 = vst [vmem:[#allocation57_spill] sm:$0xff] %v9556_v18  ;;  %v9559_v19 = vadd.f32 %v7126_v50, %v9401_v49 }
 0x3a5   : > { %v4542_v52 = vpop.f32.mrf.mxu1  ;;  %v9561_v21 = vpop.f32.mrf.mxu0 }
 0x3a6   : > { %10162 = vst [vmem:[#allocation28_spill] sm:$0xff] %v9559_v19  ;;  %10163 = vst [vmem:[#allocation29_spill] sm:$0xff] %v9561_v21  ;;  %v9564_v3 = vadd.f32 %v4542_v52, %v9406_v32 }
 0x3a7   : > { %v7165_v27 = vpop.f32.mrf.mxu1  ;;  %v7199_v43 = vpop.f32.mrf.mxu0 }
 0x3a8   : > { %10164 = vst [vmem:[#allocation34_spill] sm:$0xff] %v9564_v3 }
 0x3a9   : > { %v5016_v34 = vpop.f32.mrf.mxu1  ;;  %v5310_v20 = vpop.f32.mrf.mxu0 }
 0x3ab   : > { %v7166_v8 = vpop.f32.mrf.mxu1  ;;  %v7200_v7 = vpop.f32.mrf.mxu0 }
 0x3ad   : > { %v5019_v10 = vpop.f32.mrf.mxu1  ;;  %v9570_v18 = vpop.f32.mrf.mxu0 }
 0x3af   : > { %v9566_v61 = vpop.f32.mrf.mxu1  ;;  %v9576_v21 = vpop.f32.mrf.mxu0 }
 0x3b1   : > { %v9568_v37 = vpop.f32.mrf.mxu1  ;;  %v9582_v3 = vpop.f32.mrf.mxu0 }
 0x3b3   : > { %v9572_v49 = vpop.f32.mrf.mxu1  ;;  %v9588_v24 = vpop.f32.mrf.mxu0 }
 0x3b5   : > { %v9574_v50 = vpop.f32.mrf.mxu1  ;;  %v9594_v6 = vpop.f32.mrf.mxu0 }
 0x3b7   : > { %v9578_v32 = vpop.f32.mrf.mxu1  ;;  %v9600_v51 = vpop.f32.mrf.mxu0 }
 0x3b9   : > { %v9580_v52 = vpop.f32.mrf.mxu1  ;;  %v9606_v1 = vpop.f32.mrf.mxu0 }
 0x3bb   : > { %v9584_v19 = vpop.f32.mrf.mxu1  ;;  %v9612_v11 = vpop.f32.mrf.mxu0 }
 0x3bd   : > { %v9586_v56 = vpop.f32.mrf.mxu1 }
 0x3bf   : > { %v9590_v31 = vpop.f32.mrf.mxu1 }
 0x3c1   : > { %v9592_v16 = vpop.f32.mrf.mxu1 }
 0x3c2   : > { %10165 = vst [vmem:[#allocation67_spill] sm:$0xff] %v9592_v16 }
 0x3c3   : > { %v9596_v9 = vpop.f32.mrf.mxu1 }
 0x3c4   : > { %10166 = vst [vmem:[#allocation59_spill] sm:$0xff] %v9596_v9  ;;  %v9618_v9 = vpop.f32.mrf.mxu0 }
 0x3c5   : > { %v9598_v12 = vpop.f32.mrf.mxu1  ;;  %10174 = vst [vmem:[#allocation35_spill] sm:$0xff] %v9618_v9 }
 0x3c6   : > { %10167 = vst [vmem:[#allocation30_spill] sm:$0xff] %v9598_v12 }
 0x3c7   : > { %v9602_v30 = vpop.f32.mrf.mxu1 }
 0x3c8   : > { %10168 = vst [vmem:[#allocation31_spill] sm:$0xff] %v9602_v30  ;;  %v9624_v30 = vpop.f32.mrf.mxu0 }
 0x3c9   : > { %v9604_v45 = vpop.f32.mrf.mxu1  ;;  %10177 = vst [vmem:[#allocation65_spill] sm:$0xff] %v9624_v30 }
 0x3ca   : > { %10169 = vst [vmem:[#allocation70_spill] sm:$0xff] %v9604_v45 }
 0x3cb   : > { %v9608_v4 = vpop.f32.mrf.mxu1 }
 0x3cc   : > { %10170 = vst [vmem:[#allocation60_spill] sm:$0xff] %v9608_v4  ;;  %v9630_v4 = vpop.f32.mrf.mxu0 }
 0x3cd   : > { %v9610_v44 = vpop.f32.mrf.mxu1  ;;  %10180 = vst [vmem:[#allocation68_spill] sm:$0xff] %v9630_v4 }
 0x3ce   : > { %10171 = vst [vmem:[#allocation62_spill] sm:$0xff] %v9610_v44 }
 0x3cf   : > { %v9614_v42 = vpop.f32.mrf.mxu1 }
 0x3d0   : > { %10172 = vst [vmem:[#allocation32_spill] sm:$0xff] %v9614_v42  ;;  %v9636_v42 = vpop.f32.mrf.mxu0 }
 0x3d1   : > { %v9616_v63 = vpop.f32.mrf.mxu1  ;;  %10183 = vst [vmem:[#allocation42_spill] sm:$0xff] %v9636_v42 }
 0x3d2   : > { %10173 = vst [vmem:[#allocation33_spill] sm:$0xff] %v9616_v63 }
 0x3d3   : > { %v9620_v12 = vpop.f32.mrf.mxu1 }
 0x3d4   : > { %10175 = vst [vmem:[#allocation63_spill] sm:$0xff] %v9620_v12  ;;  %v4850_v12 = vadd.f32 %v9404_v29, %v9409_v28 }
 0x3d5   : > { %v9622_v2 = vpop.f32.mrf.mxu1 }
 0x3d6   : > { %10176 = vst [vmem:[#allocation77_spill] sm:$0xff] %v9622_v2  ;;  %v5145_v30 = vadd.f32 %v7165_v27, %v4850_v12  ;;  %v4853_v27 = vadd.f32 %v9441_v15, %v9444_v35 }
 0x3d7   : > { %v9626_v45 = vpop.f32.mrf.mxu1 }
 0x3d8   : > { %10178 = vst [vmem:[#allocation56_spill] sm:$0xff] %v9626_v45  ;;  %v4848_v45 = vadd.f32 %v9411_v23, %v9414_v33  ;;  %v5439_v29 = vadd.f32 %v7199_v43, %v5145_v30  ;;  %v9661_v23 = vld [vmem:[%s9971_s5] ss:$0 sm:$0xff]  ;;  %v5148_v35 = vadd.f32 %v9574_v50, %v4853_v27  ;;  %v5842_v50 = vld [vmem:[%s7599_s14 + $0x8] sm:$0xff] }
 0x3d9   : > { %v9628_v16 = vpop.f32.mrf.mxu1 }
 0x3da   : > { %10179 = vst [vmem:[#allocation66_spill] sm:$0xff] %v9628_v16  ;;  %v9646_v16 = vpop.f32.mrf.mxu0 }
 0x3db   : > { %v9632_v44 = vpop.f32.mrf.mxu1 }
 0x3dc   : > { %10181 = vst [vmem:[#allocation36_spill] sm:$0xff] %v9632_v44  ;;  %v5143_v44 = vadd.f32 %v5016_v34, %v4848_v45 }
 0x3dd   : > { %v9634_v14 = vpop.f32.mrf.mxu1 }
 0x3de   : > { %10182 = vst [vmem:[#allocation37_spill] sm:$0xff] %v9634_v14  ;;  %v4851_v14 = vadd.f32 %v9416_v36, %v9419_v26  ;;  %v5437_v33 = vadd.f32 %v5310_v20, %v5143_v44  ;;  %v4854_v26 = vadd.f32 %v9426_v13, %v9429_v46 }
 0x3df   : > { %v9638_v63 = vpop.f32.mrf.mxu1 }
 0x3e0   : > { %10184 = vst [vmem:[#allocation69_spill] sm:$0xff] %v9638_v63  ;;  %v4849_v63 = vadd.f32 %v9421_v25, %v9424_v60  ;;  %v5146_v28 = vadd.f32 %v7166_v8, %v4851_v14  ;;  %v4852_v25 = vadd.f32 %v9431_v54, %v9434_v47  ;;  %v9670_v60 = vld [vmem:[%s9972_s6] ss:$0 sm:$0xff]  ;;  %v5149_v13 = vadd.f32 %v9566_v61, %v4854_v26  ;;  %v5843_v54 = vld [vmem:[%s7599_s14 + $0x10] sm:$0xff] }
 0x3e1   : > { %v9642_v2 = vpop.f32.mrf.mxu1 }
 0x3e2   : > { %10185 = vst [vmem:[#allocation71_spill] sm:$0xff] %v9642_v2  ;;  %v9656_v2 = vpop.f32.mrf.mxu0  ;;  %v5144_v12 = vadd.f32 %v5019_v10, %v4849_v63  ;;  %v5440_v45 = vadd.f32 %v7200_v7, %v5146_v28  ;;  %v5147_v46 = vadd.f32 %v9568_v37, %v4852_v25  ;;  %v4858_v28 = vadd.f32 %v9446_v0, %v9449_v41 }
 0x3e3   : > { %v9648_v4 = vpop.f32.mrf.mxu1  ;;  %v4856_v41 = vadd.f32 %v9451_v58, %v9454_v55  ;;  %v4859_v58 = vadd.f32 %v9456_v22, %v9459_v38  ;;  %v4857_v55 = vadd.f32 %v9461_v5, %v9464_v59  ;;  %v5845_v59 = vld [vmem:[%s7599_s14 + $0x20] sm:$0xff] }
 0x3e4   : > { %v9672_v30 = vpop.f32.mrf.mxu0  ;;  %v5438_v10 = vadd.f32 %v9570_v18, %v5144_v12  ;;  %v5441_v15 = vadd.f32 %v9582_v3, %v5147_v46 }
 0x3e5   : > { %v9652_v42 = vpop.f32.mrf.mxu1  ;;  %v5151_v22 = vadd.f32 %v9580_v52, %v4856_v41  ;;  %v5154_v38 = vadd.f32 %v9584_v19, %v4859_v58  ;;  %v4862_v52 = vadd.f32 %v9466_v57, %v9469_v39  ;;  %v4860_v19 = vadd.f32 %v9471_v62, %v9474_v40 }
 0x3e6   : > { %v9687_v7 = vpop.f32.mrf.mxu0 }
 0x3e7   : > { %v7233_v9 = vpop.f32.mrf.mxu1  ;;  %v5445_v57 = vadd.f32 %v9606_v1, %v5151_v22  ;;  %v5448_v39 = vadd.f32 %v9612_v11, %v5154_v38  ;;  %v5157_v62 = vadd.f32 %v9590_v31, %v4862_v52  ;;  %v10187_v1 = vld [vmem:[#allocation35_spill] sm:$0xff]  ;;  %v5851_v31 = vld [vmem:[%s7599_s14 + $0x50] sm:$0xff] }
 0x3e8   : > { %v5733_v36 = vadd.f32 %v7233_v9, %v5439_v29  ;;  %v4855_v9 = vadd.f32 %v9436_v17, %v9439_v48  ;;  %v5841_v48 = vld [vmem:[%s7599_s14] sm:$0xff]  ;;  %v10188_v11 = vld [vmem:[#allocation67_spill] sm:$0xff]  ;;  %v10196_v52 = vld [vmem:[#allocation30_spill] sm:$0xff] }
 0x3e9   : > { %v5604_v14 = vpop.f32.mrf.mxu1 }
 0x3ea   : > { %v5772_v44 = vmul.f32 %v9661_v23, %v5733_v36  ;;  %v5731_v63 = vadd.f32 %v5604_v14, %v5437_v33  ;;  %v5150_v17 = vadd.f32 %v9572_v49, %v4855_v9  ;;  %v5443_v33 = vadd.f32 %v9576_v21, %v5149_v13  ;;  %v5844_v49 = vld [vmem:[%s7599_s14 + $0x18] sm:$0xff] }
 0x3eb   : > { %v7234_v47 = vpop.f32.mrf.mxu1  ;;  %v5153_v21 = vadd.f32 %v9578_v32, %v4858_v28 }
 0x3ec   : > { %v5811_v20 = vadd.f32 %v9670_v60, %v5772_v44  ;;  %v5770_v34 = vmul.f32 %v9661_v23, %v5731_v63  ;;  %v5734_v8 = vadd.f32 %v7234_v47, %v5440_v45  ;;  %v5444_v3 = vadd.f32 %v9588_v24, %v5150_v17  ;;  %v9711_v44 = vpop.f32.mrf.mxu0 }
 0x3ed   : > { %v5607_v43 = vpop.f32.mrf.mxu1  ;;  %v5442_v24 = vadd.f32 %v9594_v6, %v5148_v35  ;;  %v5447_v27 = vadd.f32 %v9600_v51, %v5153_v21 }
 0x3ee   : > { %v5875_v37 = vadd.f32 %v5843_v54, %v5811_v20  ;;  %v5809_v61 = vadd.f32 %v9670_v60, %v5770_v34  ;;  %v5773_v18 = vmul.f32 %v9661_v23, %v5734_v8  ;;  %v5732_v29 = vadd.f32 %v5607_v43, %v5438_v10  ;;  %v5847_v20 = vld [vmem:[%s7599_s14 + $0x30] sm:$0xff]  ;;  %v9731_v17 = vpop.f32.mrf.mxu0 }
 0x3ef   : > { %v7237_v12 = vpop.f32.mrf.mxu1 }
 0x3f0   : > { %v5907_v36 = vmax.f32 %v5875_v37, 0.0  ;;  %v5873_v26 = vadd.f32 %v5841_v48, %v5809_v61  ;;  %v5812_v25 = vadd.f32 %v9670_v60, %v5773_v18  ;;  %v5771_v0 = vmul.f32 %v9661_v23, %v5732_v29  ;;  %v5848_v29 = vld [vmem:[%s7599_s14 + $0x38] sm:$0xff] }
 0x3f1   : > { %v5737_v14 = vadd.f32 %v7237_v12, %v5443_v33  ;;  %v5620_v45 = vpop.f32.mrf.mxu1  ;;  %v5152_v61 = vadd.f32 %v9586_v56, %v4857_v55  ;;  %v5846_v56 = vld [vmem:[%s7599_s14 + $0x28] sm:$0xff]  ;;  %v10189_v55 = vld [vmem:[#allocation6_spill] sm:$0xff] }
 0x3f2   : > { %5939 = vst.msk [vmem:[%s9701_s15 + $0x10] sm:$0xff] %vm280_vm1, %v5907_v36  ;;  %v5905_v63 = vmax.f32 %v5873_v26, 0.0  ;;  %v5876_v9 = vadd.f32 %v5844_v49, %v5812_v25  ;;  %v5810_v13 = vadd.f32 %v9670_v60, %v5771_v0  ;;  %v5735_v46 = vadd.f32 %v5620_v45, %v5441_v15  ;;  %v9751_v36 = vpop.f32.mrf.mxu0 }
 0x3f3   : > { %v5776_v32 = vmul.f32 %v9661_v23, %v5737_v14  ;;  %v7238_v54 = vpop.f32.mrf.mxu1  ;;  %v5155_v14 = vadd.f32 %v10188_v11, %v4860_v19 }
 0x3f4   : > { %5937 = vst.msk [vmem:[%s9701_s15] sm:$0xff] %vm280_vm1, %v5905_v63  ;;  %v5908_v47 = vmax.f32 %v5876_v9, 0.0  ;;  %v5874_v10 = vadd.f32 %v5842_v50, %v5810_v13  ;;  %v5774_v34 = vmul.f32 %v9661_v23, %v5735_v46  ;;  %v5738_v8 = vadd.f32 %v7238_v54, %v5444_v3  ;;  %v10186_v3 = vld [vmem:[#allocation4_spill] sm:$0xff]  ;;  %v10192_v54 = vld [vmem:[#allocation7_spill] sm:$0xff] }
 0x3f5   : > { %v5815_v5 = vadd.f32 %v9670_v60, %v5776_v32  ;;  %v5623_v6 = vpop.f32.mrf.mxu1  ;;  %v4863_v21 = vadd.f32 %v10186_v3, %v9479_v53  ;;  %v5446_v50 = vadd.f32 %v10187_v1, %v5152_v61  ;;  %v10190_v53 = vld [vmem:[#allocation5_spill] sm:$0xff]  ;;  %v10191_v32 = vld [vmem:[#allocation8_spill] sm:$0xff] }
 0x3f6   : > { %5940 = vst.msk [vmem:[%s9701_s15 + $0x18] sm:$0xff] %vm280_vm1, %v5908_v47  ;;  %v5906_v48 = vmax.f32 %v5874_v10, 0.0  ;;  %v5813_v43 = vadd.f32 %v9670_v60, %v5774_v34  ;;  %v5777_v37 = vmul.f32 %v9661_v23, %v5738_v8  ;;  %v5736_v51 = vadd.f32 %v5623_v6, %v5442_v24  ;;  %v10193_v10 = vld [vmem:[#allocation65_spill] sm:$0xff] }
 0x3f7   : > { %v5879_v18 = vadd.f32 %v5847_v20, %v5815_v5  ;;  %v7241_v28 = vpop.f32.mrf.mxu1  ;;  %v4861_v24 = vadd.f32 %v10190_v53, %v10189_v55  ;;  %v4866_v47 = vadd.f32 %v10192_v54, %v10191_v32  ;;  %v5451_v20 = vadd.f32 %v10193_v10, %v5157_v62  ;;  %v5849_v5 = vld [vmem:[%s7599_s14 + $0x40] sm:$0xff]  ;;  %v10204_v54 = vld [vmem:[#allocation14_spill] sm:$0xff] }
 0x3f8   : > { %5938 = vst.msk [vmem:[%s9701_s15 + $0x8] sm:$0xff] %vm280_vm1, %v5906_v48  ;;  %v5877_v33 = vadd.f32 %v5845_v59, %v5813_v43  ;;  %v5816_v15 = vadd.f32 %v9670_v60, %v5777_v37  ;;  %v5775_v35 = vmul.f32 %v9661_v23, %v5736_v51  ;;  %v5741_v49 = vadd.f32 %v7241_v28, %v5447_v27  ;;  %v9771_v27 = vpop.f32.mrf.mxu0  ;;  %v10194_v48 = vld [vmem:[#allocation68_spill] sm:$0xff]  ;;  %v10195_v37 = vld [vmem:[#allocation59_spill] sm:$0xff] }
 0x3f9   : > { %v5911_v40 = vmax.f32 %v5879_v18, 0.0  ;;  %v5636_v12 = vpop.f32.mrf.mxu1  ;;  %v5449_v43 = vadd.f32 %v10194_v48, %v5155_v14  ;;  %v5158_v51 = vadd.f32 %v10195_v37, %v4863_v21  ;;  %v5156_v19 = vadd.f32 %v10196_v52, %v4861_v24  ;;  %v5852_v18 = vld [vmem:[%s7599_s14 + $0x58] sm:$0xff]  ;;  %v10199_v62 = vld [vmem:[#allocation12_spill] sm:$0xff]  ;;  %v10202_v14 = vld [vmem:[#allocation42_spill] sm:$0xff] }
 0x3fa   : > { %v5909_v26 = vmax.f32 %v5877_v33, 0.0  ;;  %v5880_v25 = vadd.f32 %v5848_v29, %v5816_v15  ;;  %v5814_v0 = vadd.f32 %v9670_v60, %v5775_v35  ;;  %v5780_v41 = vmul.f32 %v9661_v23, %v5741_v49  ;;  %v10197_v49 = vld [vmem:[#allocation10_spill] sm:$0xff]  ;;  %v9792_v3 = vpop.f32.mrf.mxu0  ;;  %v10207_v37 = vld [vmem:[#allocation16_spill] sm:$0xff] }
 0x3fb   : > { %5943 = vst.msk [vmem:[%s9701_s15 + $0x30] sm:$0xff] %vm280_vm1, %v5911_v40  ;;  %v5739_v45 = vadd.f32 %v5636_v12, %v5445_v57  ;;  %v7242_v63 = vpop.f32.mrf.mxu1  ;;  %v10198_v57 = vld [vmem:[#allocation9_spill] sm:$0xff]  ;;  %v10200_v40 = vld [vmem:[#allocation11_spill] sm:$0xff]  ;;  %v10209_v52 = vld [vmem:[#allocation18_spill] sm:$0xff] }
 0x3fc   : > { %5941 = vst.msk [vmem:[%s9701_s15 + $0x20] sm:$0xff] %vm280_vm1, %v5909_v26  ;;  %v5912_v9 = vmax.f32 %v5880_v25, 0.0  ;;  %v5878_v13 = vadd.f32 %v5846_v56, %v5814_v0  ;;  %v5819_v46 = vadd.f32 %v9670_v60, %v5780_v41  ;;  %v5742_v58 = vadd.f32 %v7242_v63, %v5448_v39  ;;  %v10201_v12 = vld [vmem:[#allocation31_spill] sm:$0xff]  ;;  %v5850_v0 = vld [vmem:[%s7599_s14 + $0x48] sm:$0xff]  ;;  %v10203_v63 = vld [vmem:[#allocation70_spill] sm:$0xff] }
 0x3fd   : > { %v5778_v34 = vmul.f32 %v9661_v23, %v5739_v45  ;;  %v5639_v8 = vpop.f32.mrf.mxu1  ;;  %v4864_v39 = vadd.f32 %v10198_v57, %v10197_v49  ;;  %v4867_v56 = vadd.f32 %v10200_v40, %v10199_v62  ;;  %v5161_v26 = vadd.f32 %v10201_v12, %v4866_v47  ;;  %v10205_v47 = vld [vmem:[#allocation13_spill] sm:$0xff]  ;;  %v10211_v62 = vld [vmem:[#allocation62_spill] sm:$0xff] }
 0x3fe   : > { %5944 = vst.msk [vmem:[%s9701_s15 + $0x38] sm:$0xff] %vm280_vm1, %v5912_v9  ;;  %v5910_v22 = vmax.f32 %v5878_v13, 0.0  ;;  %v5883_v38 = vadd.f32 %v5851_v31, %v5819_v46  ;;  %v5781_v59 = vmul.f32 %v9661_v23, %v5742_v58  ;;  %v5740_v6 = vadd.f32 %v5639_v8, %v5446_v50  ;;  %v5855_v46 = vld [vmem:[%s7599_s14 + $0x70] sm:$0xff] }
 0x3ff   : > { %v5817_v61 = vadd.f32 %v9670_v60, %v5778_v34  ;;  %v7245_v29 = vpop.f32.mrf.mxu1  ;;  %v5452_v31 = vadd.f32 %v10202_v14, %v5158_v51  ;;  %v5450_v45 = vadd.f32 %v9646_v16, %v5156_v19  ;;  %v5159_v9 = vadd.f32 %v10203_v63, %v4864_v39  ;;  %v10206_v34 = vld [vmem:[#allocation60_spill] sm:$0xff]  ;;  %v10210_v19 = vld [vmem:[#allocation17_spill] sm:$0xff] }
 0x400   : > { %5942 = vst.msk [vmem:[%s9701_s15 + $0x28] sm:$0xff] %vm280_vm1, %v5910_v22  ;;  %v5915_v28 = vmax.f32 %v5883_v38, 0.0  ;;  %v5820_v33 = vadd.f32 %v9670_v60, %v5781_v59  ;;  %v5779_v15 = vmul.f32 %v9661_v23, %v5740_v6  ;;  %v5745_v35 = vadd.f32 %v7245_v29, %v5451_v20  ;;  %v5853_v16 = vld [vmem:[%s7599_s14 + $0x60] sm:$0xff] }
 0x401   : > { %v5881_v25 = vadd.f32 %v5849_v5, %v5817_v61  ;;  %v5652_v41 = vpop.f32.mrf.mxu1  ;;  %v4865_v10 = vadd.f32 %v10205_v47, %v10204_v54  ;;  %v5455_v20 = vadd.f32 %v9656_v2, %v5161_v26  ;;  %v5162_v8 = vadd.f32 %v10206_v34, %v4867_v56  ;;  %v9811_v5 = vpop.f32.mrf.mxu0  ;;  %v10208_v2 = vld [vmem:[#allocation15_spill] sm:$0xff]  ;;  %v10212_v56 = vld [vmem:[#allocation32_spill] sm:$0xff]  ;;  %v5854_v26 = vld [vmem:[%s7599_s14 + $0x68] sm:$0xff] }
 0x402   : > { %5947 = vst.msk [vmem:[%s9701_s15 + $0x50] sm:$0xff] %vm280_vm1, %v5915_v28  ;;  %v5884_v21 = vadd.f32 %v5852_v18, %v5820_v33  ;;  %v5818_v1 = vadd.f32 %v9670_v60, %v5779_v15  ;;  %v5784_v50 = vmul.f32 %v9661_v23, %v5745_v35  ;;  %v5743_v11 = vadd.f32 %v5652_v41, %v5449_v43  ;;  %v5856_v35 = vld [vmem:[%s7599_s14 + $0x78] sm:$0xff] }
 0x403   : > { %v5913_v13 = vmax.f32 %v5881_v25, 0.0  ;;  %v7246_v58 = vpop.f32.mrf.mxu1  ;;  %v4870_v51 = vadd.f32 %v10208_v2, %v10207_v37  ;;  %v4868_v61 = vadd.f32 %v10210_v19, %v10209_v52  ;;  %v5453_v18 = vadd.f32 %v9672_v30, %v5159_v9  ;;  %v10217_v9 = vld [vmem:[#allocation33_spill] sm:$0xff]  ;;  %v5860_v19 = vld [vmem:[%s7599_s14 + $0x98] sm:$0xff] }
 0x404   : > { %v5916_v55 = vmax.f32 %v5884_v21, 0.0  ;;  %v5882_v53 = vadd.f32 %v5850_v0, %v5818_v1  ;;  %v5823_v24 = vadd.f32 %v9670_v60, %v5784_v50  ;;  %v5782_v32 = vmul.f32 %v9661_v23, %v5743_v11  ;;  %v9831_v0 = vpop.f32.mrf.mxu0  ;;  %v10213_v50 = vld [vmem:[#allocation52_spill] sm:$0xff]  ;;  %v10214_v11 = vld [vmem:[#allocation54_spill] sm:$0xff]  ;;  %v10219_v37 = vld [vmem:[#allocation21_spill] sm:$0xff] }
 0x405   : > { %5945 = vst.msk [vmem:[%s9701_s15 + $0x40] sm:$0xff] %vm280_vm1, %v5913_v13  ;;  %v5746_v22 = vadd.f32 %v7246_v58, %v5452_v31  ;;  %v5655_v38 = vpop.f32.mrf.mxu1  ;;  %v5456_v39 = vadd.f32 %v9687_v7, %v5162_v8  ;;  %v5160_v40 = vadd.f32 %v10211_v62, %v4865_v10  ;;  %v5165_v12 = vadd.f32 %v10212_v56, %v4870_v51  ;;  %v10215_v31 = vld [vmem:[#allocation58_spill] sm:$0xff]  ;;  %v10220_v2 = vld [vmem:[#allocation53_spill] sm:$0xff] }
 0x406   : > { %5948 = vst.msk [vmem:[%s9701_s15 + $0x58] sm:$0xff] %vm280_vm1, %v5916_v55  ;;  %v5914_v59 = vmax.f32 %v5882_v53, 0.0  ;;  %v5887_v6 = vadd.f32 %v5855_v46, %v5823_v24  ;;  %v5821_v48 = vadd.f32 %v9670_v60, %v5782_v32  ;;  %v5744_v43 = vadd.f32 %v5655_v38, %v5450_v45  ;;  %v10216_v45 = vld [vmem:[#allocation26_spill] sm:$0xff]  ;;  %v9851_v38 = vpop.f32.mrf.mxu0 }
 0x407   : > { %v5785_v29 = vmul.f32 %v9661_v23, %v5746_v22  ;;  %v7249_v28 = vpop.f32.mrf.mxu1  ;;  %v4871_v14 = vadd.f32 %v10214_v11, %v10213_v50  ;;  %v4869_v63 = vadd.f32 %v10216_v45, %v10215_v31  ;;  %v5163_v13 = vadd.f32 %v10217_v9, %v4868_v61  ;;  %v5859_v58 = vld [vmem:[%s7599_s14 + $0x90] sm:$0xff]  ;;  %v10226_v50 = vld [vmem:[#allocation56_spill] sm:$0xff] }
 0x408   : > { %5946 = vst.msk [vmem:[%s9701_s15 + $0x48] sm:$0xff] %vm280_vm1, %v5914_v59  ;;  %v5919_v33 = vmax.f32 %v5887_v6, 0.0  ;;  %v5885_v15 = vadd.f32 %v5853_v16, %v5821_v48  ;;  %v5783_v49 = vmul.f32 %v9661_v23, %v5744_v43  ;;  %v5749_v57 = vadd.f32 %v7249_v28, %v5455_v20  ;;  %v10218_v20 = vld [vmem:[#allocation63_spill] sm:$0xff]  ;;  %v5857_v16 = vld [vmem:[%s7599_s14 + $0x80] sm:$0xff]  ;;  %v5863_v45 = vld [vmem:[%s7599_s14 + $0xb0] sm:$0xff] }
 0x409   : > { %v5824_v30 = vadd.f32 %v9670_v60, %v5785_v29  ;;  %v5668_v25 = vpop.f32.mrf.mxu1  ;;  %v5454_v47 = vadd.f32 %v9711_v44, %v5160_v40  ;;  %v5459_v10 = vadd.f32 %v9731_v17, %v5165_v12  ;;  %v5166_v34 = vadd.f32 %v10218_v20, %v4871_v14  ;;  %v10221_v17 = vld [vmem:[#allocation77_spill] sm:$0xff]  ;;  %v10227_v14 = vld [vmem:[#allocation66_spill] sm:$0xff] }
 0x40a   : > { %5951 = vst.msk [vmem:[%s9701_s15 + $0x70] sm:$0xff] %vm280_vm1, %v5919_v33  ;;  %v5917_v41 = vmax.f32 %v5885_v15, 0.0  ;;  %v5822_v21 = vadd.f32 %v9670_v60, %v5783_v49  ;;  %v5788_v1 = vmul.f32 %v9661_v23, %v5749_v57  ;;  %v5747_v7 = vadd.f32 %v5668_v25, %v5453_v18  ;;  %v10223_v49 = vld [vmem:[#allocation19_spill] sm:$0xff] }
 0x40b   : > { %v5888_v46 = vadd.f32 %v5856_v35, %v5824_v30  ;;  %v7250_v55 = vpop.f32.mrf.mxu1  ;;  %v4874_v51 = vadd.f32 %v10220_v2, %v10219_v37  ;;  %v5457_v44 = vadd.f32 %v9751_v36, %v5163_v13  ;;  %v5164_v52 = vadd.f32 %v10221_v17, %v4869_v63  ;;  %v10222_v35 = vld [vmem:[#allocation20_spill] sm:$0xff]  ;;  %v10224_v36 = vld [vmem:[#allocation23_spill] sm:$0xff]  ;;  %v5409_v30 = vpop.f32.mrf.mxu0  ;;  %v10233_v2 = vld [vmem:[#allocation37_spill] sm:$0xff] }
 0x40c   : > { %5949 = vst.msk [vmem:[%s9701_s15 + $0x60] sm:$0xff] %vm280_vm1, %v5917_v41  ;;  %v5886_v53 = vadd.f32 %v5854_v26, %v5822_v21  ;;  %v5827_v24 = vadd.f32 %v9670_v60, %v5788_v1  ;;  %v5786_v32 = vmul.f32 %v9661_v23, %v5747_v7  ;;  %v5750_v54 = vadd.f32 %v7250_v55, %v5456_v39  ;;  %v10225_v39 = vld [vmem:[#allocation22_spill] sm:$0xff]  ;;  %v5858_v41 = vld [vmem:[%s7599_s14 + $0x88] sm:$0xff]  ;;  %v5864_v17 = vld [vmem:[%s7599_s14 + $0xb8] sm:$0xff] }
 0x40d   : > { %v5920_v8 = vmax.f32 %v5888_v46, 0.0  ;;  %v5671_v22 = vpop.f32.mrf.mxu1  ;;  %v4872_v57 = vadd.f32 %v10223_v49, %v10222_v35  ;;  %v4875_v62 = vadd.f32 %v10225_v39, %v10224_v36  ;;  %v5460_v40 = vadd.f32 %v9771_v27, %v5166_v34  ;;  %v7227_v9 = vpop.f32.mrf.mxu0  ;;  %v10236_v49 = vld [vmem:[#allocation69_spill] sm:$0xff] }
 0x40e   : > { %v5918_v59 = vmax.f32 %v5886_v53, 0.0  ;;  %v5891_v6 = vadd.f32 %v5859_v58, %v5827_v24  ;;  %v5825_v48 = vadd.f32 %v9670_v60, %v5786_v32  ;;  %v5789_v43 = vmul.f32 %v9661_v23, %v5750_v54  ;;  %v10229_v53 = vld [vmem:[#allocation61_spill] sm:$0xff]  ;;  %v10231_v54 = vld [vmem:[#allocation24_spill] sm:$0xff] }
 0x40f   : > { %5952 = vst.msk [vmem:[%s9701_s15 + $0x78] sm:$0xff] %vm280_vm1, %v5920_v8  ;;  %v5748_v61 = vadd.f32 %v5671_v22, %v5454_v47  ;;  %v7253_v18 = vpop.f32.mrf.mxu1  ;;  %v5458_v7 = vadd.f32 %v9792_v3, %v5164_v52  ;;  %v5169_v11 = vadd.f32 %v10226_v50, %v4874_v51  ;;  %v5167_v27 = vadd.f32 %v10227_v14, %v4872_v57  ;;  %v10228_v3 = vld [vmem:[#allocation55_spill] sm:$0xff]  ;;  %v10230_v32 = vld [vmem:[#allocation25_spill] sm:$0xff]  ;;  %v5861_v8 = vld [vmem:[%s7599_s14 + $0xa0] sm:$0xff] }
 0x410   : > { %5950 = vst.msk [vmem:[%s9701_s15 + $0x68] sm:$0xff] %vm280_vm1, %v5918_v59  ;;  %v5923_v29 = vmax.f32 %v5891_v6, 0.0  ;;  %v5889_v28 = vadd.f32 %v5857_v16, %v5825_v48  ;;  %v5828_v33 = vadd.f32 %v9670_v60, %v5789_v43  ;;  %v5753_v15 = vadd.f32 %v7253_v18, %v5459_v10  ;;  %v10232_v10 = vld [vmem:[#allocation36_spill] sm:$0xff]  ;;  %v5862_v57 = vld [vmem:[%s7599_s14 + $0xa8] sm:$0xff] }
 0x411   : > { %v5787_v56 = vmul.f32 %v9661_v23, %v5748_v61  ;;  %v5684_v12 = vpop.f32.mrf.mxu1  ;;  %v4873_v24 = vadd.f32 %v10229_v53, %v10228_v3  ;;  %v4878_v47 = vadd.f32 %v10231_v54, %v10230_v32  ;;  %v5170_v20 = vadd.f32 %v10232_v10, %v4875_v62  ;;  %v5865_v53 = vld [vmem:[%s7599_s14 + $0xc0] sm:$0xff] }
 0x412   : > { %5955 = vst.msk [vmem:[%s9701_s15 + $0x90] sm:$0xff] %vm280_vm1, %v5923_v29  ;;  %v5921_v26 = vmax.f32 %v5889_v28, 0.0  ;;  %v5892_v25 = vadd.f32 %v5860_v19, %v5828_v33  ;;  %v5792_v21 = vmul.f32 %v9661_v23, %v5753_v15  ;;  %v5751_v1 = vadd.f32 %v5684_v12, %v5457_v44  ;;  %v5422_v19 = vpop.f32.mrf.mxu0  ;;  %v10234_v33 = vld [vmem:[#allocation64_spill] sm:$0xff]  ;;  %v10235_v15 = vld [vmem:[#allocation27_spill] sm:$0xff] }
 0x413   : > { %v5826_v31 = vadd.f32 %v9670_v60, %v5787_v56  ;;  %v7254_v63 = vpop.f32.mrf.mxu1  ;;  %v5463_v43 = vadd.f32 %v9811_v5, %v5169_v11  ;;  %v5461_v37 = vadd.f32 %v9831_v0, %v5167_v27  ;;  %v5168_v51 = vadd.f32 %v10233_v2, %v4873_v24  ;;  %v5866_v2 = vld [vmem:[%s7599_s14 + $0xc8] sm:$0xff] }
 0x414   : > { %5953 = vst.msk [vmem:[%s9701_s15 + $0x80] sm:$0xff] %vm280_vm1, %v5921_v26  ;;  %v5924_v13 = vmax.f32 %v5892_v25, 0.0  ;;  %v5831_v46 = vadd.f32 %v9670_v60, %v5792_v21  ;;  %v5790_v58 = vmul.f32 %v9661_v23, %v5751_v1  ;;  %v5754_v55 = vadd.f32 %v7254_v63, %v5460_v40  ;;  %v10237_v26 = vld [vmem:[#allocation28_spill] sm:$0xff]  ;;  %v10238_v25 = vld [vmem:[#allocation57_spill] sm:$0xff]  ;;  %v7228_v14 = vpop.f32.mrf.mxu0 }
 0x415   : > { %v5890_v34 = vadd.f32 %v5858_v41, %v5826_v31  ;;  %v5687_v16 = vpop.f32.mrf.mxu1  ;;  %v4876_v35 = vadd.f32 %v10235_v15, %v10234_v33  ;;  %v5464_v5 = vadd.f32 %v9851_v38, %v5170_v20  ;;  %v5173_v0 = vadd.f32 %v10236_v49, %v4878_v47  ;;  %v10239_v38 = vld [vmem:[#allocation34_spill] sm:$0xff]  ;;  %v10240_v21 = vld [vmem:[#allocation29_spill] sm:$0xff] }
 0x416   : > { %5956 = vst.msk [vmem:[%s9701_s15 + $0x98] sm:$0xff] %vm280_vm1, %v5924_v13  ;;  %v5895_v22 = vadd.f32 %v5863_v45, %v5831_v46  ;;  %v5829_v59 = vadd.f32 %v9670_v60, %v5790_v58  ;;  %v5793_v6 = vmul.f32 %v9661_v23, %v5754_v55  ;;  %v5752_v48 = vadd.f32 %v5687_v16, %v5458_v7  ;;  %v5867_v45 = vld [vmem:[%s7599_s14 + $0xd0] sm:$0xff]  ;;  %v10241_v46 = vld [vmem:[#allocation71_spill] sm:$0xff]  ;;  %v5425_v16 = vpop.f32.mrf.mxu0 }
 0x417   : > { %v5922_v44 = vmax.f32 %v5890_v34, 0.0  ;;  %v7257_v52 = vpop.f32.mrf.mxu1  ;;  %v4879_v41 = vadd.f32 %v10238_v25, %v10237_v26  ;;  %v4877_v1 = vadd.f32 %v10240_v21, %v10239_v38  ;;  %v5462_v7 = vadd.f32 %v5409_v30, %v5168_v51  ;;  %v5870_v38 = vld [vmem:[%s7599_s14 + $0xe8] sm:$0xff] }
 0x418   : > { %v5927_v61 = vmax.f32 %v5895_v22, 0.0  ;;  %v5893_v18 = vadd.f32 %v5861_v8, %v5829_v59  ;;  %v5832_v29 = vadd.f32 %v9670_v60, %v5793_v6  ;;  %v5791_v28 = vmul.f32 %v9661_v23, %v5752_v48  ;;  %v5868_v8 = vld [vmem:[%s7599_s14 + $0xd8] sm:$0xff] }
 0x419   : > { %5954 = vst.msk [vmem:[%s9701_s15 + $0x88] sm:$0xff] %vm280_vm1, %v5922_v44  ;;  %v5757_v36 = vadd.f32 %v7257_v52, %v5463_v43  ;;  %v5700_v39 = vpop.f32.mrf.mxu1  ;;  %v5171_v58 = vadd.f32 %v10241_v46, %v4876_v35  ;;  %v5467_v55 = vadd.f32 %v7227_v9, %v5173_v0  ;;  %v5174_v30 = vadd.f32 %v9648_v4, %v4879_v41 }
 0x41a   : > { %5959 = vst.msk [vmem:[%s9701_s15 + $0xb0] sm:$0xff] %vm280_vm1, %v5927_v61  ;;  %v5925_v62 = vmax.f32 %v5893_v18, 0.0  ;;  %v5896_v40 = vadd.f32 %v5864_v17, %v5832_v29  ;;  %v5830_v56 = vadd.f32 %v9670_v60, %v5791_v28  ;;  %v5755_v12 = vadd.f32 %v5700_v39, %v5461_v37  ;;  %v5871_v18 = vld [vmem:[%s7599_s14 + $0xf0] sm:$0xff] }
 0x41b   : > { %v5796_v50 = vmul.f32 %v9661_v23, %v5757_v36  ;;  %v7258_v11 = vpop.f32.mrf.mxu1  ;;  %v5172_v20 = vadd.f32 %v9652_v42, %v4877_v1  ;;  %v5465_v48 = vadd.f32 %v5422_v19, %v5171_v58  ;;  %v5468_v43 = vadd.f32 %v7228_v14, %v5174_v30  ;;  %v5869_v36 = vld [vmem:[%s7599_s14 + $0xe0] sm:$0xff] }
 0x41c   : > { %5957 = vst.msk [vmem:[%s9701_s15 + $0xa0] sm:$0xff] %vm280_vm1, %v5925_v62  ;;  %v5928_v27 = vmax.f32 %v5896_v40, 0.0  ;;  %v5894_v31 = vadd.f32 %v5862_v57, %v5830_v56  ;;  %v5794_v63 = vmul.f32 %v9661_v23, %v5755_v12  ;;  %v5758_v13 = vadd.f32 %v7258_v11, %v5464_v5  ;;  %v5872_v56 = vld [vmem:[%s7599_s14 + $0xf8] sm:$0xff] }
 0x41d   : > { %v5835_v3 = vadd.f32 %v9670_v60, %v5796_v50  ;;  %v5703_v24 = vpop.f32.mrf.mxu1  ;;  %v5466_v61 = vadd.f32 %v5425_v16, %v5172_v20 }
 0x41e   : > { %5960 = vst.msk [vmem:[%s9701_s15 + $0xb8] sm:$0xff] %vm280_vm1, %v5928_v27  ;;  %v5926_v32 = vmax.f32 %v5894_v31, 0.0  ;;  %v5833_v54 = vadd.f32 %v9670_v60, %v5794_v63  ;;  %v5797_v47 = vmul.f32 %v9661_v23, %v5758_v13  ;;  %v5756_v10 = vadd.f32 %v5703_v24, %v5462_v7 }
 0x41f   : > { %v5899_v34 = vadd.f32 %v5867_v45, %v5835_v3  ;;  %v7261_v9 = vpop.f32.mrf.mxu1 }
 0x420   : > { %5958 = vst.msk [vmem:[%s9701_s15 + $0xa8] sm:$0xff] %vm280_vm1, %v5926_v32  ;;  %v5897_v4 = vadd.f32 %v5865_v53, %v5833_v54  ;;  %v5836_v22 = vadd.f32 %v9670_v60, %v5797_v47  ;;  %v5795_v59 = vmul.f32 %v9661_v23, %v5756_v10  ;;  %v5761_v6 = vadd.f32 %v7261_v9, %v5467_v55 }
 0x421   : > { %v5931_v37 = vmax.f32 %v5899_v34, 0.0  ;;  %v5716_v42 = vpop.f32.mrf.mxu1 }
 0x422   : > { %v5929_v51 = vmax.f32 %v5897_v4, 0.0  ;;  %v5900_v44 = vadd.f32 %v5868_v8, %v5836_v22  ;;  %v5834_v17 = vadd.f32 %v9670_v60, %v5795_v59  ;;  %v5800_v52 = vmul.f32 %v9661_v23, %v5761_v6 }
 0x423   : > { %5963 = vst.msk [vmem:[%s9701_s15 + $0xd0] sm:$0xff] %vm280_vm1, %v5931_v37  ;;  %v5759_v29 = vadd.f32 %v5716_v42, %v5465_v48  ;;  %v7262_v28 = vpop.f32.mrf.mxu1 }
 0x424   : > { %5961 = vst.msk [vmem:[%s9701_s15 + $0xc0] sm:$0xff] %vm280_vm1, %v5929_v51  ;;  %v5932_v19 = vmax.f32 %v5900_v44, 0.0  ;;  %v5898_v33 = vadd.f32 %v5866_v2, %v5834_v17  ;;  %v5839_v15 = vadd.f32 %v9670_v60, %v5800_v52  ;;  %v5762_v35 = vadd.f32 %v7262_v28, %v5468_v43 }
 0x425   : > { %v5798_v5 = vmul.f32 %v9661_v23, %v5759_v29  ;;  %v5719_v49 = vpop.f32.mrf.mxu1 }
 0x426   : > { %5964 = vst.msk [vmem:[%s9701_s15 + $0xd8] sm:$0xff] %vm280_vm1, %v5932_v19  ;;  %v5930_v0 = vmax.f32 %v5898_v33, 0.0  ;;  %v5903_v57 = vadd.f32 %v5871_v18, %v5839_v15  ;;  %v5801_v39 = vmul.f32 %v9661_v23, %v5762_v35  ;;  %v5760_v62 = vadd.f32 %v5719_v49, %v5466_v61 }
 0x427   : > { %v5837_v40 = vadd.f32 %v9670_v60, %v5798_v5 }
 0x428   : > { %5962 = vst.msk [vmem:[%s9701_s15 + $0xc8] sm:$0xff] %vm280_vm1, %v5930_v0  ;;  %v5935_v12 = vmax.f32 %v5903_v57, 0.0  ;;  %v5840_v26 = vadd.f32 %v9670_v60, %v5801_v39  ;;  %v5799_v25 = vmul.f32 %v9661_v23, %v5760_v62 }
 0x429   : > { %v5901_v41 = vadd.f32 %v5869_v36, %v5837_v40 }
 0x42a   : > { %5967 = vst.msk [vmem:[%s9701_s15 + $0xf0] sm:$0xff] %vm280_vm1, %v5935_v12  ;;  %v5904_v21 = vadd.f32 %v5872_v56, %v5840_v26  ;;  %v5838_v1 = vadd.f32 %v9670_v60, %v5799_v25 }
 0x42b   : > { %v5933_v7 = vmax.f32 %v5901_v41, 0.0 }
 0x42c   : > { %v5936_v50 = vmax.f32 %v5904_v21, 0.0  ;;  %v5902_v11 = vadd.f32 %v5870_v38, %v5838_v1 }
 0x42d   : > { %5965 = vst.msk [vmem:[%s9701_s15 + $0xe0] sm:$0xff] %vm280_vm1, %v5933_v7 }
 0x42e   : > { %5968 = vst.msk [vmem:[%s9701_s15 + $0xf8] sm:$0xff] %vm280_vm1, %v5936_v50  ;;  %v5934_v14 = vmax.f32 %v5902_v11, 0.0 }
 0x430   : > { %5966 = vst.msk [vmem:[%s9701_s15 + $0xe8] sm:$0xff] %vm280_vm1, %v5934_v14 }
 0x431 PF: > { %s17_s24 = sadd.s32 1, %s7296_s24  }
 0x432   : > { %p14_p4 = scmp.ge.s32.totalorder %s17_s24, 4  }
 0x434   :  { %16 = sbr.rel (!%p14_p4) target bundleno = 1 (0x1), region = 98 }

</bundles_post_ra>
